<compile_context>
chip_gen: v5e
topology: v5e:2x2
jax: 0.10.0
libtpu: 0.0.40
codegen_flags: <defaults>
</compile_context>

<pallas_src>
import jax
import jax.numpy as jnp
from jax.experimental import pallas as pl
from jax.experimental.pallas import tpu as pltpu


def _fused_forward_kernel(x_ref, w1_ref, b1_ref, w2_ref, b2_ref, w3_ref, b3_ref,
                          fc1w_ref, fc1b_ref, fc2w_ref, fc2b_ref,
                          o_ref, a3_ref, flat_ref):
    f32 = jnp.float32

    def pool2_bias_relu(y, b_col):
        # y: (C, Lc) conv output (Lc even). returns relu(max_pool1d(y, 2) + b) -> (C, Lc//2)
        _, Lc = y.shape
        Lp = Lc // 2
        r = jax.lax.broadcasted_iota(jnp.int32, (Lc, Lp), 0)
        c = jax.lax.broadcasted_iota(jnp.int32, (Lc, Lp), 1)
        s_even = (r == 2 * c).astype(f32)          # picks columns 0,2,4,...
        s_odd = (r == 2 * c + 1).astype(f32)       # picks columns 1,3,5,...
        p_even = jnp.dot(y, s_even, preferred_element_type=f32)
        p_odd = jnp.dot(y, s_odd, preferred_element_type=f32)
        return jnp.maximum(jnp.maximum(p_even, p_odd) + b_col, 0.0)

    # ---------------- conv1 (Cin = 1): shifted MACs on the VPU ----------------
    x = x_ref[0]                                   # (1, L0)
    L0 = x.shape[1]
    Lc1 = L0 - 2
    y1 = w1_ref[:, 0:1] * x[:, 0:Lc1]
    y1 = y1 + w1_ref[:, 1:2] * x[:, 1:1 + Lc1]
    y1 = y1 + w1_ref[:, 2:3] * x[:, 2:2 + Lc1]     # (18, 428)
    a1 = pool2_bias_relu(y1, b1_ref[...])          # (18, 214)

    # ---------------- conv2: 3 shifted (Cout,Cin)@(Cin,L) MXU matmuls ----------------
    Lc2 = a1.shape[1] - 2
    y2 = jnp.dot(w2_ref[0], a1[:, 0:Lc2], preferred_element_type=f32)
    y2 = y2 + jnp.dot(w2_ref[1], a1[:, 1:1 + Lc2], preferred_element_type=f32)
    y2 = y2 + jnp.dot(w2_ref[2], a1[:, 2:2 + Lc2], preferred_element_type=f32)
    a2 = pool2_bias_relu(y2, b2_ref[...])          # (36, 106)

    # ---------------- conv3 ----------------
    Lc3 = a2.shape[1] - 2
    y3 = jnp.dot(w3_ref[0], a2[:, 0:Lc3], preferred_element_type=f32)
    y3 = y3 + jnp.dot(w3_ref[1], a2[:, 1:1 + Lc3], preferred_element_type=f32)
    y3 = y3 + jnp.dot(w3_ref[2], a2[:, 2:2 + Lc3], preferred_element_type=f32)
    a3 = pool2_bias_relu(y3, b3_ref[...])          # (72, 52)

    # ---------- channel-major flatten (== torch .view) into a VMEM scratch row ----------
    C3, L3 = a3.shape
    a3_ref[...] = a3
    for ch in range(C3):
        flat_ref[:, pl.ds(ch * L3, L3)] = a3_ref[pl.ds(ch, 1), :]
    a3f = flat_ref[...]                            # (1, C3*L3)

    # ---------------- fc1 + ReLU + fc2 + log_softmax ----------------
    # fc weights are kept in their native torch layout; contract on their dim 1 (trans-B matmul)
    h = jax.lax.dot_general(a3f, fc1w_ref[...], (((1,), (1,)), ((), ())),
                            preferred_element_type=f32) + fc1b_ref[...]
    h = jnp.maximum(h, 0.0)                        # F.dropout is identity at inference
    logits = jax.lax.dot_general(h, fc2w_ref[...], (((1,), (1,)), ((), ())),
                                 preferred_element_type=f32) + fc2b_ref[...]
    m = jnp.max(logits, axis=-1, keepdims=True)
    s = logits - m
    lse = jnp.log(jnp.sum(jnp.exp(s), axis=-1, keepdims=True))
    o_ref[0] = s - lse


def forward_fn(x, params):
    B, Cin, L0 = x.shape
    C1 = params["w1"].shape[0]
    C2 = params["w2"].shape[0]
    C3 = params["w3"].shape[0]
    nlabel = params["fc2_w"].shape[0]

    L1 = (L0 - 2) // 2
    L2 = (L1 - 2) // 2
    L3 = (L2 - 2) // 2
    flat = C3 * L3
    assert flat == params["fc1_w"].shape[1], "input length inconsistent with fc1 in_features"

    # tiny weight re-arrangements (all <10 KB); the big fc1 weight is passed untouched
    w1m = params["w1"].reshape(C1, 3)                   # (18, 3)
    b1c = params["b1"].reshape(C1, 1)
    w2k = jnp.transpose(params["w2"], (2, 0, 1))        # (3, 36, 18)
    b2c = params["b2"].reshape(C2, 1)
    w3k = jnp.transpose(params["w3"], (2, 0, 1))        # (3, 72, 36)
    b3c = params["b3"].reshape(C3, 1)
    fc1w = params["fc1_w"]                              # (72, 3744)  native layout
    fc1b = params["fc1_b"].reshape(1, -1)
    fc2w = params["fc2_w"]                              # (nlabel, 72) native layout
    fc2b = params["fc2_b"].reshape(1, nlabel)

    out = pl.pallas_call(
        _fused_forward_kernel,
        out_shape=jax.ShapeDtypeStruct((B, 1, nlabel), jnp.float32),
        grid_spec=pltpu.PrefetchScalarGridSpec(
            num_scalar_prefetch=0,
            grid=(B,),
            in_specs=[
                pl.BlockSpec((1, Cin, L0), lambda b: (b, 0, 0)),
                pl.BlockSpec(w1m.shape, lambda b: (0, 0)),
                pl.BlockSpec(b1c.shape, lambda b: (0, 0)),
                pl.BlockSpec(w2k.shape, lambda b: (0, 0, 0)),
                pl.BlockSpec(b2c.shape, lambda b: (0, 0)),
                pl.BlockSpec(w3k.shape, lambda b: (0, 0, 0)),
                pl.BlockSpec(b3c.shape, lambda b: (0, 0)),
                pl.BlockSpec(fc1w.shape, lambda b: (0, 0)),
                pl.BlockSpec(fc1b.shape, lambda b: (0, 0)),
                pl.BlockSpec(fc2w.shape, lambda b: (0, 0)),
                pl.BlockSpec(fc2b.shape, lambda b: (0, 0)),
            ],
            out_specs=pl.BlockSpec((1, 1, nlabel), lambda b: (b, 0, 0)),
            scratch_shapes=[
                pltpu.VMEM((C3, L3), jnp.float32),      # a3 staging
                pltpu.VMEM((1, flat), jnp.float32),     # flattened activation row
            ],
        ),
        compiler_params=pltpu.CompilerParams(
            dimension_semantics=("parallel",),
        ),
    )(x, w1m, b1c, w2k, b2c, w3k, b3c, fc1w, fc1b, fc2w, fc2b)
    return out.reshape(B, nlabel)


forward = jax.jit(forward_fn)


if __name__ == "__main__":
    nlabel = 10
    key = jax.random.PRNGKey(0)
    keys = jax.random.split(key, 11)
    params = dict(
        w1=jax.random.normal(keys[0], (18, 1, 3), jnp.float32) * 0.10,
        b1=jax.random.normal(keys[1], (18,), jnp.float32) * 0.10,
        w2=jax.random.normal(keys[2], (36, 18, 3), jnp.float32) * 0.05,
        b2=jax.random.normal(keys[3], (36,), jnp.float32) * 0.05,
        w3=jax.random.normal(keys[4], (72, 36, 3), jnp.float32) * 0.05,
        b3=jax.random.normal(keys[5], (72,), jnp.float32) * 0.05,
        fc1_w=jax.random.normal(keys[6], (72, 3744), jnp.float32) * 0.02,
        fc1_b=jax.random.normal(keys[7], (72,), jnp.float32) * 0.02,
        fc2_w=jax.random.normal(keys[8], (nlabel, 72), jnp.float32) * 0.10,
        fc2_b=jax.random.normal(keys[9], (nlabel,), jnp.float32) * 0.10,
    )

    # Input: (batch=2, channels=1, length=430) — length chosen so flatten size == 3744 (fc1 in_features)
    x = jax.random.normal(keys[10], (2, 1, 430), jnp.float32)

    out = forward(x, params)
    jax.block_until_ready(out)
    assert out.shape == (2, nlabel)
    # rows of log_softmax should (approximately) exponentiate-sum to 1
    assert jnp.allclose(jnp.sum(jnp.exp(out), axis=-1), 1.0, atol=1e-4)
    print("KERNEL_OK")
</pallas_src>

<mosaic_0001>
module attributes {stable_mosaic.version = 11 : i64} {
  func.func @_fused_forward_kernel(%arg0: i32, %arg1: memref<1x1x430xf32, #tpu.memory_space<vmem>>, %arg2: memref<18x3xf32, #tpu.memory_space<vmem>>, %arg3: memref<18x1xf32, #tpu.memory_space<vmem>>, %arg4: memref<3x36x18xf32, #tpu.memory_space<vmem>>, %arg5: memref<36x1xf32, #tpu.memory_space<vmem>>, %arg6: memref<3x72x36xf32, #tpu.memory_space<vmem>>, %arg7: memref<72x1xf32, #tpu.memory_space<vmem>>, %arg8: memref<72x3744xf32, #tpu.memory_space<vmem>>, %arg9: memref<1x72xf32, #tpu.memory_space<vmem>>, %arg10: memref<10x72xf32, #tpu.memory_space<vmem>>, %arg11: memref<1x10xf32, #tpu.memory_space<vmem>>, %arg12: memref<1x1x10xf32, #tpu.memory_space<vmem>>, %arg13: memref<72x52xf32, #tpu.memory_space<vmem>>, %arg14: memref<1x3744xf32, #tpu.memory_space<vmem>>) attributes {dimension_semantics = [#tpu.dimension_semantics<parallel>], iteration_bounds = array<i64: 2>, scalar_prefetch = 0 : i64, scratch_operands = 2 : i64, tpu.core_type = #tpu.core_type<tc>, window_params = [{transform_indices = @transform_0, window_bounds = array<i64: 1, 1, 430>}, {pipeline_mode = #tpu.pipeline_mode<synchronous>, transform_indices = @transform_1, window_bounds = array<i64: 18, 3>}, {pipeline_mode = #tpu.pipeline_mode<synchronous>, transform_indices = @transform_2, window_bounds = array<i64: 18, 1>}, {pipeline_mode = #tpu.pipeline_mode<synchronous>, transform_indices = @transform_3, window_bounds = array<i64: 3, 36, 18>}, {pipeline_mode = #tpu.pipeline_mode<synchronous>, transform_indices = @transform_4, window_bounds = array<i64: 36, 1>}, {pipeline_mode = #tpu.pipeline_mode<synchronous>, transform_indices = @transform_5, window_bounds = array<i64: 3, 72, 36>}, {pipeline_mode = #tpu.pipeline_mode<synchronous>, transform_indices = @transform_6, window_bounds = array<i64: 72, 1>}, {pipeline_mode = #tpu.pipeline_mode<synchronous>, transform_indices = @transform_7, window_bounds = array<i64: 72, 3744>}, {pipeline_mode = #tpu.pipeline_mode<synchronous>, transform_indices = @transform_8, window_bounds = array<i64: 1, 72>}, {pipeline_mode = #tpu.pipeline_mode<synchronous>, transform_indices = @transform_9, window_bounds = array<i64: 10, 72>}, {pipeline_mode = #tpu.pipeline_mode<synchronous>, transform_indices = @transform_10, window_bounds = array<i64: 1, 10>}, {transform_indices = @transform_11, window_bounds = array<i64: 1, 1, 10>}]} {
    %c0 = arith.constant 0 : index
    %c0_0 = arith.constant 0 : index
    %c0_1 = arith.constant 0 : index
    %0 = vector.load %arg1[%c0, %c0_0, %c0_1] : memref<1x1x430xf32, #tpu.memory_space<vmem>>, vector<1x1x430xf32>
    %1 = vector.shape_cast %0 : vector<1x1x430xf32> to vector<1x430xf32>
    %c0_2 = arith.constant 0 : index
    %c0_3 = arith.constant 0 : index
    %2 = vector.load %arg2[%c0_2, %c0_3] : memref<18x3xf32, #tpu.memory_space<vmem>>, vector<18x1xf32>
    %3 = vector.extract_strided_slice %1 {offsets = [0, 0], sizes = [1, 428], strides = [1, 1]} : vector<1x430xf32> to vector<1x428xf32>
    %4 = vector.broadcast %2 : vector<18x1xf32> to vector<18x428xf32>
    %5 = vector.broadcast %3 : vector<1x428xf32> to vector<18x428xf32>
    %6 = arith.mulf %4, %5 : vector<18x428xf32>
    %c0_4 = arith.constant 0 : index
    %c1 = arith.constant 1 : index
    %7 = vector.load %arg2[%c0_4, %c1] : memref<18x3xf32, #tpu.memory_space<vmem>>, vector<18x1xf32>
    %8 = vector.extract_strided_slice %1 {offsets = [0, 1], sizes = [1, 428], strides = [1, 1]} : vector<1x430xf32> to vector<1x428xf32>
    %9 = vector.broadcast %7 : vector<18x1xf32> to vector<18x428xf32>
    %10 = vector.broadcast %8 : vector<1x428xf32> to vector<18x428xf32>
    %11 = arith.mulf %9, %10 : vector<18x428xf32>
    %12 = arith.addf %6, %11 : vector<18x428xf32>
    %c0_5 = arith.constant 0 : index
    %c2 = arith.constant 2 : index
    %13 = vector.load %arg2[%c0_5, %c2] : memref<18x3xf32, #tpu.memory_space<vmem>>, vector<18x1xf32>
    %14 = vector.extract_strided_slice %1 {offsets = [0, 2], sizes = [1, 428], strides = [1, 1]} : vector<1x430xf32> to vector<1x428xf32>
    %15 = vector.broadcast %13 : vector<18x1xf32> to vector<18x428xf32>
    %16 = vector.broadcast %14 : vector<1x428xf32> to vector<18x428xf32>
    %17 = arith.mulf %15, %16 : vector<18x428xf32>
    %18 = arith.addf %12, %17 : vector<18x428xf32>
    %c0_6 = arith.constant 0 : index
    %c0_7 = arith.constant 0 : index
    %19 = vector.load %arg3[%c0_6, %c0_7] : memref<18x1xf32, #tpu.memory_space<vmem>>, vector<18x1xf32>
    %20 = tpu.iota {dimensions = array<i32: 0>} : vector<428x214xi32>
    %21 = tpu.iota {dimensions = array<i32: 1>} : vector<428x214xi32>
    %c2_i32 = arith.constant 2 : i32
    %22 = vector.broadcast %c2_i32 : i32 to vector<428x214xi32>
    %23 = arith.muli %22, %21 : vector<428x214xi32>
    %24 = arith.cmpi eq, %20, %23 : vector<428x214xi32>
    %25 = arith.extui %24 : vector<428x214xi1> to vector<428x214xi32>
    %26 = arith.sitofp %25 : vector<428x214xi32> to vector<428x214xf32>
    %c2_i32_8 = arith.constant 2 : i32
    %27 = vector.broadcast %c2_i32_8 : i32 to vector<428x214xi32>
    %28 = arith.muli %27, %21 : vector<428x214xi32>
    %c1_i32 = arith.constant 1 : i32
    %29 = vector.broadcast %c1_i32 : i32 to vector<428x214xi32>
    %30 = arith.addi %28, %29 : vector<428x214xi32>
    %31 = arith.cmpi eq, %20, %30 : vector<428x214xi32>
    %32 = arith.extui %31 : vector<428x214xi1> to vector<428x214xi32>
    %33 = arith.sitofp %32 : vector<428x214xi32> to vector<428x214xf32>
    %cst = arith.constant dense<0.000000e+00> : vector<18x214xf32>
    %34 = tpu.matmul %18, %26, %cst {dimension_numbers = #tpu.dot_dimension_numbers<[1], [0], [0], [1], [0, 0, 1, 1], [], []>} : vector<18x428xf32>, vector<428x214xf32>, vector<18x214xf32> -> vector<18x214xf32>
    %cst_9 = arith.constant dense<0.000000e+00> : vector<18x214xf32>
    %35 = tpu.matmul %18, %33, %cst_9 {dimension_numbers = #tpu.dot_dimension_numbers<[1], [0], [0], [1], [0, 0, 1, 1], [], []>} : vector<18x428xf32>, vector<428x214xf32>, vector<18x214xf32> -> vector<18x214xf32>
    %36 = arith.maximumf %34, %35 : vector<18x214xf32>
    %37 = vector.broadcast %19 : vector<18x1xf32> to vector<18x214xf32>
    %38 = arith.addf %36, %37 : vector<18x214xf32>
    %cst_10 = arith.constant 0.000000e+00 : f32
    %39 = vector.broadcast %cst_10 : f32 to vector<18x214xf32>
    %40 = arith.maximumf %38, %39 : vector<18x214xf32>
    %c0_11 = arith.constant 0 : index
    %c0_12 = arith.constant 0 : index
    %c0_13 = arith.constant 0 : index
    %41 = vector.load %arg4[%c0_11, %c0_12, %c0_13] : memref<3x36x18xf32, #tpu.memory_space<vmem>>, vector<1x36x18xf32>
    %42 = vector.shape_cast %41 : vector<1x36x18xf32> to vector<36x18xf32>
    %43 = vector.extract_strided_slice %40 {offsets = [0, 0], sizes = [18, 212], strides = [1, 1]} : vector<18x214xf32> to vector<18x212xf32>
    %cst_14 = arith.constant dense<0.000000e+00> : vector<36x212xf32>
    %44 = tpu.matmul %42, %43, %cst_14 {dimension_numbers = #tpu.dot_dimension_numbers<[1], [0], [0], [1], [0, 0, 1, 1], [], []>} : vector<36x18xf32>, vector<18x212xf32>, vector<36x212xf32> -> vector<36x212xf32>
    %c1_15 = arith.constant 1 : index
    %c0_16 = arith.constant 0 : index
    %c0_17 = arith.constant 0 : index
    %45 = vector.load %arg4[%c1_15, %c0_16, %c0_17] : memref<3x36x18xf32, #tpu.memory_space<vmem>>, vector<1x36x18xf32>
    %46 = vector.shape_cast %45 : vector<1x36x18xf32> to vector<36x18xf32>
    %47 = vector.extract_strided_slice %40 {offsets = [0, 1], sizes = [18, 212], strides = [1, 1]} : vector<18x214xf32> to vector<18x212xf32>
    %cst_18 = arith.constant dense<0.000000e+00> : vector<36x212xf32>
    %48 = tpu.matmul %46, %47, %cst_18 {dimension_numbers = #tpu.dot_dimension_numbers<[1], [0], [0], [1], [0, 0, 1, 1], [], []>} : vector<36x18xf32>, vector<18x212xf32>, vector<36x212xf32> -> vector<36x212xf32>
    %49 = arith.addf %44, %48 : vector<36x212xf32>
    %c2_19 = arith.constant 2 : index
    %c0_20 = arith.constant 0 : index
    %c0_21 = arith.constant 0 : index
    %50 = vector.load %arg4[%c2_19, %c0_20, %c0_21] : memref<3x36x18xf32, #tpu.memory_space<vmem>>, vector<1x36x18xf32>
    %51 = vector.shape_cast %50 : vector<1x36x18xf32> to vector<36x18xf32>
    %52 = vector.extract_strided_slice %40 {offsets = [0, 2], sizes = [18, 212], strides = [1, 1]} : vector<18x214xf32> to vector<18x212xf32>
    %cst_22 = arith.constant dense<0.000000e+00> : vector<36x212xf32>
    %53 = tpu.matmul %51, %52, %cst_22 {dimension_numbers = #tpu.dot_dimension_numbers<[1], [0], [0], [1], [0, 0, 1, 1], [], []>} : vector<36x18xf32>, vector<18x212xf32>, vector<36x212xf32> -> vector<36x212xf32>
    %54 = arith.addf %49, %53 : vector<36x212xf32>
    %c0_23 = arith.constant 0 : index
    %c0_24 = arith.constant 0 : index
    %55 = vector.load %arg5[%c0_23, %c0_24] : memref<36x1xf32, #tpu.memory_space<vmem>>, vector<36x1xf32>
    %56 = tpu.iota {dimensions = array<i32: 0>} : vector<212x106xi32>
    %57 = tpu.iota {dimensions = array<i32: 1>} : vector<212x106xi32>
    %c2_i32_25 = arith.constant 2 : i32
    %58 = vector.broadcast %c2_i32_25 : i32 to vector<212x106xi32>
    %59 = arith.muli %58, %57 : vector<212x106xi32>
    %60 = arith.cmpi eq, %56, %59 : vector<212x106xi32>
    %61 = arith.extui %60 : vector<212x106xi1> to vector<212x106xi32>
    %62 = arith.sitofp %61 : vector<212x106xi32> to vector<212x106xf32>
    %c2_i32_26 = arith.constant 2 : i32
    %63 = vector.broadcast %c2_i32_26 : i32 to vector<212x106xi32>
    %64 = arith.muli %63, %57 : vector<212x106xi32>
    %c1_i32_27 = arith.constant 1 : i32
    %65 = vector.broadcast %c1_i32_27 : i32 to vector<212x106xi32>
    %66 = arith.addi %64, %65 : vector<212x106xi32>
    %67 = arith.cmpi eq, %56, %66 : vector<212x106xi32>
    %68 = arith.extui %67 : vector<212x106xi1> to vector<212x106xi32>
    %69 = arith.sitofp %68 : vector<212x106xi32> to vector<212x106xf32>
    %cst_28 = arith.constant dense<0.000000e+00> : vector<36x106xf32>
    %70 = tpu.matmul %54, %62, %cst_28 {dimension_numbers = #tpu.dot_dimension_numbers<[1], [0], [0], [1], [0, 0, 1, 1], [], []>} : vector<36x212xf32>, vector<212x106xf32>, vector<36x106xf32> -> vector<36x106xf32>
    %cst_29 = arith.constant dense<0.000000e+00> : vector<36x106xf32>
    %71 = tpu.matmul %54, %69, %cst_29 {dimension_numbers = #tpu.dot_dimension_numbers<[1], [0], [0], [1], [0, 0, 1, 1], [], []>} : vector<36x212xf32>, vector<212x106xf32>, vector<36x106xf32> -> vector<36x106xf32>
    %72 = arith.maximumf %70, %71 : vector<36x106xf32>
    %73 = vector.broadcast %55 : vector<36x1xf32> to vector<36x106xf32>
    %74 = arith.addf %72, %73 : vector<36x106xf32>
    %cst_30 = arith.constant 0.000000e+00 : f32
    %75 = vector.broadcast %cst_30 : f32 to vector<36x106xf32>
    %76 = arith.maximumf %74, %75 : vector<36x106xf32>
    %c0_31 = arith.constant 0 : index
    %c0_32 = arith.constant 0 : index
    %c0_33 = arith.constant 0 : index
    %77 = vector.load %arg6[%c0_31, %c0_32, %c0_33] : memref<3x72x36xf32, #tpu.memory_space<vmem>>, vector<1x72x36xf32>
    %78 = vector.shape_cast %77 : vector<1x72x36xf32> to vector<72x36xf32>
    %79 = vector.extract_strided_slice %76 {offsets = [0, 0], sizes = [36, 104], strides = [1, 1]} : vector<36x106xf32> to vector<36x104xf32>
    %cst_34 = arith.constant dense<0.000000e+00> : vector<72x104xf32>
    %80 = tpu.matmul %78, %79, %cst_34 {dimension_numbers = #tpu.dot_dimension_numbers<[1], [0], [0], [1], [0, 0, 1, 1], [], []>} : vector<72x36xf32>, vector<36x104xf32>, vector<72x104xf32> -> vector<72x104xf32>
    %c1_35 = arith.constant 1 : index
    %c0_36 = arith.constant 0 : index
    %c0_37 = arith.constant 0 : index
    %81 = vector.load %arg6[%c1_35, %c0_36, %c0_37] : memref<3x72x36xf32, #tpu.memory_space<vmem>>, vector<1x72x36xf32>
    %82 = vector.shape_cast %81 : vector<1x72x36xf32> to vector<72x36xf32>
    %83 = vector.extract_strided_slice %76 {offsets = [0, 1], sizes = [36, 104], strides = [1, 1]} : vector<36x106xf32> to vector<36x104xf32>
    %cst_38 = arith.constant dense<0.000000e+00> : vector<72x104xf32>
    %84 = tpu.matmul %82, %83, %cst_38 {dimension_numbers = #tpu.dot_dimension_numbers<[1], [0], [0], [1], [0, 0, 1, 1], [], []>} : vector<72x36xf32>, vector<36x104xf32>, vector<72x104xf32> -> vector<72x104xf32>
    %85 = arith.addf %80, %84 : vector<72x104xf32>
    %c2_39 = arith.constant 2 : index
    %c0_40 = arith.constant 0 : index
    %c0_41 = arith.constant 0 : index
    %86 = vector.load %arg6[%c2_39, %c0_40, %c0_41] : memref<3x72x36xf32, #tpu.memory_space<vmem>>, vector<1x72x36xf32>
    %87 = vector.shape_cast %86 : vector<1x72x36xf32> to vector<72x36xf32>
    %88 = vector.extract_strided_slice %76 {offsets = [0, 2], sizes = [36, 104], strides = [1, 1]} : vector<36x106xf32> to vector<36x104xf32>
    %cst_42 = arith.constant dense<0.000000e+00> : vector<72x104xf32>
    %89 = tpu.matmul %87, %88, %cst_42 {dimension_numbers = #tpu.dot_dimension_numbers<[1], [0], [0], [1], [0, 0, 1, 1], [], []>} : vector<72x36xf32>, vector<36x104xf32>, vector<72x104xf32> -> vector<72x104xf32>
    %90 = arith.addf %85, %89 : vector<72x104xf32>
    %c0_43 = arith.constant 0 : index
    %c0_44 = arith.constant 0 : index
    %91 = vector.load %arg7[%c0_43, %c0_44] : memref<72x1xf32, #tpu.memory_space<vmem>>, vector<72x1xf32>
    %92 = tpu.iota {dimensions = array<i32: 0>} : vector<104x52xi32>
    %93 = tpu.iota {dimensions = array<i32: 1>} : vector<104x52xi32>
    %c2_i32_45 = arith.constant 2 : i32
    %94 = vector.broadcast %c2_i32_45 : i32 to vector<104x52xi32>
    %95 = arith.muli %94, %93 : vector<104x52xi32>
    %96 = arith.cmpi eq, %92, %95 : vector<104x52xi32>
    %97 = arith.extui %96 : vector<104x52xi1> to vector<104x52xi32>
    %98 = arith.sitofp %97 : vector<104x52xi32> to vector<104x52xf32>
    %c2_i32_46 = arith.constant 2 : i32
    %99 = vector.broadcast %c2_i32_46 : i32 to vector<104x52xi32>
    %100 = arith.muli %99, %93 : vector<104x52xi32>
    %c1_i32_47 = arith.constant 1 : i32
    %101 = vector.broadcast %c1_i32_47 : i32 to vector<104x52xi32>
    %102 = arith.addi %100, %101 : vector<104x52xi32>
    %103 = arith.cmpi eq, %92, %102 : vector<104x52xi32>
    %104 = arith.extui %103 : vector<104x52xi1> to vector<104x52xi32>
    %105 = arith.sitofp %104 : vector<104x52xi32> to vector<104x52xf32>
    %cst_48 = arith.constant dense<0.000000e+00> : vector<72x52xf32>
    %106 = tpu.matmul %90, %98, %cst_48 {dimension_numbers = #tpu.dot_dimension_numbers<[1], [0], [0], [1], [0, 0, 1, 1], [], []>} : vector<72x104xf32>, vector<104x52xf32>, vector<72x52xf32> -> vector<72x52xf32>
    %cst_49 = arith.constant dense<0.000000e+00> : vector<72x52xf32>
    %107 = tpu.matmul %90, %105, %cst_49 {dimension_numbers = #tpu.dot_dimension_numbers<[1], [0], [0], [1], [0, 0, 1, 1], [], []>} : vector<72x104xf32>, vector<104x52xf32>, vector<72x52xf32> -> vector<72x52xf32>
    %108 = arith.maximumf %106, %107 : vector<72x52xf32>
    %109 = vector.broadcast %91 : vector<72x1xf32> to vector<72x52xf32>
    %110 = arith.addf %108, %109 : vector<72x52xf32>
    %cst_50 = arith.constant 0.000000e+00 : f32
    %111 = vector.broadcast %cst_50 : f32 to vector<72x52xf32>
    %112 = arith.maximumf %110, %111 : vector<72x52xf32>
    %c0_51 = arith.constant 0 : index
    %c0_52 = arith.constant 0 : index
    %113 = vector.load %arg13[%c0_51, %c0_52] : memref<72x52xf32, #tpu.memory_space<vmem>>, vector<72x52xf32>
    tpu.vector_store %arg13[%c0_51, %c0_52], %112 {strides = array<i32>} : memref<72x52xf32, #tpu.memory_space<vmem>>, vector<72x52xf32>,
    %c0_53 = arith.constant 0 : index
    %c0_54 = arith.constant 0 : index
    %114 = vector.load %arg13[%c0_53, %c0_54] : memref<72x52xf32, #tpu.memory_space<vmem>>, vector<1x52xf32>
    %c0_55 = arith.constant 0 : index
    %c0_56 = arith.constant 0 : index
    %115 = vector.load %arg14[%c0_55, %c0_56] : memref<1x3744xf32, #tpu.memory_space<vmem>>, vector<1x52xf32>
    tpu.vector_store %arg14[%c0_55, %c0_56], %114 {strides = array<i32>} : memref<1x3744xf32, #tpu.memory_space<vmem>>, vector<1x52xf32>,
    %c1_57 = arith.constant 1 : index
    %c0_58 = arith.constant 0 : index
    %116 = vector.load %arg13[%c1_57, %c0_58] : memref<72x52xf32, #tpu.memory_space<vmem>>, vector<1x52xf32>
    %c0_59 = arith.constant 0 : index
    %c52 = arith.constant 52 : index
    %117 = vector.load %arg14[%c0_59, %c52] : memref<1x3744xf32, #tpu.memory_space<vmem>>, vector<1x52xf32>
    tpu.vector_store %arg14[%c0_59, %c52], %116 {strides = array<i32>} : memref<1x3744xf32, #tpu.memory_space<vmem>>, vector<1x52xf32>,
    %c2_60 = arith.constant 2 : index
    %c0_61 = arith.constant 0 : index
    %118 = vector.load %arg13[%c2_60, %c0_61] : memref<72x52xf32, #tpu.memory_space<vmem>>, vector<1x52xf32>
    %c0_62 = arith.constant 0 : index
    %c104 = arith.constant 104 : index
    %119 = vector.load %arg14[%c0_62, %c104] : memref<1x3744xf32, #tpu.memory_space<vmem>>, vector<1x52xf32>
    tpu.vector_store %arg14[%c0_62, %c104], %118 {strides = array<i32>} : memref<1x3744xf32, #tpu.memory_space<vmem>>, vector<1x52xf32>,
    %c3 = arith.constant 3 : index
    %c0_63 = arith.constant 0 : index
    %120 = vector.load %arg13[%c3, %c0_63] : memref<72x52xf32, #tpu.memory_space<vmem>>, vector<1x52xf32>
    %c0_64 = arith.constant 0 : index
    %c156 = arith.constant 156 : index
    %121 = vector.load %arg14[%c0_64, %c156] : memref<1x3744xf32, #tpu.memory_space<vmem>>, vector<1x52xf32>
    tpu.vector_store %arg14[%c0_64, %c156], %120 {strides = array<i32>} : memref<1x3744xf32, #tpu.memory_space<vmem>>, vector<1x52xf32>,
    %c4 = arith.constant 4 : index
    %c0_65 = arith.constant 0 : index
    %122 = vector.load %arg13[%c4, %c0_65] : memref<72x52xf32, #tpu.memory_space<vmem>>, vector<1x52xf32>
    %c0_66 = arith.constant 0 : index
    %c208 = arith.constant 208 : index
    %123 = vector.load %arg14[%c0_66, %c208] : memref<1x3744xf32, #tpu.memory_space<vmem>>, vector<1x52xf32>
    tpu.vector_store %arg14[%c0_66, %c208], %122 {strides = array<i32>} : memref<1x3744xf32, #tpu.memory_space<vmem>>, vector<1x52xf32>,
    %c5 = arith.constant 5 : index
    %c0_67 = arith.constant 0 : index
    %124 = vector.load %arg13[%c5, %c0_67] : memref<72x52xf32, #tpu.memory_space<vmem>>, vector<1x52xf32>
    %c0_68 = arith.constant 0 : index
    %c260 = arith.constant 260 : index
    %125 = vector.load %arg14[%c0_68, %c260] : memref<1x3744xf32, #tpu.memory_space<vmem>>, vector<1x52xf32>
    tpu.vector_store %arg14[%c0_68, %c260], %124 {strides = array<i32>} : memref<1x3744xf32, #tpu.memory_space<vmem>>, vector<1x52xf32>,
    %c6 = arith.constant 6 : index
    %c0_69 = arith.constant 0 : index
    %126 = vector.load %arg13[%c6, %c0_69] : memref<72x52xf32, #tpu.memory_space<vmem>>, vector<1x52xf32>
    %c0_70 = arith.constant 0 : index
    %c312 = arith.constant 312 : index
    %127 = vector.load %arg14[%c0_70, %c312] : memref<1x3744xf32, #tpu.memory_space<vmem>>, vector<1x52xf32>
    tpu.vector_store %arg14[%c0_70, %c312], %126 {strides = array<i32>} : memref<1x3744xf32, #tpu.memory_space<vmem>>, vector<1x52xf32>,
    %c7 = arith.constant 7 : index
    %c0_71 = arith.constant 0 : index
    %128 = vector.load %arg13[%c7, %c0_71] : memref<72x52xf32, #tpu.memory_space<vmem>>, vector<1x52xf32>
    %c0_72 = arith.constant 0 : index
    %c364 = arith.constant 364 : index
    %129 = vector.load %arg14[%c0_72, %c364] : memref<1x3744xf32, #tpu.memory_space<vmem>>, vector<1x52xf32>
    tpu.vector_store %arg14[%c0_72, %c364], %128 {strides = array<i32>} : memref<1x3744xf32, #tpu.memory_space<vmem>>, vector<1x52xf32>,
    %c8 = arith.constant 8 : index
    %c0_73 = arith.constant 0 : index
    %130 = vector.load %arg13[%c8, %c0_73] : memref<72x52xf32, #tpu.memory_space<vmem>>, vector<1x52xf32>
    %c0_74 = arith.constant 0 : index
    %c416 = arith.constant 416 : index
    %131 = vector.load %arg14[%c0_74, %c416] : memref<1x3744xf32, #tpu.memory_space<vmem>>, vector<1x52xf32>
    tpu.vector_store %arg14[%c0_74, %c416], %130 {strides = array<i32>} : memref<1x3744xf32, #tpu.memory_space<vmem>>, vector<1x52xf32>,
    %c9 = arith.constant 9 : index
    %c0_75 = arith.constant 0 : index
    %132 = vector.load %arg13[%c9, %c0_75] : memref<72x52xf32, #tpu.memory_space<vmem>>, vector<1x52xf32>
    %c0_76 = arith.constant 0 : index
    %c468 = arith.constant 468 : index
    %133 = vector.load %arg14[%c0_76, %c468] : memref<1x3744xf32, #tpu.memory_space<vmem>>, vector<1x52xf32>
    tpu.vector_store %arg14[%c0_76, %c468], %132 {strides = array<i32>} : memref<1x3744xf32, #tpu.memory_space<vmem>>, vector<1x52xf32>,
    %c10 = arith.constant 10 : index
    %c0_77 = arith.constant 0 : index
    %134 = vector.load %arg13[%c10, %c0_77] : memref<72x52xf32, #tpu.memory_space<vmem>>, vector<1x52xf32>
    %c0_78 = arith.constant 0 : index
    %c520 = arith.constant 520 : index
    %135 = vector.load %arg14[%c0_78, %c520] : memref<1x3744xf32, #tpu.memory_space<vmem>>, vector<1x52xf32>
    tpu.vector_store %arg14[%c0_78, %c520], %134 {strides = array<i32>} : memref<1x3744xf32, #tpu.memory_space<vmem>>, vector<1x52xf32>,
    %c11 = arith.constant 11 : index
    %c0_79 = arith.constant 0 : index
    %136 = vector.load %arg13[%c11, %c0_79] : memref<72x52xf32, #tpu.memory_space<vmem>>, vector<1x52xf32>
    %c0_80 = arith.constant 0 : index
    %c572 = arith.constant 572 : index
    %137 = vector.load %arg14[%c0_80, %c572] : memref<1x3744xf32, #tpu.memory_space<vmem>>, vector<1x52xf32>
    tpu.vector_store %arg14[%c0_80, %c572], %136 {strides = array<i32>} : memref<1x3744xf32, #tpu.memory_space<vmem>>, vector<1x52xf32>,
    %c12 = arith.constant 12 : index
    %c0_81 = arith.constant 0 : index
    %138 = vector.load %arg13[%c12, %c0_81] : memref<72x52xf32, #tpu.memory_space<vmem>>, vector<1x52xf32>
    %c0_82 = arith.constant 0 : index
    %c624 = arith.constant 624 : index
    %139 = vector.load %arg14[%c0_82, %c624] : memref<1x3744xf32, #tpu.memory_space<vmem>>, vector<1x52xf32>
    tpu.vector_store %arg14[%c0_82, %c624], %138 {strides = array<i32>} : memref<1x3744xf32, #tpu.memory_space<vmem>>, vector<1x52xf32>,
    %c13 = arith.constant 13 : index
    %c0_83 = arith.constant 0 : index
    %140 = vector.load %arg13[%c13, %c0_83] : memref<72x52xf32, #tpu.memory_space<vmem>>, vector<1x52xf32>
    %c0_84 = arith.constant 0 : index
    %c676 = arith.constant 676 : index
    %141 = vector.load %arg14[%c0_84, %c676] : memref<1x3744xf32, #tpu.memory_space<vmem>>, vector<1x52xf32>
    tpu.vector_store %arg14[%c0_84, %c676], %140 {strides = array<i32>} : memref<1x3744xf32, #tpu.memory_space<vmem>>, vector<1x52xf32>,
    %c14 = arith.constant 14 : index
    %c0_85 = arith.constant 0 : index
    %142 = vector.load %arg13[%c14, %c0_85] : memref<72x52xf32, #tpu.memory_space<vmem>>, vector<1x52xf32>
    %c0_86 = arith.constant 0 : index
    %c728 = arith.constant 728 : index
    %143 = vector.load %arg14[%c0_86, %c728] : memref<1x3744xf32, #tpu.memory_space<vmem>>, vector<1x52xf32>
    tpu.vector_store %arg14[%c0_86, %c728], %142 {strides = array<i32>} : memref<1x3744xf32, #tpu.memory_space<vmem>>, vector<1x52xf32>,
    %c15 = arith.constant 15 : index
    %c0_87 = arith.constant 0 : index
    %144 = vector.load %arg13[%c15, %c0_87] : memref<72x52xf32, #tpu.memory_space<vmem>>, vector<1x52xf32>
    %c0_88 = arith.constant 0 : index
    %c780 = arith.constant 780 : index
    %145 = vector.load %arg14[%c0_88, %c780] : memref<1x3744xf32, #tpu.memory_space<vmem>>, vector<1x52xf32>
    tpu.vector_store %arg14[%c0_88, %c780], %144 {strides = array<i32>} : memref<1x3744xf32, #tpu.memory_space<vmem>>, vector<1x52xf32>,
    %c16 = arith.constant 16 : index
    %c0_89 = arith.constant 0 : index
    %146 = vector.load %arg13[%c16, %c0_89] : memref<72x52xf32, #tpu.memory_space<vmem>>, vector<1x52xf32>
    %c0_90 = arith.constant 0 : index
    %c832 = arith.constant 832 : index
    %147 = vector.load %arg14[%c0_90, %c832] : memref<1x3744xf32, #tpu.memory_space<vmem>>, vector<1x52xf32>
    tpu.vector_store %arg14[%c0_90, %c832], %146 {strides = array<i32>} : memref<1x3744xf32, #tpu.memory_space<vmem>>, vector<1x52xf32>,
    %c17 = arith.constant 17 : index
    %c0_91 = arith.constant 0 : index
    %148 = vector.load %arg13[%c17, %c0_91] : memref<72x52xf32, #tpu.memory_space<vmem>>, vector<1x52xf32>
    %c0_92 = arith.constant 0 : index
    %c884 = arith.constant 884 : index
    %149 = vector.load %arg14[%c0_92, %c884] : memref<1x3744xf32, #tpu.memory_space<vmem>>, vector<1x52xf32>
    tpu.vector_store %arg14[%c0_92, %c884], %148 {strides = array<i32>} : memref<1x3744xf32, #tpu.memory_space<vmem>>, vector<1x52xf32>,
    %c18 = arith.constant 18 : index
    %c0_93 = arith.constant 0 : index
    %150 = vector.load %arg13[%c18, %c0_93] : memref<72x52xf32, #tpu.memory_space<vmem>>, vector<1x52xf32>
    %c0_94 = arith.constant 0 : index
    %c936 = arith.constant 936 : index
    %151 = vector.load %arg14[%c0_94, %c936] : memref<1x3744xf32, #tpu.memory_space<vmem>>, vector<1x52xf32>
    tpu.vector_store %arg14[%c0_94, %c936], %150 {strides = array<i32>} : memref<1x3744xf32, #tpu.memory_space<vmem>>, vector<1x52xf32>,
    %c19 = arith.constant 19 : index
    %c0_95 = arith.constant 0 : index
    %152 = vector.load %arg13[%c19, %c0_95] : memref<72x52xf32, #tpu.memory_space<vmem>>, vector<1x52xf32>
    %c0_96 = arith.constant 0 : index
    %c988 = arith.constant 988 : index
    %153 = vector.load %arg14[%c0_96, %c988] : memref<1x3744xf32, #tpu.memory_space<vmem>>, vector<1x52xf32>
    tpu.vector_store %arg14[%c0_96, %c988], %152 {strides = array<i32>} : memref<1x3744xf32, #tpu.memory_space<vmem>>, vector<1x52xf32>,
    %c20 = arith.constant 20 : index
    %c0_97 = arith.constant 0 : index
    %154 = vector.load %arg13[%c20, %c0_97] : memref<72x52xf32, #tpu.memory_space<vmem>>, vector<1x52xf32>
    %c0_98 = arith.constant 0 : index
    %c1040 = arith.constant 1040 : index
    %155 = vector.load %arg14[%c0_98, %c1040] : memref<1x3744xf32, #tpu.memory_space<vmem>>, vector<1x52xf32>
    tpu.vector_store %arg14[%c0_98, %c1040], %154 {strides = array<i32>} : memref<1x3744xf32, #tpu.memory_space<vmem>>, vector<1x52xf32>,
    %c21 = arith.constant 21 : index
    %c0_99 = arith.constant 0 : index
    %156 = vector.load %arg13[%c21, %c0_99] : memref<72x52xf32, #tpu.memory_space<vmem>>, vector<1x52xf32>
    %c0_100 = arith.constant 0 : index
    %c1092 = arith.constant 1092 : index
    %157 = vector.load %arg14[%c0_100, %c1092] : memref<1x3744xf32, #tpu.memory_space<vmem>>, vector<1x52xf32>
    tpu.vector_store %arg14[%c0_100, %c1092], %156 {strides = array<i32>} : memref<1x3744xf32, #tpu.memory_space<vmem>>, vector<1x52xf32>,
    %c22 = arith.constant 22 : index
    %c0_101 = arith.constant 0 : index
    %158 = vector.load %arg13[%c22, %c0_101] : memref<72x52xf32, #tpu.memory_space<vmem>>, vector<1x52xf32>
    %c0_102 = arith.constant 0 : index
    %c1144 = arith.constant 1144 : index
    %159 = vector.load %arg14[%c0_102, %c1144] : memref<1x3744xf32, #tpu.memory_space<vmem>>, vector<1x52xf32>
    tpu.vector_store %arg14[%c0_102, %c1144], %158 {strides = array<i32>} : memref<1x3744xf32, #tpu.memory_space<vmem>>, vector<1x52xf32>,
    %c23 = arith.constant 23 : index
    %c0_103 = arith.constant 0 : index
    %160 = vector.load %arg13[%c23, %c0_103] : memref<72x52xf32, #tpu.memory_space<vmem>>, vector<1x52xf32>
    %c0_104 = arith.constant 0 : index
    %c1196 = arith.constant 1196 : index
    %161 = vector.load %arg14[%c0_104, %c1196] : memref<1x3744xf32, #tpu.memory_space<vmem>>, vector<1x52xf32>
    tpu.vector_store %arg14[%c0_104, %c1196], %160 {strides = array<i32>} : memref<1x3744xf32, #tpu.memory_space<vmem>>, vector<1x52xf32>,
    %c24 = arith.constant 24 : index
    %c0_105 = arith.constant 0 : index
    %162 = vector.load %arg13[%c24, %c0_105] : memref<72x52xf32, #tpu.memory_space<vmem>>, vector<1x52xf32>
    %c0_106 = arith.constant 0 : index
    %c1248 = arith.constant 1248 : index
    %163 = vector.load %arg14[%c0_106, %c1248] : memref<1x3744xf32, #tpu.memory_space<vmem>>, vector<1x52xf32>
    tpu.vector_store %arg14[%c0_106, %c1248], %162 {strides = array<i32>} : memref<1x3744xf32, #tpu.memory_space<vmem>>, vector<1x52xf32>,
    %c25 = arith.constant 25 : index
    %c0_107 = arith.constant 0 : index
    %164 = vector.load %arg13[%c25, %c0_107] : memref<72x52xf32, #tpu.memory_space<vmem>>, vector<1x52xf32>
    %c0_108 = arith.constant 0 : index
    %c1300 = arith.constant 1300 : index
    %165 = vector.load %arg14[%c0_108, %c1300] : memref<1x3744xf32, #tpu.memory_space<vmem>>, vector<1x52xf32>
    tpu.vector_store %arg14[%c0_108, %c1300], %164 {strides = array<i32>} : memref<1x3744xf32, #tpu.memory_space<vmem>>, vector<1x52xf32>,
    %c26 = arith.constant 26 : index
    %c0_109 = arith.constant 0 : index
    %166 = vector.load %arg13[%c26, %c0_109] : memref<72x52xf32, #tpu.memory_space<vmem>>, vector<1x52xf32>
    %c0_110 = arith.constant 0 : index
    %c1352 = arith.constant 1352 : index
    %167 = vector.load %arg14[%c0_110, %c1352] : memref<1x3744xf32, #tpu.memory_space<vmem>>, vector<1x52xf32>
    tpu.vector_store %arg14[%c0_110, %c1352], %166 {strides = array<i32>} : memref<1x3744xf32, #tpu.memory_space<vmem>>, vector<1x52xf32>,
    %c27 = arith.constant 27 : index
    %c0_111 = arith.constant 0 : index
    %168 = vector.load %arg13[%c27, %c0_111] : memref<72x52xf32, #tpu.memory_space<vmem>>, vector<1x52xf32>
    %c0_112 = arith.constant 0 : index
    %c1404 = arith.constant 1404 : index
    %169 = vector.load %arg14[%c0_112, %c1404] : memref<1x3744xf32, #tpu.memory_space<vmem>>, vector<1x52xf32>
    tpu.vector_store %arg14[%c0_112, %c1404], %168 {strides = array<i32>} : memref<1x3744xf32, #tpu.memory_space<vmem>>, vector<1x52xf32>,
    %c28 = arith.constant 28 : index
    %c0_113 = arith.constant 0 : index
    %170 = vector.load %arg13[%c28, %c0_113] : memref<72x52xf32, #tpu.memory_space<vmem>>, vector<1x52xf32>
    %c0_114 = arith.constant 0 : index
    %c1456 = arith.constant 1456 : index
    %171 = vector.load %arg14[%c0_114, %c1456] : memref<1x3744xf32, #tpu.memory_space<vmem>>, vector<1x52xf32>
    tpu.vector_store %arg14[%c0_114, %c1456], %170 {strides = array<i32>} : memref<1x3744xf32, #tpu.memory_space<vmem>>, vector<1x52xf32>,
    %c29 = arith.constant 29 : index
    %c0_115 = arith.constant 0 : index
    %172 = vector.load %arg13[%c29, %c0_115] : memref<72x52xf32, #tpu.memory_space<vmem>>, vector<1x52xf32>
    %c0_116 = arith.constant 0 : index
    %c1508 = arith.constant 1508 : index
    %173 = vector.load %arg14[%c0_116, %c1508] : memref<1x3744xf32, #tpu.memory_space<vmem>>, vector<1x52xf32>
    tpu.vector_store %arg14[%c0_116, %c1508], %172 {strides = array<i32>} : memref<1x3744xf32, #tpu.memory_space<vmem>>, vector<1x52xf32>,
    %c30 = arith.constant 30 : index
    %c0_117 = arith.constant 0 : index
    %174 = vector.load %arg13[%c30, %c0_117] : memref<72x52xf32, #tpu.memory_space<vmem>>, vector<1x52xf32>
    %c0_118 = arith.constant 0 : index
    %c1560 = arith.constant 1560 : index
    %175 = vector.load %arg14[%c0_118, %c1560] : memref<1x3744xf32, #tpu.memory_space<vmem>>, vector<1x52xf32>
    tpu.vector_store %arg14[%c0_118, %c1560], %174 {strides = array<i32>} : memref<1x3744xf32, #tpu.memory_space<vmem>>, vector<1x52xf32>,
    %c31 = arith.constant 31 : index
    %c0_119 = arith.constant 0 : index
    %176 = vector.load %arg13[%c31, %c0_119] : memref<72x52xf32, #tpu.memory_space<vmem>>, vector<1x52xf32>
    %c0_120 = arith.constant 0 : index
    %c1612 = arith.constant 1612 : index
    %177 = vector.load %arg14[%c0_120, %c1612] : memref<1x3744xf32, #tpu.memory_space<vmem>>, vector<1x52xf32>
    tpu.vector_store %arg14[%c0_120, %c1612], %176 {strides = array<i32>} : memref<1x3744xf32, #tpu.memory_space<vmem>>, vector<1x52xf32>,
    %c32 = arith.constant 32 : index
    %c0_121 = arith.constant 0 : index
    %178 = vector.load %arg13[%c32, %c0_121] : memref<72x52xf32, #tpu.memory_space<vmem>>, vector<1x52xf32>
    %c0_122 = arith.constant 0 : index
    %c1664 = arith.constant 1664 : index
    %179 = vector.load %arg14[%c0_122, %c1664] : memref<1x3744xf32, #tpu.memory_space<vmem>>, vector<1x52xf32>
    tpu.vector_store %arg14[%c0_122, %c1664], %178 {strides = array<i32>} : memref<1x3744xf32, #tpu.memory_space<vmem>>, vector<1x52xf32>,
    %c33 = arith.constant 33 : index
    %c0_123 = arith.constant 0 : index
    %180 = vector.load %arg13[%c33, %c0_123] : memref<72x52xf32, #tpu.memory_space<vmem>>, vector<1x52xf32>
    %c0_124 = arith.constant 0 : index
    %c1716 = arith.constant 1716 : index
    %181 = vector.load %arg14[%c0_124, %c1716] : memref<1x3744xf32, #tpu.memory_space<vmem>>, vector<1x52xf32>
    tpu.vector_store %arg14[%c0_124, %c1716], %180 {strides = array<i32>} : memref<1x3744xf32, #tpu.memory_space<vmem>>, vector<1x52xf32>,
    %c34 = arith.constant 34 : index
    %c0_125 = arith.constant 0 : index
    %182 = vector.load %arg13[%c34, %c0_125] : memref<72x52xf32, #tpu.memory_space<vmem>>, vector<1x52xf32>
    %c0_126 = arith.constant 0 : index
    %c1768 = arith.constant 1768 : index
    %183 = vector.load %arg14[%c0_126, %c1768] : memref<1x3744xf32, #tpu.memory_space<vmem>>, vector<1x52xf32>
    tpu.vector_store %arg14[%c0_126, %c1768], %182 {strides = array<i32>} : memref<1x3744xf32, #tpu.memory_space<vmem>>, vector<1x52xf32>,
    %c35 = arith.constant 35 : index
    %c0_127 = arith.constant 0 : index
    %184 = vector.load %arg13[%c35, %c0_127] : memref<72x52xf32, #tpu.memory_space<vmem>>, vector<1x52xf32>
    %c0_128 = arith.constant 0 : index
    %c1820 = arith.constant 1820 : index
    %185 = vector.load %arg14[%c0_128, %c1820] : memref<1x3744xf32, #tpu.memory_space<vmem>>, vector<1x52xf32>
    tpu.vector_store %arg14[%c0_128, %c1820], %184 {strides = array<i32>} : memref<1x3744xf32, #tpu.memory_space<vmem>>, vector<1x52xf32>,
    %c36 = arith.constant 36 : index
    %c0_129 = arith.constant 0 : index
    %186 = vector.load %arg13[%c36, %c0_129] : memref<72x52xf32, #tpu.memory_space<vmem>>, vector<1x52xf32>
    %c0_130 = arith.constant 0 : index
    %c1872 = arith.constant 1872 : index
    %187 = vector.load %arg14[%c0_130, %c1872] : memref<1x3744xf32, #tpu.memory_space<vmem>>, vector<1x52xf32>
    tpu.vector_store %arg14[%c0_130, %c1872], %186 {strides = array<i32>} : memref<1x3744xf32, #tpu.memory_space<vmem>>, vector<1x52xf32>,
    %c37 = arith.constant 37 : index
    %c0_131 = arith.constant 0 : index
    %188 = vector.load %arg13[%c37, %c0_131] : memref<72x52xf32, #tpu.memory_space<vmem>>, vector<1x52xf32>
    %c0_132 = arith.constant 0 : index
    %c1924 = arith.constant 1924 : index
    %189 = vector.load %arg14[%c0_132, %c1924] : memref<1x3744xf32, #tpu.memory_space<vmem>>, vector<1x52xf32>
    tpu.vector_store %arg14[%c0_132, %c1924], %188 {strides = array<i32>} : memref<1x3744xf32, #tpu.memory_space<vmem>>, vector<1x52xf32>,
    %c38 = arith.constant 38 : index
    %c0_133 = arith.constant 0 : index
    %190 = vector.load %arg13[%c38, %c0_133] : memref<72x52xf32, #tpu.memory_space<vmem>>, vector<1x52xf32>
    %c0_134 = arith.constant 0 : index
    %c1976 = arith.constant 1976 : index
    %191 = vector.load %arg14[%c0_134, %c1976] : memref<1x3744xf32, #tpu.memory_space<vmem>>, vector<1x52xf32>
    tpu.vector_store %arg14[%c0_134, %c1976], %190 {strides = array<i32>} : memref<1x3744xf32, #tpu.memory_space<vmem>>, vector<1x52xf32>,
    %c39 = arith.constant 39 : index
    %c0_135 = arith.constant 0 : index
    %192 = vector.load %arg13[%c39, %c0_135] : memref<72x52xf32, #tpu.memory_space<vmem>>, vector<1x52xf32>
    %c0_136 = arith.constant 0 : index
    %c2028 = arith.constant 2028 : index
    %193 = vector.load %arg14[%c0_136, %c2028] : memref<1x3744xf32, #tpu.memory_space<vmem>>, vector<1x52xf32>
    tpu.vector_store %arg14[%c0_136, %c2028], %192 {strides = array<i32>} : memref<1x3744xf32, #tpu.memory_space<vmem>>, vector<1x52xf32>,
    %c40 = arith.constant 40 : index
    %c0_137 = arith.constant 0 : index
    %194 = vector.load %arg13[%c40, %c0_137] : memref<72x52xf32, #tpu.memory_space<vmem>>, vector<1x52xf32>
    %c0_138 = arith.constant 0 : index
    %c2080 = arith.constant 2080 : index
    %195 = vector.load %arg14[%c0_138, %c2080] : memref<1x3744xf32, #tpu.memory_space<vmem>>, vector<1x52xf32>
    tpu.vector_store %arg14[%c0_138, %c2080], %194 {strides = array<i32>} : memref<1x3744xf32, #tpu.memory_space<vmem>>, vector<1x52xf32>,
    %c41 = arith.constant 41 : index
    %c0_139 = arith.constant 0 : index
    %196 = vector.load %arg13[%c41, %c0_139] : memref<72x52xf32, #tpu.memory_space<vmem>>, vector<1x52xf32>
    %c0_140 = arith.constant 0 : index
    %c2132 = arith.constant 2132 : index
    %197 = vector.load %arg14[%c0_140, %c2132] : memref<1x3744xf32, #tpu.memory_space<vmem>>, vector<1x52xf32>
    tpu.vector_store %arg14[%c0_140, %c2132], %196 {strides = array<i32>} : memref<1x3744xf32, #tpu.memory_space<vmem>>, vector<1x52xf32>,
    %c42 = arith.constant 42 : index
    %c0_141 = arith.constant 0 : index
    %198 = vector.load %arg13[%c42, %c0_141] : memref<72x52xf32, #tpu.memory_space<vmem>>, vector<1x52xf32>
    %c0_142 = arith.constant 0 : index
    %c2184 = arith.constant 2184 : index
    %199 = vector.load %arg14[%c0_142, %c2184] : memref<1x3744xf32, #tpu.memory_space<vmem>>, vector<1x52xf32>
    tpu.vector_store %arg14[%c0_142, %c2184], %198 {strides = array<i32>} : memref<1x3744xf32, #tpu.memory_space<vmem>>, vector<1x52xf32>,
    %c43 = arith.constant 43 : index
    %c0_143 = arith.constant 0 : index
    %200 = vector.load %arg13[%c43, %c0_143] : memref<72x52xf32, #tpu.memory_space<vmem>>, vector<1x52xf32>
    %c0_144 = arith.constant 0 : index
    %c2236 = arith.constant 2236 : index
    %201 = vector.load %arg14[%c0_144, %c2236] : memref<1x3744xf32, #tpu.memory_space<vmem>>, vector<1x52xf32>
    tpu.vector_store %arg14[%c0_144, %c2236], %200 {strides = array<i32>} : memref<1x3744xf32, #tpu.memory_space<vmem>>, vector<1x52xf32>,
    %c44 = arith.constant 44 : index
    %c0_145 = arith.constant 0 : index
    %202 = vector.load %arg13[%c44, %c0_145] : memref<72x52xf32, #tpu.memory_space<vmem>>, vector<1x52xf32>
    %c0_146 = arith.constant 0 : index
    %c2288 = arith.constant 2288 : index
    %203 = vector.load %arg14[%c0_146, %c2288] : memref<1x3744xf32, #tpu.memory_space<vmem>>, vector<1x52xf32>
    tpu.vector_store %arg14[%c0_146, %c2288], %202 {strides = array<i32>} : memref<1x3744xf32, #tpu.memory_space<vmem>>, vector<1x52xf32>,
    %c45 = arith.constant 45 : index
    %c0_147 = arith.constant 0 : index
    %204 = vector.load %arg13[%c45, %c0_147] : memref<72x52xf32, #tpu.memory_space<vmem>>, vector<1x52xf32>
    %c0_148 = arith.constant 0 : index
    %c2340 = arith.constant 2340 : index
    %205 = vector.load %arg14[%c0_148, %c2340] : memref<1x3744xf32, #tpu.memory_space<vmem>>, vector<1x52xf32>
    tpu.vector_store %arg14[%c0_148, %c2340], %204 {strides = array<i32>} : memref<1x3744xf32, #tpu.memory_space<vmem>>, vector<1x52xf32>,
    %c46 = arith.constant 46 : index
    %c0_149 = arith.constant 0 : index
    %206 = vector.load %arg13[%c46, %c0_149] : memref<72x52xf32, #tpu.memory_space<vmem>>, vector<1x52xf32>
    %c0_150 = arith.constant 0 : index
    %c2392 = arith.constant 2392 : index
    %207 = vector.load %arg14[%c0_150, %c2392] : memref<1x3744xf32, #tpu.memory_space<vmem>>, vector<1x52xf32>
    tpu.vector_store %arg14[%c0_150, %c2392], %206 {strides = array<i32>} : memref<1x3744xf32, #tpu.memory_space<vmem>>, vector<1x52xf32>,
    %c47 = arith.constant 47 : index
    %c0_151 = arith.constant 0 : index
    %208 = vector.load %arg13[%c47, %c0_151] : memref<72x52xf32, #tpu.memory_space<vmem>>, vector<1x52xf32>
    %c0_152 = arith.constant 0 : index
    %c2444 = arith.constant 2444 : index
    %209 = vector.load %arg14[%c0_152, %c2444] : memref<1x3744xf32, #tpu.memory_space<vmem>>, vector<1x52xf32>
    tpu.vector_store %arg14[%c0_152, %c2444], %208 {strides = array<i32>} : memref<1x3744xf32, #tpu.memory_space<vmem>>, vector<1x52xf32>,
    %c48 = arith.constant 48 : index
    %c0_153 = arith.constant 0 : index
    %210 = vector.load %arg13[%c48, %c0_153] : memref<72x52xf32, #tpu.memory_space<vmem>>, vector<1x52xf32>
    %c0_154 = arith.constant 0 : index
    %c2496 = arith.constant 2496 : index
    %211 = vector.load %arg14[%c0_154, %c2496] : memref<1x3744xf32, #tpu.memory_space<vmem>>, vector<1x52xf32>
    tpu.vector_store %arg14[%c0_154, %c2496], %210 {strides = array<i32>} : memref<1x3744xf32, #tpu.memory_space<vmem>>, vector<1x52xf32>,
    %c49 = arith.constant 49 : index
    %c0_155 = arith.constant 0 : index
    %212 = vector.load %arg13[%c49, %c0_155] : memref<72x52xf32, #tpu.memory_space<vmem>>, vector<1x52xf32>
    %c0_156 = arith.constant 0 : index
    %c2548 = arith.constant 2548 : index
    %213 = vector.load %arg14[%c0_156, %c2548] : memref<1x3744xf32, #tpu.memory_space<vmem>>, vector<1x52xf32>
    tpu.vector_store %arg14[%c0_156, %c2548], %212 {strides = array<i32>} : memref<1x3744xf32, #tpu.memory_space<vmem>>, vector<1x52xf32>,
    %c50 = arith.constant 50 : index
    %c0_157 = arith.constant 0 : index
    %214 = vector.load %arg13[%c50, %c0_157] : memref<72x52xf32, #tpu.memory_space<vmem>>, vector<1x52xf32>
    %c0_158 = arith.constant 0 : index
    %c2600 = arith.constant 2600 : index
    %215 = vector.load %arg14[%c0_158, %c2600] : memref<1x3744xf32, #tpu.memory_space<vmem>>, vector<1x52xf32>
    tpu.vector_store %arg14[%c0_158, %c2600], %214 {strides = array<i32>} : memref<1x3744xf32, #tpu.memory_space<vmem>>, vector<1x52xf32>,
    %c51 = arith.constant 51 : index
    %c0_159 = arith.constant 0 : index
    %216 = vector.load %arg13[%c51, %c0_159] : memref<72x52xf32, #tpu.memory_space<vmem>>, vector<1x52xf32>
    %c0_160 = arith.constant 0 : index
    %c2652 = arith.constant 2652 : index
    %217 = vector.load %arg14[%c0_160, %c2652] : memref<1x3744xf32, #tpu.memory_space<vmem>>, vector<1x52xf32>
    tpu.vector_store %arg14[%c0_160, %c2652], %216 {strides = array<i32>} : memref<1x3744xf32, #tpu.memory_space<vmem>>, vector<1x52xf32>,
    %c52_161 = arith.constant 52 : index
    %c0_162 = arith.constant 0 : index
    %218 = vector.load %arg13[%c52_161, %c0_162] : memref<72x52xf32, #tpu.memory_space<vmem>>, vector<1x52xf32>
    %c0_163 = arith.constant 0 : index
    %c2704 = arith.constant 2704 : index
    %219 = vector.load %arg14[%c0_163, %c2704] : memref<1x3744xf32, #tpu.memory_space<vmem>>, vector<1x52xf32>
    tpu.vector_store %arg14[%c0_163, %c2704], %218 {strides = array<i32>} : memref<1x3744xf32, #tpu.memory_space<vmem>>, vector<1x52xf32>,
    %c53 = arith.constant 53 : index
    %c0_164 = arith.constant 0 : index
    %220 = vector.load %arg13[%c53, %c0_164] : memref<72x52xf32, #tpu.memory_space<vmem>>, vector<1x52xf32>
    %c0_165 = arith.constant 0 : index
    %c2756 = arith.constant 2756 : index
    %221 = vector.load %arg14[%c0_165, %c2756] : memref<1x3744xf32, #tpu.memory_space<vmem>>, vector<1x52xf32>
    tpu.vector_store %arg14[%c0_165, %c2756], %220 {strides = array<i32>} : memref<1x3744xf32, #tpu.memory_space<vmem>>, vector<1x52xf32>,
    %c54 = arith.constant 54 : index
    %c0_166 = arith.constant 0 : index
    %222 = vector.load %arg13[%c54, %c0_166] : memref<72x52xf32, #tpu.memory_space<vmem>>, vector<1x52xf32>
    %c0_167 = arith.constant 0 : index
    %c2808 = arith.constant 2808 : index
    %223 = vector.load %arg14[%c0_167, %c2808] : memref<1x3744xf32, #tpu.memory_space<vmem>>, vector<1x52xf32>
    tpu.vector_store %arg14[%c0_167, %c2808], %222 {strides = array<i32>} : memref<1x3744xf32, #tpu.memory_space<vmem>>, vector<1x52xf32>,
    %c55 = arith.constant 55 : index
    %c0_168 = arith.constant 0 : index
    %224 = vector.load %arg13[%c55, %c0_168] : memref<72x52xf32, #tpu.memory_space<vmem>>, vector<1x52xf32>
    %c0_169 = arith.constant 0 : index
    %c2860 = arith.constant 2860 : index
    %225 = vector.load %arg14[%c0_169, %c2860] : memref<1x3744xf32, #tpu.memory_space<vmem>>, vector<1x52xf32>
    tpu.vector_store %arg14[%c0_169, %c2860], %224 {strides = array<i32>} : memref<1x3744xf32, #tpu.memory_space<vmem>>, vector<1x52xf32>,
    %c56 = arith.constant 56 : index
    %c0_170 = arith.constant 0 : index
    %226 = vector.load %arg13[%c56, %c0_170] : memref<72x52xf32, #tpu.memory_space<vmem>>, vector<1x52xf32>
    %c0_171 = arith.constant 0 : index
    %c2912 = arith.constant 2912 : index
    %227 = vector.load %arg14[%c0_171, %c2912] : memref<1x3744xf32, #tpu.memory_space<vmem>>, vector<1x52xf32>
    tpu.vector_store %arg14[%c0_171, %c2912], %226 {strides = array<i32>} : memref<1x3744xf32, #tpu.memory_space<vmem>>, vector<1x52xf32>,
    %c57 = arith.constant 57 : index
    %c0_172 = arith.constant 0 : index
    %228 = vector.load %arg13[%c57, %c0_172] : memref<72x52xf32, #tpu.memory_space<vmem>>, vector<1x52xf32>
    %c0_173 = arith.constant 0 : index
    %c2964 = arith.constant 2964 : index
    %229 = vector.load %arg14[%c0_173, %c2964] : memref<1x3744xf32, #tpu.memory_space<vmem>>, vector<1x52xf32>
    tpu.vector_store %arg14[%c0_173, %c2964], %228 {strides = array<i32>} : memref<1x3744xf32, #tpu.memory_space<vmem>>, vector<1x52xf32>,
    %c58 = arith.constant 58 : index
    %c0_174 = arith.constant 0 : index
    %230 = vector.load %arg13[%c58, %c0_174] : memref<72x52xf32, #tpu.memory_space<vmem>>, vector<1x52xf32>
    %c0_175 = arith.constant 0 : index
    %c3016 = arith.constant 3016 : index
    %231 = vector.load %arg14[%c0_175, %c3016] : memref<1x3744xf32, #tpu.memory_space<vmem>>, vector<1x52xf32>
    tpu.vector_store %arg14[%c0_175, %c3016], %230 {strides = array<i32>} : memref<1x3744xf32, #tpu.memory_space<vmem>>, vector<1x52xf32>,
    %c59 = arith.constant 59 : index
    %c0_176 = arith.constant 0 : index
    %232 = vector.load %arg13[%c59, %c0_176] : memref<72x52xf32, #tpu.memory_space<vmem>>, vector<1x52xf32>
    %c0_177 = arith.constant 0 : index
    %c3068 = arith.constant 3068 : index
    %233 = vector.load %arg14[%c0_177, %c3068] : memref<1x3744xf32, #tpu.memory_space<vmem>>, vector<1x52xf32>
    tpu.vector_store %arg14[%c0_177, %c3068], %232 {strides = array<i32>} : memref<1x3744xf32, #tpu.memory_space<vmem>>, vector<1x52xf32>,
    %c60 = arith.constant 60 : index
    %c0_178 = arith.constant 0 : index
    %234 = vector.load %arg13[%c60, %c0_178] : memref<72x52xf32, #tpu.memory_space<vmem>>, vector<1x52xf32>
    %c0_179 = arith.constant 0 : index
    %c3120 = arith.constant 3120 : index
    %235 = vector.load %arg14[%c0_179, %c3120] : memref<1x3744xf32, #tpu.memory_space<vmem>>, vector<1x52xf32>
    tpu.vector_store %arg14[%c0_179, %c3120], %234 {strides = array<i32>} : memref<1x3744xf32, #tpu.memory_space<vmem>>, vector<1x52xf32>,
    %c61 = arith.constant 61 : index
    %c0_180 = arith.constant 0 : index
    %236 = vector.load %arg13[%c61, %c0_180] : memref<72x52xf32, #tpu.memory_space<vmem>>, vector<1x52xf32>
    %c0_181 = arith.constant 0 : index
    %c3172 = arith.constant 3172 : index
    %237 = vector.load %arg14[%c0_181, %c3172] : memref<1x3744xf32, #tpu.memory_space<vmem>>, vector<1x52xf32>
    tpu.vector_store %arg14[%c0_181, %c3172], %236 {strides = array<i32>} : memref<1x3744xf32, #tpu.memory_space<vmem>>, vector<1x52xf32>,
    %c62 = arith.constant 62 : index
    %c0_182 = arith.constant 0 : index
    %238 = vector.load %arg13[%c62, %c0_182] : memref<72x52xf32, #tpu.memory_space<vmem>>, vector<1x52xf32>
    %c0_183 = arith.constant 0 : index
    %c3224 = arith.constant 3224 : index
    %239 = vector.load %arg14[%c0_183, %c3224] : memref<1x3744xf32, #tpu.memory_space<vmem>>, vector<1x52xf32>
    tpu.vector_store %arg14[%c0_183, %c3224], %238 {strides = array<i32>} : memref<1x3744xf32, #tpu.memory_space<vmem>>, vector<1x52xf32>,
    %c63 = arith.constant 63 : index
    %c0_184 = arith.constant 0 : index
    %240 = vector.load %arg13[%c63, %c0_184] : memref<72x52xf32, #tpu.memory_space<vmem>>, vector<1x52xf32>
    %c0_185 = arith.constant 0 : index
    %c3276 = arith.constant 3276 : index
    %241 = vector.load %arg14[%c0_185, %c3276] : memref<1x3744xf32, #tpu.memory_space<vmem>>, vector<1x52xf32>
    tpu.vector_store %arg14[%c0_185, %c3276], %240 {strides = array<i32>} : memref<1x3744xf32, #tpu.memory_space<vmem>>, vector<1x52xf32>,
    %c64 = arith.constant 64 : index
    %c0_186 = arith.constant 0 : index
    %242 = vector.load %arg13[%c64, %c0_186] : memref<72x52xf32, #tpu.memory_space<vmem>>, vector<1x52xf32>
    %c0_187 = arith.constant 0 : index
    %c3328 = arith.constant 3328 : index
    %243 = vector.load %arg14[%c0_187, %c3328] : memref<1x3744xf32, #tpu.memory_space<vmem>>, vector<1x52xf32>
    tpu.vector_store %arg14[%c0_187, %c3328], %242 {strides = array<i32>} : memref<1x3744xf32, #tpu.memory_space<vmem>>, vector<1x52xf32>,
    %c65 = arith.constant 65 : index
    %c0_188 = arith.constant 0 : index
    %244 = vector.load %arg13[%c65, %c0_188] : memref<72x52xf32, #tpu.memory_space<vmem>>, vector<1x52xf32>
    %c0_189 = arith.constant 0 : index
    %c3380 = arith.constant 3380 : index
    %245 = vector.load %arg14[%c0_189, %c3380] : memref<1x3744xf32, #tpu.memory_space<vmem>>, vector<1x52xf32>
    tpu.vector_store %arg14[%c0_189, %c3380], %244 {strides = array<i32>} : memref<1x3744xf32, #tpu.memory_space<vmem>>, vector<1x52xf32>,
    %c66 = arith.constant 66 : index
    %c0_190 = arith.constant 0 : index
    %246 = vector.load %arg13[%c66, %c0_190] : memref<72x52xf32, #tpu.memory_space<vmem>>, vector<1x52xf32>
    %c0_191 = arith.constant 0 : index
    %c3432 = arith.constant 3432 : index
    %247 = vector.load %arg14[%c0_191, %c3432] : memref<1x3744xf32, #tpu.memory_space<vmem>>, vector<1x52xf32>
    tpu.vector_store %arg14[%c0_191, %c3432], %246 {strides = array<i32>} : memref<1x3744xf32, #tpu.memory_space<vmem>>, vector<1x52xf32>,
    %c67 = arith.constant 67 : index
    %c0_192 = arith.constant 0 : index
    %248 = vector.load %arg13[%c67, %c0_192] : memref<72x52xf32, #tpu.memory_space<vmem>>, vector<1x52xf32>
    %c0_193 = arith.constant 0 : index
    %c3484 = arith.constant 3484 : index
    %249 = vector.load %arg14[%c0_193, %c3484] : memref<1x3744xf32, #tpu.memory_space<vmem>>, vector<1x52xf32>
    tpu.vector_store %arg14[%c0_193, %c3484], %248 {strides = array<i32>} : memref<1x3744xf32, #tpu.memory_space<vmem>>, vector<1x52xf32>,
    %c68 = arith.constant 68 : index
    %c0_194 = arith.constant 0 : index
    %250 = vector.load %arg13[%c68, %c0_194] : memref<72x52xf32, #tpu.memory_space<vmem>>, vector<1x52xf32>
    %c0_195 = arith.constant 0 : index
    %c3536 = arith.constant 3536 : index
    %251 = vector.load %arg14[%c0_195, %c3536] : memref<1x3744xf32, #tpu.memory_space<vmem>>, vector<1x52xf32>
    tpu.vector_store %arg14[%c0_195, %c3536], %250 {strides = array<i32>} : memref<1x3744xf32, #tpu.memory_space<vmem>>, vector<1x52xf32>,
    %c69 = arith.constant 69 : index
    %c0_196 = arith.constant 0 : index
    %252 = vector.load %arg13[%c69, %c0_196] : memref<72x52xf32, #tpu.memory_space<vmem>>, vector<1x52xf32>
    %c0_197 = arith.constant 0 : index
    %c3588 = arith.constant 3588 : index
    %253 = vector.load %arg14[%c0_197, %c3588] : memref<1x3744xf32, #tpu.memory_space<vmem>>, vector<1x52xf32>
    tpu.vector_store %arg14[%c0_197, %c3588], %252 {strides = array<i32>} : memref<1x3744xf32, #tpu.memory_space<vmem>>, vector<1x52xf32>,
    %c70 = arith.constant 70 : index
    %c0_198 = arith.constant 0 : index
    %254 = vector.load %arg13[%c70, %c0_198] : memref<72x52xf32, #tpu.memory_space<vmem>>, vector<1x52xf32>
    %c0_199 = arith.constant 0 : index
    %c3640 = arith.constant 3640 : index
    %255 = vector.load %arg14[%c0_199, %c3640] : memref<1x3744xf32, #tpu.memory_space<vmem>>, vector<1x52xf32>
    tpu.vector_store %arg14[%c0_199, %c3640], %254 {strides = array<i32>} : memref<1x3744xf32, #tpu.memory_space<vmem>>, vector<1x52xf32>,
    %c71 = arith.constant 71 : index
    %c0_200 = arith.constant 0 : index
    %256 = vector.load %arg13[%c71, %c0_200] : memref<72x52xf32, #tpu.memory_space<vmem>>, vector<1x52xf32>
    %c0_201 = arith.constant 0 : index
    %c3692 = arith.constant 3692 : index
    %257 = vector.load %arg14[%c0_201, %c3692] : memref<1x3744xf32, #tpu.memory_space<vmem>>, vector<1x52xf32>
    tpu.vector_store %arg14[%c0_201, %c3692], %256 {strides = array<i32>} : memref<1x3744xf32, #tpu.memory_space<vmem>>, vector<1x52xf32>,
    %c0_202 = arith.constant 0 : index
    %c0_203 = arith.constant 0 : index
    %258 = vector.load %arg14[%c0_202, %c0_203] : memref<1x3744xf32, #tpu.memory_space<vmem>>, vector<1x3744xf32>
    %c0_204 = arith.constant 0 : index
    %c0_205 = arith.constant 0 : index
    %259 = vector.load %arg8[%c0_204, %c0_205] : memref<72x3744xf32, #tpu.memory_space<vmem>>, vector<72x3744xf32>
    %cst_206 = arith.constant dense<0.000000e+00> : vector<1x72xf32>
    %260 = tpu.matmul %258, %259, %cst_206 {dimension_numbers = #tpu.dot_dimension_numbers<[1], [1], [0], [0], [0, 0, 1, 0], [], []>} : vector<1x3744xf32>, vector<72x3744xf32>, vector<1x72xf32> -> vector<1x72xf32>
    %c0_207 = arith.constant 0 : index
    %c0_208 = arith.constant 0 : index
    %261 = vector.load %arg9[%c0_207, %c0_208] : memref<1x72xf32, #tpu.memory_space<vmem>>, vector<1x72xf32>
    %262 = arith.addf %260, %261 : vector<1x72xf32>
    %cst_209 = arith.constant 0.000000e+00 : f32
    %263 = vector.broadcast %cst_209 : f32 to vector<1x72xf32>
    %264 = arith.maximumf %262, %263 : vector<1x72xf32>
    %c0_210 = arith.constant 0 : index
    %c0_211 = arith.constant 0 : index
    %265 = vector.load %arg10[%c0_210, %c0_211] : memref<10x72xf32, #tpu.memory_space<vmem>>, vector<10x72xf32>
    %cst_212 = arith.constant dense<0.000000e+00> : vector<1x10xf32>
    %266 = tpu.matmul %264, %265, %cst_212 {dimension_numbers = #tpu.dot_dimension_numbers<[1], [1], [0], [0], [0, 0, 1, 0], [], []>} : vector<1x72xf32>, vector<10x72xf32>, vector<1x10xf32> -> vector<1x10xf32>
    %c0_213 = arith.constant 0 : index
    %c0_214 = arith.constant 0 : index
    %267 = vector.load %arg11[%c0_213, %c0_214] : memref<1x10xf32, #tpu.memory_space<vmem>>, vector<1x10xf32>
    %268 = arith.addf %266, %267 : vector<1x10xf32>
    %cst_215 = arith.constant dense<0xFF800000> : vector<1xf32>
    %269 = vector.multi_reduction <maximumf>, %268, %cst_215 [1] : vector<1x10xf32> to vector<1xf32>
    %270 = vector.shape_cast %269 : vector<1xf32> to vector<1x1xf32>
    %271 = vector.broadcast %270 : vector<1x1xf32> to vector<1x10xf32>
    %272 = arith.subf %268, %271 : vector<1x10xf32>
    %273 = math.exp %272 : vector<1x10xf32>
    %cst_216 = arith.constant dense<0.000000e+00> : vector<1xf32>
    %274 = vector.multi_reduction <add>, %273, %cst_216 [1] : vector<1x10xf32> to vector<1xf32>
    %275 = vector.shape_cast %274 : vector<1xf32> to vector<1x1xf32>
    %276 = math.log %275 : vector<1x1xf32>
    %277 = vector.broadcast %276 : vector<1x1xf32> to vector<1x10xf32>
    %278 = arith.subf %272, %277 : vector<1x10xf32>
    %c0_217 = arith.constant 0 : index
    %c0_218 = arith.constant 0 : index
    %c0_219 = arith.constant 0 : index
    %279 = vector.load %arg12[%c0_217, %c0_218, %c0_219] : memref<1x1x10xf32, #tpu.memory_space<vmem>>, vector<1x1x10xf32>
    %280 = vector.shape_cast %279 : vector<1x1x10xf32> to vector<1x10xf32>
    %281 = vector.shape_cast %278 : vector<1x10xf32> to vector<1x1x10xf32>
    tpu.vector_store %arg12[%c0_217, %c0_218, %c0_219], %281 {strides = array<i32>} : memref<1x1x10xf32, #tpu.memory_space<vmem>>, vector<1x1x10xf32>,
    return
  }
  func.func @transform_0(%arg0: i32) -> (i32, i32, i32) {
    %c0_i32 = arith.constant 0 : i32
    %c0_i32_0 = arith.constant 0 : i32
    %c0_i32_1 = arith.constant 0 : i32
    return %arg0, %c0_i32, %c0_i32_0 : i32, i32, i32
  }
  func.func @transform_1(%arg0: i32) -> (i32, i32) {
    %c0_i32 = arith.constant 0 : i32
    %c0_i32_0 = arith.constant 0 : i32
    %c0_i32_1 = arith.constant 0 : i32
    return %c0_i32, %c0_i32_0 : i32, i32
  }
  func.func @transform_2(%arg0: i32) -> (i32, i32) {
    %c0_i32 = arith.constant 0 : i32
    %c0_i32_0 = arith.constant 0 : i32
    %c0_i32_1 = arith.constant 0 : i32
    return %c0_i32, %c0_i32_0 : i32, i32
  }
  func.func @transform_3(%arg0: i32) -> (i32, i32, i32) {
    %c0_i32 = arith.constant 0 : i32
    %c0_i32_0 = arith.constant 0 : i32
    %c0_i32_1 = arith.constant 0 : i32
    %c0_i32_2 = arith.constant 0 : i32
    return %c0_i32, %c0_i32_0, %c0_i32_1 : i32, i32, i32
  }
  func.func @transform_4(%arg0: i32) -> (i32, i32) {
    %c0_i32 = arith.constant 0 : i32
    %c0_i32_0 = arith.constant 0 : i32
    %c0_i32_1 = arith.constant 0 : i32
    return %c0_i32, %c0_i32_0 : i32, i32
  }
  func.func @transform_5(%arg0: i32) -> (i32, i32, i32) {
    %c0_i32 = arith.constant 0 : i32
    %c0_i32_0 = arith.constant 0 : i32
    %c0_i32_1 = arith.constant 0 : i32
    %c0_i32_2 = arith.constant 0 : i32
    return %c0_i32, %c0_i32_0, %c0_i32_1 : i32, i32, i32
  }
  func.func @transform_6(%arg0: i32) -> (i32, i32) {
    %c0_i32 = arith.constant 0 : i32
    %c0_i32_0 = arith.constant 0 : i32
    %c0_i32_1 = arith.constant 0 : i32
    return %c0_i32, %c0_i32_0 : i32, i32
  }
  func.func @transform_7(%arg0: i32) -> (i32, i32) {
    %c0_i32 = arith.constant 0 : i32
    %c0_i32_0 = arith.constant 0 : i32
    %c0_i32_1 = arith.constant 0 : i32
    return %c0_i32, %c0_i32_0 : i32, i32
  }
  func.func @transform_8(%arg0: i32) -> (i32, i32) {
    %c0_i32 = arith.constant 0 : i32
    %c0_i32_0 = arith.constant 0 : i32
    %c0_i32_1 = arith.constant 0 : i32
    return %c0_i32, %c0_i32_0 : i32, i32
  }
  func.func @transform_9(%arg0: i32) -> (i32, i32) {
    %c0_i32 = arith.constant 0 : i32
    %c0_i32_0 = arith.constant 0 : i32
    %c0_i32_1 = arith.constant 0 : i32
    return %c0_i32, %c0_i32_0 : i32, i32
  }
  func.func @transform_10(%arg0: i32) -> (i32, i32) {
    %c0_i32 = arith.constant 0 : i32
    %c0_i32_0 = arith.constant 0 : i32
    %c0_i32_1 = arith.constant 0 : i32
    return %c0_i32, %c0_i32_0 : i32, i32
  }
  func.func @transform_11(%arg0: i32) -> (i32, i32, i32) {
    %c0_i32 = arith.constant 0 : i32
    %c0_i32_0 = arith.constant 0 : i32
    %c0_i32_1 = arith.constant 0 : i32
    return %arg0, %c0_i32, %c0_i32_0 : i32, i32, i32
  }
}

</mosaic_0001>

<bundles_post_ra>
// kernel: forward_fn.1
= control target key start
LH: loop header
LB: loop body
LE: loop exit
PB: predicated region body
PF: predicated region fallthrough
CT: control target
= control target key end

     0   :  { %s8839_s0 = inlined_call_operand.hbm [shape: f32[2,1,430], index: 0, kind: input, shape index: {}]   ;;  %s8840_s1 = inlined_call_operand.vmem [shape: f32[18,3], index: 1, kind: input, shape index: {}]   ;;  %s8841_s2 = inlined_call_operand.vmem [shape: f32[18,1], index: 2, kind: input, shape index: {}]   ;;  %s8842_s3 = inlined_call_operand.vmem [shape: f32[3,36,18], index: 3, kind: input, shape index: {}]   ;;  %s8843_s4 = inlined_call_operand.vmem [shape: f32[36,1], index: 4, kind: input, shape index: {}]   ;;  %s8844_s5 = inlined_call_operand.vmem [shape: f32[3,72,36], index: 5, kind: input, shape index: {}]   ;;  %s8845_s6 = inlined_call_operand.vmem [shape: f32[72,1], index: 6, kind: input, shape index: {}]   ;;  %s8846_s7 = inlined_call_operand.hbm [shape: f32[72,3744], index: 7, kind: input, shape index: {}]   ;;  %s8847_s8 = inlined_call_operand.hbm [shape: f32[1,72], index: 8, kind: input, shape index: {}]   ;;  %s8848_s9 = inlined_call_operand.hbm [shape: f32[10,72], index: 9, kind: input, shape index: {}]   ;;  %s8849_s10 = inlined_call_operand.hbm [shape: f32[1,10], index: 10, kind: input, shape index: {}]   ;;  %s8850_s11 = inlined_call_operand.hbm [shape: f32[2,1,10], index: 11, kind: output, shape index: {}]  }
   0x1   :  { %9092 = sst [smem:[#allocation56_spill]] %s8846_s7 }
   0x2   :  { %9093 = sst [smem:[#allocation57_spill]] %s8847_s8 }
   0x3   :  { %9094 = sst [smem:[#allocation58_spill]] %s8848_s9 }
   0x4   :  { %9095 = sst [smem:[#allocation59_spill]] %s8849_s10 }
   0x5   :  { %16 = vsyncpa [#allocation5], 0 }
   0x6   :  { %18 = vsyncpa [#allocation5 + $0x1], 0 }
   0x7   :  { %19 = vsyncpa [#allocation8], 0 }
   0x8   :  { %20 = vsyncpa [#allocation11], 0 }
   0x9   :  { %21 = vsyncpa [#allocation6], 0 }
   0xa   :  { %23 = vsyncpa [#allocation6 + $0x1], 0  ;;  %s5806_s17 = smov 0   ;;  %s5808_s18 = smov 0  }
   0xb   :  { %s5810_s19 = smov 0   ;;  %s5812_s20 = smov 0  }
   0xc LB: > { %9096 = sst [smem:[#allocation18_spill]] %s5694_s19  ;;  %s5830_s24 = sadd.s32 4294967295, %s5698_s20   ;;  %s5698_s20 = sphi %s5812_s20, %s9548_s20   ;;  %s5694_s19 = sphi %s5810_s19, %s9545_s19   ;;  %s5690_s18 = sphi %s5808_s18, %s9547_s18   ;;  %s5686_s17 = sphi %s5806_s17, %s9546_s17  }
   0xd   : > { %s9097_s7 = sld [smem:[#allocation56_spill]]  ;;  %p4608_p0 = scmp.ge.s32.totalorder %s5698_s20, 1 }
   0xe   : > { %p50_p1 = scmp.eq.s32.totalorder %s5830_s24, 0  ;;  %p296_p2 = scmp.lt.s32.totalorder %s5698_s20, 3 }
   0xf   : > { %s5700_s26 = smov [#allocation7]   ;;  %s9099_s9 = sld [smem:[#allocation58_spill]] }
  0x10   : > { %p5835_p3 = pnand %p4608_p0, %p296_p2  ;;  %s327_s27 = sshll.u32 %s5700_s26, 4  ;;  %s328_s27 = int_to_ptr.vmem [resolvable:$true] %s327_s27 }
  0x11   : > { %s5701_s13 = smov [#allocation10]   ;;  %s5702_s15 = smov 3840  }
  0x12   : > { %p5312_p4 = pneg %p5835_p3  ;;  %s353_s14 = sshll.u32 %s5701_s13, 4  ;;  %s354_s14 = int_to_ptr.vmem [resolvable:$true] %s353_s14 }
  0x13   : > { %s325_s23 = sshll.u32 %s9097_s7, 4  ;;  %s5703_s16 = smov 240   ;;  %s326_s23 = int_to_ptr.hbm [resolvable:$true] %s325_s23 }
  0x14   : > { %p5847_p6 = pnand %p5312_p4, %p50_p1  ;;  %s5704_s21 = smov 128  }
  0x15   : > { %s351_s30 = sshll.u32 %s9099_s9, 4  ;;  %s5705_s22 = smov 8   ;;  %s352_s30 = int_to_ptr.hbm [resolvable:$true] %s351_s30 }
  0x16   : > { %5315 = dma.hbm_to_vmem [thread:$0]  (!%p5847_p6), %s326_s23, 34560, %s328_s27, [#allocation8], %s5702_s15, %s5702_s15, %s5703_s16  }
  0x17   : > { %5321 = dma.hbm_to_vmem [thread:$0]  (!%p5847_p6), %s352_s30, 256, %s354_s14, [#allocation11], %s5704_s21, %s5704_s21, %s5705_s22  }
  0x18   : > { %s9101_s8 = sld [smem:[#allocation57_spill]]  ;;  %s5706_s13 = smov [#allocation9]  }
  0x19   : > { %s342_s23 = sshll.u32 %s5706_s13, 4  ;;  %s9102_s10 = sld [smem:[#allocation59_spill]]  ;;  %s343_s23 = int_to_ptr.vmem [resolvable:$true] %s342_s23 }
  0x1a   : > { %s5707_s30 = smov [#allocation12]   ;;  %s4607_s21 = sadd.s32 4294967294, %s5698_s20  }
  0x1b   : > { %s368_s14 = sshll.u32 %s5707_s30, 4  ;;  %s5867_s22 = sadd.s32 1, %s5698_s20   ;;  %s369_s14 = int_to_ptr.vmem [resolvable:$true] %s368_s14 }
  0x1c   : > { %s33_s26 = ssub.s32 %s5698_s20, %s5867_s22  ;;  %s36_s28 = sadd.s32 1, %s5694_s19 }
  0x1d   : > { %p34_p7 = scmp.eq.s32.totalorder %s33_s26, 0  ;;  %p43_p8 = scmp.ne.s32.totalorder %s5694_s19, %s5690_s18 }
  0x1e   : > { %s340_s29 = sshll.u32 %s9101_s8, 4  ;;  %p44_p9 = scmp.eq.s32.totalorder %s5698_s20, 0  ;;  %s341_s29 = int_to_ptr.hbm [resolvable:$true] %s340_s29 }
  0x1f   : > { %s366_s16 = sshll.u32 %s9102_s10, 4  ;;  %p49_p10 = scmp.ne.s32.totalorder %s5690_s18, %s5686_s17  ;;  %s367_s16 = int_to_ptr.hbm [resolvable:$true] %s366_s16 }
  0x20   : > { %5318 = dma.hbm_to_vmem [thread:$0]  (!%p5847_p6), %s341_s29, 16, %s343_s23, [#allocation8]  }
  0x21   : > { %5324 = dma.hbm_to_vmem [thread:$0]  (!%p5847_p6), %s367_s16, 16, %s369_s14, [#allocation11]  }
  0x22   : > { %s5878_s29 = scalar_select %p34_p7, %s5694_s19, %s36_s28  }
  0x23   : > { %p5880_p11 = por %p44_p9, %p43_p8  ;;  %p5886_p12 = por %p50_p1, %p49_p10 }
  0x24   : > { %9103 = sst [smem:[#allocation19_spill]] %s5878_s29  ;;  %p283_p13 = scmp.eq.s32.totalorder %s5830_s24, 1 }
  0x25   : > { %p289_p0 = scmp.eq.s32.totalorder %s4607_s21, 1  ;;  %p5337_p2 = scmp.lt.s32.totalorder %s5698_s20, 2 }
  0x26   : > { %s379_s23 = sand.u32 1, %s5694_s19   ;;  %p5893_p4 = por %p283_p13, %p43_p8 }
  0x27   : > { %p5897_p6 = por %p289_p0, %p49_p10  ;;  %s4614_s16 = sshll.u32 %s379_s23, 2 }
  0x28   : > { %s4615_s30 = sshll.u32 %s5698_s20, 2  ;;  %s383_s7 = scalar_lea.vmem [#allocation4], %s4614_s16 }
  0x29   : > { %s387_s28 = scalar_lea.hbm %s8839_s0, %s4615_s30  ;;  %s391_s8 = sshll.u32 %s383_s7, 4  ;;  %s392_s8 = int_to_ptr.vmem [resolvable:$true] %s391_s8 }
  0x2a   : > { %s389_s9 = sshll.u32 %s387_s28, 4  ;;  %p5907_p7 = pnand %p5337_p2, %p5880_p11  ;;  %s390_s9 = int_to_ptr.hbm [resolvable:$true] %s389_s9 }
  0x2b   : > { %s380_s10 = scalar_lea.sflag [#allocation5], %s379_s23  ;;  %s5594_s29 = sshra.s32 %s390_s9, 4  ;;  %s5595_s29 = int_to_ptr.hbm [resolvable:$true] %s5594_s29 }
  0x2c   : > { %s5596_s19 = scalar_lea.hbm %s5595_s29, 4  ;;  %p5598_p9 = pneg %p5907_p7 }
  0x2d   : > { %p5597_p8 = scmp.ne.s32.totalorder %s5595_s29, %s5596_s19  ;;  %s5601_s30 = scalar_lea.hbm %s8839_s0, 8 }
  0x2e   : > { %p5602_p11 = scmp.lt.s32.totalorder %s5595_s29, %s8839_s0  ;;  %p5603_p0 = scmp.lt.s32.totalorder %s5601_s30, %s5596_s19 }
  0x2f   : > { %p5599_p10 = pnand %p5598_p9, %p5597_p8 }
  0x30   : > { %p5604_p2 = por %p5603_p0, %p5602_p11 }
  0x31   : > { %p5600_p13 = pneg %p5599_p10 }
  0x33   : > { %p5605_p5 = pnand %p5604_p2, %p5600_p13 }
  0x35   : > { %5608 = shalt.err (!%p5605_p5)
}
  0x36   : > { %5328 = dma.hbm_to_vmem [thread:$0]  (!%p5907_p7), %s390_s9, 64, %s392_s8, %s380_s10  }
  0x37   : > { %400 = sbr.rel (%p5835_p3) target bundleno = 2391 (0x957), region = 64 }
  0x3c   : > { %s5924_s23 = sand.u32 1, %s5690_s18  }
  0x3d   : > { %s4617_s26 = sshll.u32 %s5924_s23, 2  ;;  %s403_s28 = scalar_lea.sflag [#allocation5], %s5924_s23 }
  0x3e   : > { %s5928_s16 = scalar_lea.vmem [#allocation4], %s4617_s26 }
  0x3f   : > { %5669 = dma.done.wait (%p5886_p12), %s403_s28, 64  }
  0x40   : > { %5671 = vsyncadd (%p5886_p12), %s403_s28, 4294967232 }
  0x41   : > { %5673 = dma.done.wait (%p50_p1), [#allocation8], 34576  }
  0x42   : > { %5675 = vsyncadd (%p50_p1), [#allocation8], 4294932720 }
  0x43   : > { %5677 = dma.done.wait (%p50_p1), [#allocation11], 272  }
  0x44   : > { %5679 = vsyncadd (%p50_p1), [#allocation11], 4294967024  ;;  %v5708_v0 = vmov 1   ;;  %v466_v1 = vld [vmem:[%s8840_s1] sm:$0xff]  ;;  %v467_v2 = vld [vmem:[%s8840_s1 + $0x8] sm:$0xff]  ;;  %v5709_v4 = vmov 2   ;;  %v8868_v40 = vlaneseq }
  0x45   : > { %5421 = vset.pattern.permute.xlu0 %v5708_v0  ;;  %5423 = vset.pattern.permute.xlu1 %v5708_v0  ;;  %v468_v3 = vld [vmem:[%s8840_s1 + $0x10] sm:$0x3]  ;;  %v5710_v5 = vmov 0   ;;  %v465_v6 = vld [vmem:[%s5928_s16] sm:$0xf]  ;;  %s5711_s12 = smov 127  }
  0x46   : > { %5425 = vset.pattern.permute.xlu2 %v5708_v0  ;;  %506 = vperm.xlu0 %5421, %v466_v1   ;;  %v5952_v7 = vperm.slane %v465_v6, 2  ;;  %v5954_v8 = vperm.slane %v465_v6, 1  ;;  %v5956_v9 = vperm.slane %v465_v6, 0  ;;  %v5964_v14 = vperm.slane %v465_v6, 3  ;;  %s5712_s21 = smov 126   ;;  %s5715_s26 = smov 28  }
  0x47   : > { %510 = vperm.xlu1 %5423, %v467_v2   ;;  %514 = vperm.xlu2 %5425, %v468_v3   ;;  %v695_v36 = vld [vmem:[%s8841_s2 + $0x10] sm:$0x3]  ;;  %v6008_v41 = vshrl.u32 %v8868_v40, 7  ;;  %v6011_v42 = vand.u32 127, %v8868_v40  ;;  %v8956_v50 = vmov 1.0   ;;  %s9002_s28 = smov 104  }
  0x48   : > { %s5717_s16 = smov 52   ;;  %s9004_s8 = smov 56  }
  0x49   : > { %9109 = vst [vmem:[#allocation20_spill] sm:$0xff] %v6008_v41  ;;  %v6014_v43 = vadd.s32 120, %v6008_v41  ;;  %v6017_v44 = vmul.u32 2, %v6011_v42  ;;  %v6020_v45 = vadd.s32 248, %v6008_v41  ;;  %v6023_v46 = vadd.s32 112, %v6008_v41  ;;  %s5719_s9 = smov 80  }
  0x4a   : > { %v6027_v48 = vadd.s32 240, %v6008_v41  ;;  %v6046_v51 = vadd.s32 104, %v6008_v41  ;;  %v6049_v52 = vadd.s32 232, %v6008_v41  ;;  %v6061_v53 = vadd.s32 96, %v6008_v41  ;;  %s5720_s10 = smov 108   ;;  %s5721_s19 = smov 4  }
  0x4b   : > { %9110 = vst [vmem:[#allocation21_spill] sm:$0xff] %v6014_v43  ;;  %vm8867_vm0 = vcmp.eq.s32.totalorder %v6014_v43, %v6017_v44  ;;  %vm818_vm1 = vcmp.eq.s32.totalorder %v6020_v45, %v6017_v44  ;;  %vm8864_vm2 = vcmp.eq.s32.totalorder %v6023_v46, %v6017_v44  ;;  %v6064_v54 = vadd.s32 224, %v6008_v41  ;;  %s5722_s25 = smov 112   ;;  %s5723_s29 = smov 84  }
  0x4c   : > { %9111 = vst [vmem:[#allocation22_spill] sm:$0xff] %v6017_v44  ;;  %4838 = vmatpush.msk.msra.mxu0 %vm8867_vm0, %v8956_v50  ;;  %vm816_vm3 = vcmp.eq.s32.totalorder %v6027_v48, %v6017_v44  ;;  %4854 = vmatpush.msk.msra.mxu1 %vm818_vm1, %v8956_v50  ;;  %vm8863_vm4 = vcmp.eq.s32.totalorder %v6046_v51, %v6017_v44  ;;  %v6071_v55 = vadd.s32 88, %v6008_v41  ;;  %v6074_v56 = vadd.s32 216, %v6008_v41  ;;  %s8999_s7 = smov 32   ;;  %s5726_s30 = smov 8  }
  0x4d   : > { %9112 = vst [vmem:[#allocation23_spill] sm:$0xff] %v6023_v46  ;;  %vm814_vm5 = vcmp.eq.s32.totalorder %v6049_v52, %v6017_v44  ;;  %v6077_v57 = vadd.s32 376, %v6008_v41  ;;  %v6080_v58 = vadd.s32 80, %v6008_v41  ;;  %vm8860_vm6 = vcmp.eq.s32.totalorder %v6061_v53, %v6017_v44  ;;  %s8989_s14 = smov 12   ;;  %s8991_s13 = smov 36  }
  0x4e   : > { %5422 = vset.pattern.permute.xlu0 %v5709_v4  ;;  %9113 = vst [vmem:[#allocation24_spill] sm:$0xff] %v6046_v51  ;;  %4839 = vmatpush.msk.msra.mxu0 %vm8864_vm2, %v8956_v50  ;;  %vm812_vm7 = vcmp.eq.s32.totalorder %v6064_v54, %v6017_v44  ;;  %v6088_v59 = vadd.s32 208, %v6008_v41  ;;  %vm8859_vm8 = vcmp.eq.s32.totalorder %v6071_v55, %v6017_v44  ;;  %v6105_v60 = vadd.s32 368, %v6008_v41 }
  0x4f   : > { %5424 = vset.pattern.permute.xlu1 %v5709_v4  ;;  %600 = vperm.xlu0 %5422, %v466_v1   ;;  %9114 = vst [vmem:[#allocation25_spill] sm:$0xff] %v6061_v53  ;;  %vm810_vm9 = vcmp.eq.s32.totalorder %v6074_v56, %v6017_v44  ;;  %vm850_vm10 = vcmp.eq.s32.totalorder %v6077_v57, %v6017_v44  ;;  %v6117_v61 = vadd.s32 72, %v6008_v41  ;;  %v6120_v62 = vadd.s32 200, %v6008_v41 }
  0x50   : > { %604 = vperm.xlu1 %5424, %v467_v2   ;;  %5426 = vset.pattern.permute.xlu2 %v5709_v4  ;;  %9115 = vst [vmem:[#allocation26_spill] sm:$0xff] %v6071_v55  ;;  %vm8857_vm11 = vcmp.eq.s32.totalorder %v6080_v58, %v6017_v44  ;;  %vm808_vm12 = vcmp.eq.s32.totalorder %v6088_v59, %v6017_v44  ;;  %v6123_v63 = vadd.s32 360, %v6008_v41  ;;  %v6131_v0 = vadd.s32 64, %v6008_v41 }
  0x51   : > { %608 = vperm.xlu2 %5426, %v468_v3   ;;  %4855 = vmatpush.msk.msra.mxu1 %vm816_vm3, %v8956_v50  ;;  %9116 = vst [vmem:[#allocation27_spill] sm:$0xff] %v6080_v58  ;;  %vm848_vm13 = vcmp.eq.s32.totalorder %v6105_v60, %v6017_v44  ;;  %vm8854_vm14 = vcmp.eq.s32.totalorder %v6117_v61, %v6017_v44  ;;  %v6153_v4 = vadd.s32 184, %v6008_v41  ;;  %v6176_v6 = vadd.s32 48, %v6008_v41 }
  0x52   : > { %4840 = vmatpush.msk.msra.mxu0 %vm8863_vm4, %v8956_v50  ;;  %4870 = vmatpush.msk.msra.mxu2 %vm850_vm10, %v8956_v50  ;;  %9117 = vst [vmem:[#allocation28_spill] sm:$0xff] %v6117_v61  ;;  %vm806_vm15 = vcmp.eq.s32.totalorder %v6120_v62, %v6017_v44  ;;  %vm846_vm1 = vcmp.eq.s32.totalorder %v6123_v63, %v6017_v44 }
  0x53   : > { %4856 = vmatpush.msk.msra.mxu1 %vm814_vm5, %v8956_v50  ;;  %9118 = vst [vmem:[#allocation29_spill] sm:$0xff] %v6120_v62  ;;  %vm8852_vm3 = vcmp.eq.s32.totalorder %v6131_v0, %v6017_v44  ;;  %vm8906_vm10 = vcmp.eq.s32.totalorder %v6153_v4, %v6017_v44 }
  0x54   : > { %4841 = vmatpush.msk.msra.mxu0 %vm8860_vm6, %v8956_v50  ;;  %9119 = vst [vmem:[#allocation30_spill] sm:$0xff] %v6123_v63  ;;  %4871 = vmatpush.msk.msra.mxu2 %vm848_vm13, %v8956_v50 }
  0x55   : > { %4857 = vmatpush.msk.msra.mxu1 %vm812_vm7, %v8956_v50  ;;  %9120 = vst [vmem:[#allocation31_spill] sm:$0xff] %v6131_v0 }
  0x56   : > { %4842 = vmatpush.msk.msra.mxu0 %vm8859_vm8, %v8956_v50  ;;  %4872 = vmatpush.msk.msra.mxu2 %vm846_vm1, %v8956_v50  ;;  %9125 = vst [vmem:[#allocation36_spill] sm:$0xff] %v6176_v6  ;;  %vm8856_vm1 = vcmp.eq.s32.totalorder %v6176_v6, %v6017_v44 }
  0x57   : > { %5429 = vset.pattern.permute.xlu0 %v5710_v5  ;;  %4858 = vmatpush.msk.msra.mxu1 %vm810_vm9, %v8956_v50 }
  0x58   : > { %5427 = vset.pattern.permute.xlu1 %v5710_v5  ;;  %4843 = vmatpush.msk.msra.mxu0 %vm8857_vm11, %v8956_v50 }
  0x59   : > { %471 = vperm.xlu1 %5427, %v466_v1   ;;  %5428 = vset.pattern.permute.xlu2 %v5710_v5  ;;  %v6134_v1 = vadd.s32 192, %v6008_v41  ;;  %v6167_v5 = vadd.s32 344, %v6008_v41 }
  0x5a   : > { %4859 = vmatpush.msk.msra.mxu1 %vm808_vm12, %v8956_v50  ;;  %4844 = vmatpush.msk.msra.mxu0 %vm8854_vm14, %v8956_v50 }
  0x5b   : > { %9121 = vst [vmem:[#allocation32_spill] sm:$0xff] %v6134_v1  ;;  %vm8907_vm5 = vcmp.eq.s32.totalorder %v6134_v1, %v6017_v44  ;;  %vm842_vm13 = vcmp.eq.s32.totalorder %v6167_v5, %v6017_v44 }
  0x5c   : > { %9124 = vst [vmem:[#allocation35_spill] sm:$0xff] %v6167_v5  ;;  %4860 = vmatpush.msk.msra.mxu1 %vm806_vm15, %v8956_v50  ;;  %4845 = vmatpush.msk.msra.mxu0 %vm8852_vm3, %v8956_v50 }
  0x5e   : > { %4861 = vmatpush.msk.msra.mxu1 %vm8907_vm5, %v8956_v50 }
  0x60   : > { %4862 = vmatpush.msk.msra.mxu1 %vm8906_vm10, %v8956_v50 }
  0x61   : > { %476 = vperm.xlu1 %5427, %v467_v2   ;;  %v6137_v2 = vadd.s32 352, %v6008_v41 }
  0x63   : > { %9122 = vst [vmem:[#allocation33_spill] sm:$0xff] %v6137_v2  ;;  %vm844_vm7 = vcmp.eq.s32.totalorder %v6137_v2, %v6017_v44 }
  0x64   : > { %4873 = vmatpush.msk.msra.mxu2 %vm844_vm7, %v8956_v50 }
  0x66   : > { %4874 = vmatpush.msk.msra.mxu2 %vm842_vm13, %v8956_v50 }
  0x69   : > { %481 = vperm.xlu1 %5427, %v468_v3   ;;  %v6140_v3 = vadd.s32 56, %v6008_v41 }
  0x6b   : > { %9123 = vst [vmem:[#allocation34_spill] sm:$0xff] %v6140_v3  ;;  %vm8853_vm9 = vcmp.eq.s32.totalorder %v6140_v3, %v6017_v44 }
  0x6c   : > { %4846 = vmatpush.msk.msra.mxu0 %vm8853_vm9, %v8956_v50 }
  0x6e   : > { %4847 = vmatpush.msk.msra.mxu0 %vm8856_vm1, %v8956_v50 }
  0xa1   : > { %v515_v27 = vpop.permute.xlu2 %514 }
  0xa2   : > { %v527_v28 = vmul.f32 %v515_v27, %v5952_v7  ;;  %v525_v35 = vmul.f32 %v515_v27, %v5956_v9  ;;  %v526_v37 = vmul.f32 %v515_v27, %v5954_v8  ;;  %v528_v39 = vmul.f32 %v515_v27, %v5964_v14 }
  0xa3   : > { %v6314_v27 = vadd.s32 8, %v6008_v41 }
  0xa5   : > { %9134 = vst [vmem:[#allocation45_spill] sm:$0xff] %v6314_v27 }
  0xab   : > { %v609_v31 = vpop.permute.xlu2 %608 }
  0xac   : > { %v620_v32 = vmul.f32 %v609_v31, %v5954_v8  ;;  %v619_v38 = vmul.f32 %v609_v31, %v5956_v9  ;;  %v621_v47 = vmul.f32 %v609_v31, %v5952_v7  ;;  %v622_v49 = vmul.f32 %v609_v31, %v5964_v14 }
  0xad   : > { %v6331_v31 = vadd.s32 416, %v6008_v41 }
  0xaf   : > { %9136 = vst [vmem:[#allocation47_spill] sm:$0xff] %v6331_v31 }
  0xb8   : > { %v507_v10 = vpop.permute.xlu0 %506 }
  0xb9   : > { %v519_v11 = vmul.f32 %v507_v10, %v5952_v7  ;;  %v518_v12 = vmul.f32 %v507_v10, %v5954_v8  ;;  %v517_v13 = vmul.f32 %v507_v10, %v5956_v9  ;;  %v520_v16 = vmul.f32 %v507_v10, %v5964_v14  ;;  %v511_v19 = vpop.permute.xlu1 %510 }
  0xba   : > { %v523_v20 = vmul.f32 %v511_v19, %v5952_v7  ;;  %v521_v24 = vmul.f32 %v511_v19, %v5956_v9  ;;  %v522_v26 = vmul.f32 %v511_v19, %v5954_v8  ;;  %v524_v30 = vmul.f32 %v511_v19, %v5964_v14 }
  0xbb   : > { %545 = vrot.lane.b32.xlu1 %v519_v11, %s5711_s12  ;;  %543 = vrot.lane.b32.xlu0 %v518_v12, %s5711_s12  ;;  %v6179_v10 = vadd.s32 176, %v6008_v41  ;;  %v6191_v11 = vadd.s32 336, %v6008_v41  ;;  %v6213_v12 = vadd.s32 40, %v6008_v41  ;;  %v6250_v19 = vadd.s32 320, %v6008_v41 }
  0xbc   : > { %541 = vrot.lane.b32.xlu2 %v517_v13, %s5711_s12  ;;  %v6216_v13 = vadd.s32 168, %v6008_v41 }
  0xbd   : > { %9126 = vst [vmem:[#allocation37_spill] sm:$0xff] %v6191_v11  ;;  %vm8905_vm7 = vcmp.eq.s32.totalorder %v6179_v10, %v6017_v44  ;;  %vm840_vm3 = vcmp.eq.s32.totalorder %v6191_v11, %v6017_v44  ;;  %vm8855_vm13 = vcmp.eq.s32.totalorder %v6213_v12, %v6017_v44 }
  0xbe   : > { %9127 = vst [vmem:[#allocation38_spill] sm:$0xff] %v6213_v12  ;;  %4875 = vmatpush.msk.msra.mxu2 %vm840_vm3, %v8956_v50  ;;  %4863 = vmatpush.msk.msra.mxu1 %vm8905_vm7, %v8956_v50  ;;  %vm8904_vm9 = vcmp.eq.s32.totalorder %v6216_v13, %v6017_v44 }
  0xbf   : > { %4848 = vmatpush.msk.msra.mxu0 %vm8855_vm13, %v8956_v50  ;;  %9130 = vst [vmem:[#allocation41_spill] sm:$0xff] %v6250_v19  ;;  %vm836_vm13 = vcmp.eq.s32.totalorder %v6250_v19, %v6017_v44 }
  0xc0   : > { %4864 = vmatpush.msk.msra.mxu1 %vm8904_vm9, %v8956_v50 }
  0xc1   : > { %v601_v15 = vpop.permute.xlu0 %600 }
  0xc2   : > { %v612_v17 = vmul.f32 %v601_v15, %v5954_v8  ;;  %v611_v18 = vmul.f32 %v601_v15, %v5956_v9  ;;  %v613_v21 = vmul.f32 %v601_v15, %v5952_v7  ;;  %v614_v22 = vmul.f32 %v601_v15, %v5964_v14  ;;  %v605_v23 = vpop.permute.xlu1 %604 }
  0xc3   : > { %v616_v25 = vmul.f32 %v605_v23, %v5954_v8  ;;  %v615_v29 = vmul.f32 %v605_v23, %v5956_v9  ;;  %v617_v33 = vmul.f32 %v605_v23, %v5952_v7  ;;  %v618_v34 = vmul.f32 %v605_v23, %v5964_v14 }
  0xc4   : > { %547 = vrot.lane.b32.xlu2 %v520_v16, %s5711_s12  ;;  %637 = vrot.lane.b32.xlu1 %v612_v17, %s5712_s21  ;;  %v6219_v15 = vadd.s32 328, %v6008_v41  ;;  %v6239_v17 = vadd.s32 32, %v6008_v41  ;;  %v6268_v23 = vadd.s32 16, %v6008_v41 }
  0xc5   : > { %635 = vrot.lane.b32.xlu0 %v611_v18, %s5712_s21  ;;  %v6247_v18 = vadd.s32 160, %v6008_v41 }
  0xc6   : > { %9128 = vst [vmem:[#allocation39_spill] sm:$0xff] %v6219_v15  ;;  %vm838_vm14 = vcmp.eq.s32.totalorder %v6219_v15, %v6017_v44  ;;  %vm8862_vm8 = vcmp.eq.s32.totalorder %v6268_v23, %v6017_v44 }
  0xc7   : > { %9129 = vst [vmem:[#allocation40_spill] sm:$0xff] %v6239_v17  ;;  %4876 = vmatpush.msk.msra.mxu2 %vm838_vm14, %v8956_v50  ;;  %vm8858_vm14 = vcmp.eq.s32.totalorder %v6239_v17, %v6017_v44  ;;  %vm8895_vm3 = vcmp.eq.s32.totalorder %v6247_v18, %v6017_v44 }
  0xc8   : > { %9132 = vst [vmem:[#allocation43_spill] sm:$0xff] %v6268_v23  ;;  %4849 = vmatpush.msk.msra.mxu0 %vm8858_vm14, %v8956_v50  ;;  %4865 = vmatpush.msk.msra.mxu1 %vm8895_vm3, %v8956_v50 }
  0xc9   : > { %4877 = vmatpush.msk.msra.mxu2 %vm836_vm13, %v8956_v50 }
  0xcb   : > { %v6226_v16 = vpop.permute.xlu1 %471 }
  0xcc   : > { %639 = vrot.lane.b32.xlu2 %v613_v21, %s5712_s21  ;;  %553 = vrot.lane.b32.xlu1 %v523_v20, %s5711_s12  ;;  %v6253_v20 = vadd.s32 24, %v6008_v41  ;;  %v6256_v21 = vadd.s32 152, %v6008_v41 }
  0xcd   : > { %641 = vrot.lane.b32.xlu0 %v614_v22, %s5712_s21  ;;  %v6265_v22 = vadd.s32 312, %v6008_v41 }
  0xce   : > { %9131 = vst [vmem:[#allocation42_spill] sm:$0xff] %v6253_v20  ;;  %vm8861_vm1 = vcmp.eq.s32.totalorder %v6253_v20, %v6017_v44  ;;  %vm8890_vm11 = vcmp.eq.s32.totalorder %v6256_v21, %v6017_v44 }
  0xcf   : > { %vm834_vm14 = vcmp.eq.s32.totalorder %v6265_v22, %v6017_v44  ;;  %4850 = vmatpush.msk.msra.mxu0 %vm8861_vm1, %v8956_v50  ;;  %4866 = vmatpush.msk.msra.mxu1 %vm8890_vm11, %v8956_v50  ;;  %vm1416_vm1 = vcmask 1043456  }
  0xd0   : > { %4878 = vmatpush.msk.msra.mxu2 %vm834_vm14, %v8956_v50 }
  0xd1   : > { %4851 = vmatpush.msk.msra.mxu0 %vm8862_vm8, %v8956_v50  ;;  %vm8865_vm8 = vcmp.eq.s32.totalorder %v6314_v27, %v6017_v44 }
  0xd3   : > { %4852 = vmatpush.msk.msra.mxu0 %vm8865_vm8, %v8956_v50 }
  0xd4   : > { %549 = vrot.lane.b32.xlu2 %v521_v24, %s5711_s12  ;;  %645 = vrot.lane.b32.xlu1 %v616_v25, %s5712_s21  ;;  %v6271_v24 = vadd.s32 144, %v6008_v41  ;;  %v6295_v25 = vadd.s32 304, %v6008_v41 }
  0xd5   : > { %551 = vrot.lane.b32.xlu0 %v522_v26, %s5711_s12  ;;  %v6304_v26 = vadd.s32 424, %v6008_v41 }
  0xd6   : > { %vm8885_vm6 = vcmp.eq.s32.totalorder %v6271_v24, %v6017_v44  ;;  %vm832_vm13 = vcmp.eq.s32.totalorder %v6295_v25, %v6017_v44 }
  0xd7   : > { %9133 = vst [vmem:[#allocation44_spill] sm:$0xff] %v6304_v26  ;;  %vm862_vm14 = vcmp.eq.s32.totalorder %v6304_v26, %v6017_v44  ;;  %4867 = vmatpush.msk.msra.mxu1 %vm8885_vm6, %v8956_v50  ;;  %4879 = vmatpush.msk.msra.mxu2 %vm832_vm13, %v8956_v50  ;;  %vm860_vm13 = vcmp.eq.s32.totalorder %v6331_v31, %v6017_v44 }
  0xdc   : > { %555 = vrot.lane.b32.xlu2 %v524_v30, %s5711_s12  ;;  %561 = vrot.lane.b32.xlu1 %v527_v28, %s5711_s12  ;;  %v6317_v28 = vadd.s32 136, %v6008_v41 }
  0xdd   : > { %643 = vrot.lane.b32.xlu0 %v615_v29, %s5712_s21  ;;  %v6320_v29 = vadd.s32 296, %v6008_v41 }
  0xde   : > { %9135 = vst [vmem:[#allocation46_spill] sm:$0xff] %v6317_v28  ;;  %vm8883_vm4 = vcmp.eq.s32.totalorder %v6317_v28, %v6017_v44 }
  0xdf   : > { %vm830_vm2 = vcmp.eq.s32.totalorder %v6320_v29, %v6017_v44  ;;  %4868 = vmatpush.msk.msra.mxu1 %vm8883_vm4, %v8956_v50 }
  0xe0   : > { %4880 = vmatpush.msk.msra.mxu2 %vm830_vm2, %v8956_v50 }
  0xe4   : > { %647 = vrot.lane.b32.xlu2 %v617_v33, %s5712_s21  ;;  %653 = vrot.lane.b32.xlu1 %v620_v32, %s5712_s21  ;;  %v8870_v32 = vmov 0.0  }
  0xe5   : > { %649 = vrot.lane.b32.xlu0 %v618_v34, %s5712_s21  ;;  %v4728_v33 = vsel %vm862_vm14, 1.0, %v8870_v32  ;;  %v6353_v34 = vadd.s32 128, %v6008_v41  ;;  %vm8866_vm14 = vcmp.eq.s32.totalorder %v6008_v41, %v6017_v44  ;;  %v6415_v32 = vadd.s32 384, %v6008_v41 }
  0xe6   : > { %4886 = vmatpush.msk.msra.mxu3 %vm1416_vm1, %v4728_v33  ;;  %4853 = vmatpush.msk.msra.mxu0 %vm8866_vm14, %v8956_v50  ;;  %v6407_v33 = vadd.s32 264, %v6008_v41 }
  0xe7   : > { %9137 = vst [vmem:[#allocation48_spill] sm:$0xff] %v6353_v34  ;;  %vm8874_vm8 = vcmp.eq.s32.totalorder %v6353_v34, %v6017_v44  ;;  %v6421_v34 = vadd.s32 256, %v6008_v41 }
  0xe8   : > { %4887 = vmatpush.msk.msra.mxu3 %vm860_vm13, %v8956_v50  ;;  %4869 = vmatpush.msk.msra.mxu1 %vm8874_vm8, %v8956_v50  ;;  %9141 = vst [vmem:[#allocation52_spill] sm:$0xff] %v6415_v32  ;;  %vm852_vm8 = vcmp.eq.s32.totalorder %v6415_v32, %v6017_v44 }
  0xec   : > { %557 = vrot.lane.b32.xlu2 %v525_v35, %s5711_s12  ;;  %1863 = vperm.xlu1 %5427, %v695_v36   ;;  %v6356_v35 = vadd.s32 288, %v6008_v41  ;;  %v6358_v36 = vpop.permute.xlu1 %476 }
  0xed   : > { %559 = vrot.lane.b32.xlu0 %v526_v37, %s5711_s12  ;;  %v6368_v37 = vadd.s32 408, %v6008_v41 }
  0xee   : > { %vm828_vm2 = vcmp.eq.s32.totalorder %v6356_v35, %v6017_v44 }
  0xef   : > { %9138 = vst [vmem:[#allocation49_spill] sm:$0xff] %v6368_v37  ;;  %4881 = vmatpush.msk.msra.mxu2 %vm828_vm2, %v8956_v50  ;;  %vm858_vm13 = vcmp.eq.s32.totalorder %v6368_v37, %v6017_v44 }
  0xf0   : > { %4888 = vmatpush.msk.msra.mxu3 %vm858_vm13, %v8956_v50 }
  0xf4   : > { %563 = vrot.lane.b32.xlu2 %v528_v39, %s5711_s12  ;;  %v6383_v39 = vadd.s32 400, %v6008_v41  ;;  %v6431_v28 = vpop.permute.xlu1 %481 }
  0xf5   : > { %651 = vrot.lane.b32.xlu0 %v619_v38, %s5712_s21  ;;  %v6371_v38 = vadd.s32 280, %v6008_v41  ;;  %9142 = vst [vmem:[#allocation53_spill] sm:$0xff] %v6431_v28 }
  0xf6   : > { %9139 = vst [vmem:[#allocation50_spill] sm:$0xff] %v6383_v39  ;;  %vm856_vm0 = vcmp.eq.s32.totalorder %v6383_v39, %v6017_v44 }
  0xf7   : > { %vm826_vm14 = vcmp.eq.s32.totalorder %v6371_v38, %v6017_v44  ;;  %4889 = vmatpush.msk.msra.mxu3 %vm856_vm0, %v8956_v50  ;;  %vm820_vm0 = vcmp.eq.s32.totalorder %v6421_v34, %v6017_v44 }
  0xf8   : > { %4882 = vmatpush.msk.msra.mxu2 %vm826_vm14, %v8956_v50  ;;  %vm822_vm14 = vcmp.eq.s32.totalorder %v6407_v33, %v6017_v44 }
  0xfc   : > { %655 = vrot.lane.b32.xlu2 %v621_v47, %s5712_s21  ;;  %v6395_v47 = vadd.s32 272, %v6008_v41 }
  0xfd   : > { %657 = vrot.lane.b32.xlu0 %v622_v49, %s5712_s21  ;;  %v6401_v49 = vadd.s32 392, %v6008_v41 }
  0xfe   : > { %vm824_vm2 = vcmp.eq.s32.totalorder %v6395_v47, %v6017_v44 }
  0xff   : > { %9140 = vst [vmem:[#allocation51_spill] sm:$0xff] %v6401_v49  ;;  %vm854_vm13 = vcmp.eq.s32.totalorder %v6401_v49, %v6017_v44  ;;  %4883 = vmatpush.msk.msra.mxu2 %vm824_vm2, %v8956_v50  ;;  %v753_v49 = vadd.s32 128, %v6011_v42 }
 0x100   : > { %4890 = vmatpush.msk.msra.mxu3 %vm854_vm13, %v8956_v50 }
 0x101   : > { %4884 = vmatpush.msk.msra.mxu2 %vm822_vm14, %v8956_v50  ;;  %v6434_v41 = vmul.u32 2, %v753_v49 }
 0x102   : > { %4891 = vmatpush.msk.msra.mxu3 %vm852_vm8, %v8956_v50 }
 0x103   : > { %4885 = vmatpush.msk.msra.mxu2 %vm820_vm0, %v8956_v50  ;;  %vm851_vm2 = vcmp.eq.s32.totalorder %v6077_v57, %v6434_v41  ;;  %vm849_vm13 = vcmp.eq.s32.totalorder %v6105_v60, %v6434_v41  ;;  %vm847_vm8 = vcmp.eq.s32.totalorder %v6123_v63, %v6434_v41  ;;  %vm787_vm14 = vcmp.eq.s32.totalorder %v6014_v43, %v6434_v41 }
 0x104   : > { %4927 = vmatpush.msk.msrb.mxu1 %vm851_vm2, %v8956_v50  ;;  %vm819_vm0 = vcmp.eq.s32.totalorder %v6020_v45, %v6434_v41  ;;  %vm845_vm4 = vcmp.eq.s32.totalorder %v6137_v2, %v6434_v41  ;;  %4895 = vmatpush.msk.msrb.mxu3 %vm787_vm14, %v8956_v50  ;;  %vm785_vm2 = vcmp.eq.s32.totalorder %v6023_v46, %v6434_v41 }
 0x105   : > { %4911 = vmatpush.msk.msrb.mxu0 %vm819_vm0, %v8956_v50  ;;  %vm843_vm14 = vcmp.eq.s32.totalorder %v6167_v5, %v6434_v41  ;;  %vm783_vm0 = vcmp.eq.s32.totalorder %v6046_v51, %v6434_v41  ;;  %vm841_vm6 = vcmp.eq.s32.totalorder %v6191_v11, %v6434_v41  ;;  %v493_v2 = vmul.f32 %v5956_v9, %v6226_v16 }
 0x106   : > { %4928 = vmatpush.msk.msrb.mxu1 %vm849_vm13, %v8956_v50  ;;  %vm565_vm13 = vcmask 1039360   ;;  %4896 = vmatpush.msk.msrb.mxu3 %vm785_vm2, %v8956_v50  ;;  %v494_v63 = vmul.f32 %v5954_v8, %v6226_v16  ;;  %vm781_vm2 = vcmp.eq.s32.totalorder %v6061_v53, %v6434_v41  ;;  %vm839_vm11 = vcmp.eq.s32.totalorder %v6219_v15, %v6434_v41 }
 0x107   : > { %vm837_vm3 = vcmp.eq.s32.totalorder %v6250_v19, %v6434_v41  ;;  %vm801_vm9 = vcmp.eq.s32.totalorder %v6179_v10, %v6434_v41  ;;  %vm763_vm7 = vcmp.eq.s32.totalorder %v6253_v20, %v6434_v41  ;;  %vm859_vm10 = vcmp.eq.s32.totalorder %v6368_v37, %v6434_v41 }
 0x108   : > { %4929 = vmatpush.msk.msrb.mxu1 %vm847_vm8, %v8956_v50  ;;  %vm817_vm8 = vcmp.eq.s32.totalorder %v6027_v48, %v6434_v41  ;;  %4897 = vmatpush.msk.msrb.mxu3 %vm783_vm0, %v8956_v50  ;;  %vm811_vm0 = vcmp.eq.s32.totalorder %v6074_v56, %v6434_v41  ;;  %vm761_vm5 = vcmp.eq.s32.totalorder %v6268_v23, %v6434_v41 }
 0x109   : > { %4912 = vmatpush.msk.msrb.mxu0 %vm817_vm8, %v8956_v50  ;;  %vm813_vm8 = vcmp.eq.s32.totalorder %v6064_v54, %v6434_v41 }
 0x10a   : > { %4930 = vmatpush.msk.msrb.mxu1 %vm845_vm4, %v8956_v50  ;;  %vm815_vm4 = vcmp.eq.s32.totalorder %v6049_v52, %v6434_v41  ;;  %4898 = vmatpush.msk.msrb.mxu3 %vm781_vm2, %v8956_v50  ;;  %vm809_vm2 = vcmp.eq.s32.totalorder %v6088_v59, %v6434_v41 }
 0x10b   : > { %4913 = vmatpush.msk.msrb.mxu0 %vm815_vm4, %v8956_v50  ;;  %vm659_vm4 = vcmask 1031168  }
 0x10c   : > { %4931 = vmatpush.msk.msrb.mxu1 %vm843_vm14, %v8956_v50  ;;  %vm779_vm14 = vcmp.eq.s32.totalorder %v6071_v55, %v6434_v41 }
 0x10d   : > { %4914 = vmatpush.msk.msrb.mxu0 %vm813_vm8, %v8956_v50  ;;  %4899 = vmatpush.msk.msrb.mxu3 %vm779_vm14, %v8956_v50  ;;  %vm835_vm8 = vcmp.eq.s32.totalorder %v6265_v22, %v6434_v41  ;;  %vm807_vm14 = vcmp.eq.s32.totalorder %v6120_v62, %v6434_v41 }
 0x10e   : > { %4932 = vmatpush.msk.msrb.mxu1 %vm841_vm6, %v8956_v50  ;;  %vm777_vm6 = vcmp.eq.s32.totalorder %v6080_v58, %v6434_v41 }
 0x10f   : > { %4915 = vmatpush.msk.msrb.mxu0 %vm811_vm0, %v8956_v50  ;;  %4900 = vmatpush.msk.msrb.mxu3 %vm777_vm6, %v8956_v50  ;;  %vm773_vm0 = vcmp.eq.s32.totalorder %v6131_v0, %v6434_v41  ;;  %vm805_vm6 = vcmp.eq.s32.totalorder %v6134_v1, %v6434_v41 }
 0x110   : > { %4933 = vmatpush.msk.msrb.mxu1 %vm839_vm11, %v8956_v50  ;;  %vm775_vm11 = vcmp.eq.s32.totalorder %v6117_v61, %v6434_v41 }
 0x111   : > { %4916 = vmatpush.msk.msrb.mxu0 %vm809_vm2, %v8956_v50  ;;  %4901 = vmatpush.msk.msrb.mxu3 %vm775_vm11, %v8956_v50  ;;  %vm831_vm2 = vcmp.eq.s32.totalorder %v6320_v29, %v6434_v41  ;;  %vm803_vm11 = vcmp.eq.s32.totalorder %v6153_v4, %v6434_v41 }
 0x112   : > { %4934 = vmatpush.msk.msrb.mxu1 %vm837_vm3, %v8956_v50  ;;  %vm833_vm3 = vcmp.eq.s32.totalorder %v6295_v25, %v6434_v41 }
 0x113   : > { %4917 = vmatpush.msk.msrb.mxu0 %vm807_vm14, %v8956_v50  ;;  %4902 = vmatpush.msk.msrb.mxu3 %vm773_vm0, %v8956_v50  ;;  %vm829_vm14 = vcmp.eq.s32.totalorder %v6356_v35, %v6434_v41  ;;  %vm827_vm0 = vcmp.eq.s32.totalorder %v6371_v38, %v6434_v41 }
 0x114   : > { %4935 = vmatpush.msk.msrb.mxu1 %vm835_vm8, %v8956_v50  ;;  %vm771_vm8 = vcmp.eq.s32.totalorder %v6140_v3, %v6434_v41 }
 0x115   : > { %4918 = vmatpush.msk.msrb.mxu0 %vm805_vm6, %v8956_v50  ;;  %4903 = vmatpush.msk.msrb.mxu3 %vm771_vm8, %v8956_v50  ;;  %vm1406_vm6 = vcmask 359424   ;;  %vm799_vm8 = vcmp.eq.s32.totalorder %v6216_v13, %v6434_v41 }
 0x116   : > { %v6322_v30 = vpop.permute.xlu2 %541  ;;  %4936 = vmatpush.msk.msrb.mxu1 %vm833_vm3, %v8956_v50  ;;  %vm769_vm3 = vcmp.eq.s32.totalorder %v6176_v6, %v6434_v41 }
 0x117   : > { %4919 = vmatpush.msk.msrb.mxu0 %vm803_vm11, %v8956_v50  ;;  %4904 = vmatpush.msk.msrb.mxu3 %vm769_vm3, %v8956_v50  ;;  %vm825_vm11 = vcmp.eq.s32.totalorder %v6395_v47, %v6434_v41  ;;  %vm797_vm3 = vcmp.eq.s32.totalorder %v6247_v18, %v6434_v41 }
 0x118   : > { %4937 = vmatpush.msk.msrb.mxu1 %vm831_vm2, %v8956_v50  ;;  %vm767_vm2 = vcmp.eq.s32.totalorder %v6213_v12, %v6434_v41 }
 0x119   : > { %4920 = vmatpush.msk.msrb.mxu0 %vm801_vm9, %v8956_v50  ;;  %vm863_vm9 = vcmp.eq.s32.totalorder %v6304_v26, %v6434_v41  ;;  %4905 = vmatpush.msk.msrb.mxu3 %vm767_vm2, %v8956_v50  ;;  %vm795_vm2 = vcmp.eq.s32.totalorder %v6256_v21, %v6434_v41 }
 0x11a   : > { %4938 = vmatpush.msk.msrb.mxu1 %vm829_vm14, %v8956_v50  ;;  %vm765_vm14 = vcmp.eq.s32.totalorder %v6239_v17, %v6434_v41 }
 0x11b   : > { %4921 = vmatpush.msk.msrb.mxu0 %vm799_vm8, %v8956_v50  ;;  %vm861_vm8 = vcmp.eq.s32.totalorder %v6331_v31, %v6434_v41  ;;  %4906 = vmatpush.msk.msrb.mxu3 %vm765_vm14, %v8956_v50  ;;  %vm793_vm14 = vcmp.eq.s32.totalorder %v6271_v24, %v6434_v41 }
 0x11c   : > { %4939 = vmatpush.msk.msrb.mxu1 %vm827_vm0, %v8956_v50  ;;  %vm823_vm0 = vcmp.eq.s32.totalorder %v6407_v33, %v6434_v41 }
 0x11d   : > { %4922 = vmatpush.msk.msrb.mxu0 %vm797_vm3, %v8956_v50  ;;  %4907 = vmatpush.msk.msrb.mxu3 %vm763_vm7, %v8956_v50  ;;  %vm857_vm3 = vcmp.eq.s32.totalorder %v6383_v39, %v6434_v41  ;;  %v9147_v39 = vld [vmem:[#allocation46_spill] sm:$0xff] }
 0x11e   : > { %v6409_v40 = vpop.permute.xlu2 %547  ;;  %4940 = vmatpush.msk.msrb.mxu1 %vm825_vm11, %v8956_v50 }
 0x11f   : > { %4923 = vmatpush.msk.msrb.mxu0 %vm795_vm2, %v8956_v50  ;;  %4908 = vmatpush.msk.msrb.mxu3 %vm761_vm5, %v8956_v50 }
 0x120   : > { %4941 = vmatpush.msk.msrb.mxu1 %vm823_vm0, %v8956_v50 }
 0x121   : > { %4924 = vmatpush.msk.msrb.mxu0 %vm793_vm14, %v8956_v50 }
 0x126   : > { %v6436_v27 = vpop.permute.xlu2 %639 }
 0x12d   : > { %v6453_v42 = vpop.permute.xlu1 %545  ;;  %v544_v49 = vpop.permute.xlu0 %543 }
 0x12e   : > { %v6457_v28 = vpop.permute.xlu2 %549  ;;  %v567_v11 = vsel %vm565_vm13, %v544_v49, %v6453_v42  ;;  %v566_v5 = vsel %vm565_vm13, %v6322_v30, %v544_v49 }
 0x12f   : > { %v588_v15 = vadd.f32 %v567_v11, %v494_v63  ;;  %v587_v30 = vadd.f32 %v566_v5, %v493_v2  ;;  %v496_v2 = vmul.f32 %v5964_v14, %v6226_v16 }
 0x136   : > { %v6502_v53 = vpop.permute.xlu2 %555  ;;  %v638_v55 = vpop.permute.xlu1 %637 }
 0x137   : > { %v661_v49 = vsel %vm659_vm4, %v638_v55, %v6436_v27  ;;  %v636_v19 = vpop.permute.xlu0 %635 }
 0x138   : > { %v6515_v63 = vadd.f32 %v661_v49, %v588_v15  ;;  %v660_v11 = vsel %vm659_vm4, %v636_v19, %v638_v55  ;;  %v495_v55 = vmul.f32 %v5952_v7, %v6226_v16  ;;  %v568_v15 = vsel %vm565_vm13, %v6453_v42, %v6409_v40 }
 0x139   : > { %v6525_v5 = vadd.f32 %v660_v11, %v587_v30  ;;  %v590_v16 = vadd.f32 %v6409_v40, %v496_v2 }
 0x13a   : > { %1465 = vmatmul.f32.vlgmr.msra.gmra.mxu1 %v6515_v63  ;;  %v589_v42 = vadd.f32 %v568_v15, %v495_v55  ;;  %v6601_v15 = vadd.s32 1, %v6434_v41 }
 0x13b   : > { %9143 = vst [vmem:[#allocation54_spill] sm:$0xff] %v6525_v5  ;;  %1439 = vmatmul.f32.vlgmr.msra.gmra.mxu0 %v6525_v5 }
 0x13c   : > { %vm1145_vm11 = vcmp.eq.s32.totalorder %v6020_v45, %v6601_v15  ;;  %vm1143_vm0 = vcmp.eq.s32.totalorder %v6027_v48, %v6601_v15  ;;  %vm1141_vm2 = vcmp.eq.s32.totalorder %v6049_v52, %v6601_v15 }
 0x13e   : > { %v6560_v19 = vpop.permute.xlu1 %553  ;;  %v6567_v49 = vpop.permute.xlu2 %647 }
 0x13f   : > { %v642_v30 = vpop.permute.xlu0 %641 }
 0x140   : > { %v662_v11 = vsel %vm659_vm4, %v6436_v27, %v642_v30  ;;  %v6571_v40 = vadd.f32 %v642_v30, %v590_v16  ;;  %v9145_v27 = vmov 0.0  }
 0x141   : > { %v6575_v2 = vadd.f32 %v662_v11, %v589_v42  ;;  %v4729_v55 = vsel %vm863_vm9, 1.0, %v9145_v27  ;;  %vm821_vm9 = vcmp.eq.s32.totalorder %v6421_v34, %v6434_v41  ;;  %v498_v42 = vmul.f32 %v5954_v8, %v6358_v36 }
 0x142   : > { %9144 = vst [vmem:[#allocation55_spill] sm:$0xff] %v6571_v40  ;;  %4892 = vmatmul.msk.f32.vlgmr.msra.gmra.mxu3 %vm1406_vm6, %v6571_v40  ;;  %4943 = vmatpush.msk.msrb.mxu2 %vm1416_vm1, %v4729_v55  ;;  %v9146_v55 = vld [vmem:[#allocation45_spill] sm:$0xff]  ;;  %v6642_v40 = vadd.s32 1, %v6017_v44  ;;  %v9151_v44 = vld [vmem:[#allocation48_spill] sm:$0xff] }
 0x143   : > { %1491 = vmatmul.f32.vlgmr.msra.gmra.mxu2 %v6575_v2  ;;  %4942 = vmatpush.msk.msrb.mxu1 %vm821_vm9, %v8956_v50  ;;  %vm759_vm7 = vcmp.eq.s32.totalorder %v9146_v55, %v6434_v41  ;;  %vm789_vm9 = vcmp.eq.s32.totalorder %v9151_v44, %v6434_v41 }
 0x144   : > { %4944 = vmatpush.msk.msrb.mxu2 %vm861_vm8, %v8956_v50  ;;  %vm791_vm8 = vcmp.eq.s32.totalorder %v9147_v39, %v6434_v41  ;;  %9148 = vst [vmem:[#allocation46_spill] sm:$0xff] %v6642_v40  ;;  %4909 = vmatpush.msk.msrb.mxu3 %vm759_vm7, %v8956_v50  ;;  %vm8943_vm14 = vcmp.eq.s32.totalorder %v6014_v43, %v6642_v40 }
 0x145   : > { %5025 = vmatpush.msk.msra.mxu1 %vm1145_vm11, %v8956_v50  ;;  %4925 = vmatpush.msk.msrb.mxu0 %vm791_vm8, %v8956_v50  ;;  %vm853_vm11 = vcmp.eq.s32.totalorder %v6415_v32, %v6434_v41  ;;  %vm1144_vm7 = vcmp.eq.s32.totalorder %v6020_v45, %v6642_v40  ;;  %vm8922_vm8 = vcmp.eq.s32.totalorder %v6023_v46, %v6642_v40 }
 0x146   : > { %v646_v16 = vpop.permute.xlu1 %645  ;;  %4945 = vmatpush.msk.msrb.mxu2 %vm859_vm10, %v8956_v50  ;;  %v6644_v5 = vpop.permute.xlu2 %557 }
 0x147   : > { %v552_v30 = vpop.permute.xlu0 %551  ;;  %v664_v31 = vsel %vm659_vm4, %v646_v16, %v6567_v49  ;;  %5026 = vmatpush.msk.msra.mxu1 %vm1143_vm0, %v8956_v50  ;;  %vm1139_vm0 = vcmp.eq.s32.totalorder %v6064_v54, %v6601_v15  ;;  %4926 = vmatpush.msk.msrb.mxu0 %vm789_vm9, %v8956_v50  ;;  %vm8925_vm9 = vcmp.eq.s32.totalorder %v6046_v51, %v6642_v40 }
 0x148   : > { %v570_v11 = vsel %vm565_vm13, %v552_v30, %v6560_v19  ;;  %4946 = vmatpush.msk.msrb.mxu2 %vm857_vm3, %v8956_v50  ;;  %v569_v26 = vsel %vm565_vm13, %v6457_v28, %v552_v30  ;;  %vm1176_vm3 = vcmp.eq.s32.totalorder %v6077_v57, %v6642_v40  ;;  %v9155_v30 = vld [vmem:[#allocation33_spill] sm:$0xff] }
 0x149   : > { %v592_v37 = vadd.f32 %v570_v11, %v498_v42  ;;  %v9149_v42 = vld [vmem:[#allocation51_spill] sm:$0xff]  ;;  %v9150_v11 = vld [vmem:[#allocation20_spill] sm:$0xff]  ;;  %5027 = vmatpush.msk.msra.mxu1 %vm1141_vm2, %v8956_v50  ;;  %4984 = vmatpush.msk.msra.mxu0 %vm1176_vm3, %v8956_v50  ;;  %vm1142_vm2 = vcmp.eq.s32.totalorder %v6027_v48, %v6642_v40  ;;  %vm1135_vm3 = vcmp.eq.s32.totalorder %v6088_v59, %v6601_v15  ;;  %v9154_v48 = vld [vmem:[#allocation25_spill] sm:$0xff] }
 0x14a   : > { %vm855_vm10 = vcmp.eq.s32.totalorder %v9149_v42, %v6434_v41  ;;  %vm757_vm5 = vcmp.eq.s32.totalorder %v9150_v11, %v6434_v41 }
 0x14b   : > { %v6654_v27 = vadd.f32 %v664_v31, %v592_v37  ;;  %4947 = vmatpush.msk.msrb.mxu2 %vm855_vm10, %v8956_v50  ;;  %v497_v31 = vmul.f32 %v5956_v9, %v6358_v36  ;;  %4910 = vmatpush.msk.msrb.mxu3 %vm757_vm5, %v8956_v50  ;;  %vm1174_vm10 = vcmp.eq.s32.totalorder %v6105_v60, %v6642_v40  ;;  %v9153_v37 = vld [vmem:[#allocation30_spill] sm:$0xff] }
 0x14c   : > { %vm1137_vm5 = vcmp.eq.s32.totalorder %v6074_v56, %v6601_v15  ;;  %5028 = vmatpush.msk.msra.mxu1 %vm1139_vm0, %v8956_v50  ;;  %4985 = vmatpush.msk.msra.mxu0 %vm1174_vm10, %v8956_v50  ;;  %vm1140_vm0 = vcmp.eq.s32.totalorder %v6049_v52, %v6642_v40  ;;  %vm1133_vm10 = vcmp.eq.s32.totalorder %v6120_v62, %v6601_v15 }
 0x14d   : > { %1468 = vmatmul.f32.gmra.mxu1 %v6654_v27  ;;  %v591_v41 = vadd.f32 %v569_v26, %v497_v31  ;;  %4948 = vmatpush.msk.msrb.mxu2 %vm853_vm11, %v8956_v50  ;;  %vm1172_vm11 = vcmp.eq.s32.totalorder %v9153_v37, %v6642_v40  ;;  %v571_v31 = vsel %vm565_vm13, %v6560_v19, %v6502_v53  ;;  %v9156_v19 = vld [vmem:[#allocation26_spill] sm:$0xff] }
 0x14e   : > { %4952 = vmatpush.msk.msra.mxu3 %vm8943_vm14, %v8956_v50  ;;  %5029 = vmatpush.msk.msra.mxu1 %vm1137_vm5, %v8956_v50  ;;  %vm1138_vm5 = vcmp.eq.s32.totalorder %v6064_v54, %v6642_v40  ;;  %v499_v52 = vmul.f32 %v5952_v7, %v6358_v36  ;;  %vm8946_vm14 = vcmp.eq.s32.totalorder %v6253_v20, %v6642_v40 }
 0x14f   : > { %v644_v28 = vpop.permute.xlu0 %643  ;;  %4968 = vmatpush.msk.msra.mxu2 %vm1144_vm7, %v8956_v50  ;;  %vm8929_vm7 = vcmp.eq.s32.totalorder %v9154_v48, %v6642_v40  ;;  %4986 = vmatpush.msk.msra.mxu0 %vm1172_vm11, %v8956_v50 }
 0x150   : > { %v663_v45 = vsel %vm659_vm4, %v644_v28, %v646_v16  ;;  %4953 = vmatpush.msk.msra.mxu3 %vm8922_vm8, %v8956_v50  ;;  %v500_v16 = vmul.f32 %v5964_v14, %v6358_v36  ;;  %vm1170_vm8 = vcmp.eq.s32.totalorder %v9155_v30, %v6642_v40  ;;  %v6739_v28 = vpop.permute.xlu1 %561  ;;  %5030 = vmatpush.msk.msra.mxu1 %vm1135_vm3, %v8956_v50 }
 0x151   : > { %v6698_v26 = vadd.f32 %v663_v45, %v591_v41  ;;  %4969 = vmatpush.msk.msra.mxu2 %vm1142_vm2, %v8956_v50  ;;  %v6726_v41 = vpop.permute.xlu2 %563  ;;  %vm8928_vm2 = vcmp.eq.s32.totalorder %v9156_v19, %v6642_v40  ;;  %v9157_v45 = vld [vmem:[#allocation35_spill] sm:$0xff]  ;;  %4987 = vmatpush.msk.msra.mxu0 %vm1170_vm8, %v8956_v50  ;;  %vm1131_vm3 = vcmp.eq.s32.totalorder %v6134_v1, %v6601_v15 }
 0x152   : > { %4954 = vmatpush.msk.msra.mxu3 %vm8925_vm9, %v8956_v50  ;;  %vm1168_vm11 = vcmp.eq.s32.totalorder %v9157_v45, %v6642_v40  ;;  %v594_v32 = vadd.f32 %v6502_v53, %v500_v16  ;;  %v593_v54 = vadd.f32 %v571_v31, %v499_v52  ;;  %5031 = vmatpush.msk.msra.mxu1 %vm1133_vm10, %v8956_v50  ;;  %v9158_v53 = vld [vmem:[#allocation37_spill] sm:$0xff] }
 0x153   : > { %9152 = vst [vmem:[#allocation51_spill] sm:$0xff] %v6698_v26  ;;  %1442 = vmatmul.f32.gmra.mxu0 %v6698_v26  ;;  %4970 = vmatpush.msk.msra.mxu2 %vm1140_vm0, %v8956_v50  ;;  %vm1136_vm0 = vcmp.eq.s32.totalorder %v6074_v56, %v6642_v40  ;;  %vm1166_vm9 = vcmp.eq.s32.totalorder %v9158_v53, %v6642_v40 }
 0x154   : > { %4955 = vmatpush.msk.msra.mxu3 %vm8929_vm7, %v8956_v50  ;;  %4988 = vmatpush.msk.msra.mxu0 %vm1168_vm11, %v8956_v50  ;;  %vm8930_vm8 = vcmp.eq.s32.totalorder %v6080_v58, %v6642_v40  ;;  %vm1129_vm10 = vcmp.eq.s32.totalorder %v6153_v4, %v6601_v15  ;;  %vm8931_vm11 = vcmp.eq.s32.totalorder %v6117_v61, %v6642_v40 }
 0x155   : > { %4971 = vmatpush.msk.msra.mxu2 %vm1138_vm5, %v8956_v50  ;;  %5032 = vmatpush.msk.msra.mxu1 %vm1131_vm3, %v8956_v50  ;;  %vm1134_vm5 = vcmp.eq.s32.totalorder %v6088_v59, %v6642_v40  ;;  %vm1127_vm3 = vcmp.eq.s32.totalorder %v6179_v10, %v6601_v15  ;;  %v9188_v59 = vld [vmem:[#allocation23_spill] sm:$0xff] }
 0x156   : > { %4956 = vmatpush.msk.msra.mxu3 %vm8928_vm2, %v8956_v50  ;;  %4989 = vmatpush.msk.msra.mxu0 %vm1166_vm9, %v8956_v50  ;;  %vm8935_vm9 = vcmp.eq.s32.totalorder %v6131_v0, %v6642_v40 }
 0x157   : > { %v650_v36 = vpop.permute.xlu0 %649  ;;  %4972 = vmatpush.msk.msra.mxu2 %vm1136_vm0, %v8956_v50  ;;  %vm8932_vm0 = vcmp.eq.s32.totalorder %v6120_v62, %v6642_v40  ;;  %5033 = vmatpush.msk.msra.mxu1 %vm1129_vm10, %v8956_v50  ;;  %vm1125_vm10 = vcmp.eq.s32.totalorder %v6216_v13, %v6601_v15 }
 0x158   : > { %v665_v16 = vsel %vm659_vm4, %v6567_v49, %v650_v36  ;;  %v6763_v26 = vadd.f32 %v650_v36, %v594_v32  ;;  %v9159_v32 = vld [vmem:[#allocation39_spill] sm:$0xff]  ;;  %4957 = vmatpush.msk.msra.mxu3 %vm8930_vm8, %v8956_v50  ;;  %v9160_v49 = vld [vmem:[#allocation41_spill] sm:$0xff]  ;;  %vm8936_vm8 = vcmp.eq.s32.totalorder %v6134_v1, %v6642_v40  ;;  %v654_v52 = vpop.permute.xlu1 %653 }
 0x159   : > { %v6772_v56 = vadd.f32 %v665_v16, %v593_v54  ;;  %vm1164_vm2 = vcmp.eq.s32.totalorder %v9159_v32, %v6642_v40  ;;  %4973 = vmatpush.msk.msra.mxu2 %vm1134_vm5, %v8956_v50  ;;  %vm1162_vm7 = vcmp.eq.s32.totalorder %v9160_v49, %v6642_v40  ;;  %v6814_v31 = vpop.permute.xlu2 %655  ;;  %5034 = vmatpush.msk.msra.mxu1 %vm1127_vm3, %v8956_v50  ;;  %v9161_v54 = vld [vmem:[#allocation53_spill] sm:$0xff] }
 0x15a   : > { %4893 = vmatmul.msk.f32.gmra.mxu3 %vm1406_vm6, %v6763_v26  ;;  %4990 = vmatpush.msk.msra.mxu0 %vm1164_vm2, %v8956_v50  ;;  %vm1160_vm2 = vcmp.eq.s32.totalorder %v6265_v22, %v6642_v40  ;;  %v502_v36 = vmul.f32 %v5954_v8, %v9161_v54  ;;  %vm1123_vm3 = vcmp.eq.s32.totalorder %v6247_v18, %v6601_v15 }
 0x15b   : > { %1494 = vmatmul.f32.gmra.mxu2 %v6772_v56  ;;  %4958 = vmatpush.msk.msra.mxu3 %vm8931_vm11, %v8956_v50  ;;  %vm8939_vm11 = vcmp.eq.s32.totalorder %v6140_v3, %v6642_v40  ;;  %v667_v1 = vsel %vm659_vm4, %v654_v52, %v6814_v31 }
 0x15c   : > { %4974 = vmatpush.msk.msra.mxu2 %vm8932_vm0, %v8956_v50  ;;  %4991 = vmatpush.msk.msra.mxu0 %vm1162_vm7, %v8956_v50  ;;  %vm8942_vm0 = vcmp.eq.s32.totalorder %v6153_v4, %v6642_v40  ;;  %vm1158_vm7 = vcmp.eq.s32.totalorder %v6295_v25, %v6642_v40 }
 0x15d   : > { %4959 = vmatpush.msk.msra.mxu3 %vm8935_vm9, %v8956_v50  ;;  %5035 = vmatpush.msk.msra.mxu1 %vm1125_vm10, %v8956_v50  ;;  %vm8940_vm9 = vcmp.eq.s32.totalorder %v6176_v6, %v6642_v40  ;;  %vm1121_vm10 = vcmp.eq.s32.totalorder %v6256_v21, %v6601_v15 }
 0x15e   : > { %4975 = vmatpush.msk.msra.mxu2 %vm8936_vm8, %v8956_v50  ;;  %4992 = vmatpush.msk.msra.mxu0 %vm1160_vm2, %v8956_v50  ;;  %vm8941_vm8 = vcmp.eq.s32.totalorder %v6179_v10, %v6642_v40  ;;  %vm1156_vm2 = vcmp.eq.s32.totalorder %v6320_v29, %v6642_v40 }
 0x15f   : > { %v560_v16 = vpop.permute.xlu0 %559  ;;  %4960 = vmatpush.msk.msra.mxu3 %vm8939_vm11, %v8956_v50  ;;  %5036 = vmatpush.msk.msra.mxu1 %vm1123_vm3, %v8956_v50  ;;  %vm8944_vm11 = vcmp.eq.s32.totalorder %v6213_v12, %v6642_v40  ;;  %vm1119_vm3 = vcmp.eq.s32.totalorder %v6271_v24, %v6601_v15 }
 0x160   : > { %v573_v62 = vsel %vm565_vm13, %v560_v16, %v6739_v28  ;;  %4976 = vmatpush.msk.msra.mxu2 %vm8942_vm0, %v8956_v50  ;;  %4993 = vmatpush.msk.msra.mxu0 %vm1158_vm7, %v8956_v50  ;;  %vm8945_vm7 = vcmp.eq.s32.totalorder %v6239_v17, %v6642_v40  ;;  %vm8947_vm0 = vcmp.eq.s32.totalorder %v6247_v18, %v6642_v40 }
 0x161   : > { %v596_v8 = vadd.f32 %v573_v62, %v502_v36  ;;  %4961 = vmatpush.msk.msra.mxu3 %vm8940_vm9, %v8956_v50  ;;  %v572_v36 = vsel %vm565_vm13, %v6644_v5, %v560_v16  ;;  %5037 = vmatpush.msk.msra.mxu1 %vm1121_vm10, %v8956_v50  ;;  %vm8955_vm9 = vcmp.eq.s32.totalorder %v6216_v13, %v6642_v40 }
 0x162   : > { %4977 = vmatpush.msk.msra.mxu2 %vm8941_vm8, %v8956_v50  ;;  %vm1154_vm10 = vcmp.eq.s32.totalorder %v6356_v35, %v6642_v40  ;;  %vm1117_vm8 = vcmp.eq.s32.totalorder %v9147_v39, %v6601_v15  ;;  %4994 = vmatpush.msk.msra.mxu0 %vm1156_vm2, %v8956_v50  ;;  %vm1152_vm2 = vcmp.eq.s32.totalorder %v6371_v38, %v6642_v40 }
 0x163   : > { %v6865_v62 = vadd.f32 %v667_v1, %v596_v8  ;;  %v501_v1 = vmul.f32 %v5956_v9, %v9161_v54  ;;  %4962 = vmatpush.msk.msra.mxu3 %vm8944_vm11, %v8956_v50  ;;  %5038 = vmatpush.msk.msra.mxu1 %vm1119_vm3, %v8956_v50  ;;  %vm1115_vm3 = vcmp.eq.s32.totalorder %v9151_v44, %v6601_v15 }
 0x164   : > { %4978 = vmatpush.msk.msra.mxu2 %vm8955_vm9, %v8956_v50  ;;  %4995 = vmatpush.msk.msra.mxu0 %vm1154_vm10, %v8956_v50  ;;  %vm8954_vm11 = vcmp.eq.s32.totalorder %v6256_v21, %v6642_v40  ;;  %vm8948_vm10 = vcmp.eq.s32.totalorder %v6268_v23, %v6642_v40  ;;  %vm1107_vm9 = vcmp.eq.s32.totalorder %v9154_v48, %v6601_v15 }
 0x165   : > { %1471 = vmatmul.f32.gmra.mxu1 %v6865_v62  ;;  %v595_v9 = vadd.f32 %v572_v36, %v501_v1  ;;  %4963 = vmatpush.msk.msra.mxu3 %vm8945_vm7, %v8956_v50  ;;  %vm8953_vm7 = vcmp.eq.s32.totalorder %v6271_v24, %v6642_v40  ;;  %v574_v36 = vsel %vm565_vm13, %v6739_v28, %v6726_v41 }
 0x166   : > { %5039 = vmatpush.msk.msra.mxu1 %vm1117_vm8, %v8956_v50  ;;  %4979 = vmatpush.msk.msra.mxu2 %vm8947_vm0, %v8956_v50  ;;  %vm1150_vm8 = vcmp.eq.s32.totalorder %v6395_v47, %v6642_v40  ;;  %vm1148_vm0 = vcmp.eq.s32.totalorder %v6407_v33, %v6642_v40  ;;  %v503_v1 = vmul.f32 %v5952_v7, %v9161_v54 }
 0x167   : > { %v652_v5 = vpop.permute.xlu0 %651  ;;  %4964 = vmatpush.msk.msra.mxu3 %vm8946_vm14, %v8956_v50  ;;  %4996 = vmatpush.msk.msra.mxu0 %vm1152_vm2, %v8956_v50  ;;  %vm8950_vm14 = vcmp.eq.s32.totalorder %v9146_v55, %v6642_v40  ;;  %vm8952_vm2 = vcmp.eq.s32.totalorder %v9147_v39, %v6642_v40 }
 0x168   : > { %v666_v16 = vsel %vm659_vm4, %v652_v5, %v654_v52  ;;  %5040 = vmatpush.msk.msra.mxu1 %vm1115_vm3, %v8956_v50  ;;  %4980 = vmatpush.msk.msra.mxu2 %vm8954_vm11, %v8956_v50  ;;  %v504_v52 = vmul.f32 %v5964_v14, %v9161_v54  ;;  %vm8949_vm3 = vcmp.eq.s32.totalorder %v9150_v11, %v6642_v40  ;;  %v9163_v5 = vmov 0.0  }
 0x169   : > { %v6921_v8 = vadd.f32 %v666_v16, %v595_v9  ;;  %4965 = vmatpush.msk.msra.mxu3 %vm8948_vm10, %v8956_v50  ;;  %4997 = vmatpush.msk.msra.mxu0 %vm1150_vm8, %v8956_v50  ;;  %vm1146_vm10 = vcmp.eq.s32.totalorder %v6421_v34, %v6642_v40  ;;  %vm8951_vm8 = vcmp.eq.s32.totalorder %v9151_v44, %v6642_v40 }
 0x16a   : > { %4981 = vmatpush.msk.msra.mxu2 %vm8953_vm7, %v8956_v50  ;;  %v598_v14 = vadd.f32 %v6726_v41, %v504_v52  ;;  %v597_v7 = vadd.f32 %v574_v36, %v503_v1  ;;  %v9164_v52 = vld [vmem:[#allocation47_spill] sm:$0xff]  ;;  %v9165_v36 = vld [vmem:[#allocation54_spill] sm:$0xff]  ;;  %vm1109_vm7 = vcmp.eq.s32.totalorder %v6046_v51, %v6601_v15  ;;  %vm1173_vm11 = vcmp.eq.s32.totalorder %v9153_v37, %v6601_v15  ;;  %v9170_v37 = vld [vmem:[#allocation52_spill] sm:$0xff] }
 0x16b   : > { %1445 = vmatmul.f32.gmra.mxu0 %v6921_v8  ;;  %4966 = vmatpush.msk.msra.mxu3 %vm8950_vm14, %v8956_v50  ;;  %vm1186_vm14 = vcmp.eq.s32.totalorder %v9164_v52, %v6642_v40  ;;  %v9166_v1 = vld [vmem:[#allocation55_spill] sm:$0xff] }
 0x16c   : > { %4998 = vmatpush.msk.msra.mxu0 %vm1148_vm0, %v8956_v50  ;;  %4982 = vmatpush.msk.msra.mxu2 %vm8952_vm2, %v8956_v50 }
 0x16d   : > { %1595 = vmatmul.f32.vlgmr.msrb.gmra.mxu1 %v6575_v2  ;;  %4967 = vmatpush.msk.msra.mxu3 %vm8949_vm3, %v8956_v50  ;;  %vm1177_vm3 = vcmp.eq.s32.totalorder %v6077_v57, %v6601_v15  ;;  %v9167_v57 = vld [vmem:[#allocation49_spill] sm:$0xff] }
 0x16e   : > { %4999 = vmatpush.msk.msra.mxu0 %vm1146_vm10, %v8956_v50  ;;  %4983 = vmatpush.msk.msra.mxu2 %vm8951_vm8, %v8956_v50  ;;  %vm1113_vm10 = vcmp.eq.s32.totalorder %v6014_v43, %v6601_v15  ;;  %vm1175_vm8 = vcmp.eq.s32.totalorder %v6105_v60, %v6601_v15  ;;  %vm1184_vm2 = vcmp.eq.s32.totalorder %v9167_v57, %v6642_v40  ;;  %v9169_v60 = vld [vmem:[#allocation51_spill] sm:$0xff] }
 0x16f   : > { %v658_v28 = vpop.permute.xlu0 %657 }
 0x170   : > { %v668_v41 = vsel %vm659_vm4, %v6814_v31, %v658_v28  ;;  %v6985_v54 = vadd.f32 %v658_v28, %v598_v14  ;;  %v9162_v31 = vld [vmem:[#allocation44_spill] sm:$0xff]  ;;  %v9168_v14 = vld [vmem:[#allocation50_spill] sm:$0xff] }
 0x171   : > { %v6992_v9 = vadd.f32 %v668_v41, %v597_v7  ;;  %vm1188_vm0 = vcmp.eq.s32.totalorder %v9162_v31, %v6642_v40 }
 0x172   : > { %4894 = vmatmul.msk.f32.gmra.mxu3 %vm1406_vm6, %v6985_v54  ;;  %v4836_v16 = vsel %vm1188_vm0, 1.0, %v9163_v5  ;;  %vm1111_vm0 = vcmp.eq.s32.totalorder %v6023_v46, %v6601_v15 }
 0x173   : > { %1497 = vmatmul.f32.gmra.mxu2 %v6992_v9  ;;  %1569 = vmatmul.f32.vlgmr.msrb.gmra.mxu0 %v6515_v63 }
 0x174   : > { %5000 = vmatpush.msk.msrb.mxu0 %vm1416_vm1, %v4836_v16 }
 0x175   : > { %1598 = vmatmul.f32.gmra.mxu1 %v6772_v56 }
 0x176   : > { %5001 = vmatpush.msk.msrb.mxu0 %vm1186_vm14, %v8956_v50  ;;  %vm1182_vm14 = vcmp.eq.s32.totalorder %v9168_v14, %v6642_v40 }
 0x178   : > { %5002 = vmatpush.msk.msrb.mxu0 %vm1184_vm2, %v8956_v50  ;;  %vm1169_vm2 = vcmp.eq.s32.totalorder %v9157_v45, %v6601_v15 }
 0x17a   : > { %1543 = vmatmul.f32.vlgmr.msrb.gmra.mxu3 %v9165_v36  ;;  %5003 = vmatpush.msk.msrb.mxu0 %vm1182_vm14, %v8956_v50  ;;  %vm1165_vm14 = vcmp.eq.s32.totalorder %v9159_v32, %v6601_v15 }
 0x17b   : > { %1572 = vmatmul.f32.gmra.mxu0 %v6654_v27  ;;  %4949 = vmatmul.msk.f32.vlgmr.msrb.gmra.mxu2 %vm1406_vm6, %v9166_v1 }
 0x17c   : > { %5009 = vmatpush.msk.msrb.mxu3 %vm1113_vm10, %v8956_v50  ;;  %5041 = vmatpush.msk.msrb.mxu2 %vm1177_vm3, %v8956_v50  ;;  %vm1180_vm3 = vcmp.eq.s32.totalorder %v9149_v42, %v6642_v40  ;;  %vm1171_vm10 = vcmp.eq.s32.totalorder %v9155_v30, %v6601_v15  ;;  %v693_v30 = vld [vmem:[%s8841_s2] sm:$0xff] }
 0x17d   : > { %1601 = vmatmul.f32.gmra.mxu1 %v6992_v9  ;;  %5004 = vmatpush.msk.msrb.mxu0 %vm1180_vm3, %v8956_v50  ;;  %vm1163_vm3 = vcmp.eq.s32.totalorder %v9160_v49, %v6601_v15 }
 0x17e   : > { %5010 = vmatpush.msk.msrb.mxu3 %vm1111_vm0, %v8956_v50  ;;  %5042 = vmatpush.msk.msrb.mxu2 %vm1175_vm8, %v8956_v50  ;;  %vm1178_vm8 = vcmp.eq.s32.totalorder %v9170_v37, %v6642_v40  ;;  %vm1103_vm0 = vcmp.eq.s32.totalorder %v6080_v58, %v6601_v15  ;;  %v1864_v40 = vpop.permute.xlu1 %1863 }
 0x17f   : > { %5005 = vmatpush.msk.msrb.mxu0 %vm1178_vm8, %v8956_v50  ;;  %vm1159_vm8 = vcmp.eq.s32.totalorder %v6295_v25, %v6601_v15  ;;  %1853 = vperm.xlu0 %5429, %v693_v30   ;;  %v694_v25 = vld [vmem:[%s8841_s2 + $0x8] sm:$0xff] }
 0x180   : > { %5011 = vmatpush.msk.msrb.mxu3 %vm1109_vm7, %v8956_v50  ;;  %5043 = vmatpush.msk.msrb.mxu2 %vm1173_vm11, %v8956_v50  ;;  %vm1105_vm11 = vcmp.eq.s32.totalorder %v9156_v19, %v6601_v15  ;;  %vm1167_vm7 = vcmp.eq.s32.totalorder %v9158_v53, %v6601_v15 }
 0x181   : > { %1858 = vperm.xlu2 %5428, %v694_v25  }
 0x182   : > { %1546 = vmatmul.f32.gmra.mxu3 %v9169_v60  ;;  %5044 = vmatpush.msk.msrb.mxu2 %vm1171_vm10, %v8956_v50  ;;  %vm1161_vm10 = vcmp.eq.s32.totalorder %v6265_v22, %v6601_v15 }
 0x183   : > { %1575 = vmatmul.f32.gmra.mxu0 %v6865_v62  ;;  %4950 = vmatmul.msk.f32.gmra.mxu2 %vm1406_vm6, %v6763_v26 }
 0x184   : > { %5012 = vmatpush.msk.msrb.mxu3 %vm1107_vm9, %v8956_v50  ;;  %5045 = vmatpush.msk.msrb.mxu2 %vm1169_vm2, %v8956_v50  ;;  %vm1101_vm9 = vcmp.eq.s32.totalorder %v6117_v61, %v6601_v15  ;;  %vm1099_vm2 = vcmp.eq.s32.totalorder %v6131_v0, %v6601_v15 }
 0x185   : > { %1783 = vmatmul.f32.vlgmr.msra.gmra.mxu1 %v6515_v63 }
 0x186   : > { %5013 = vmatpush.msk.msrb.mxu3 %vm1105_vm11, %v8956_v50  ;;  %5046 = vmatpush.msk.msrb.mxu2 %vm1167_vm7, %v8956_v50  ;;  %vm1189_vm11 = vcmp.eq.s32.totalorder %v9162_v31, %v6601_v15  ;;  %vm1097_vm7 = vcmp.eq.s32.totalorder %v6140_v3, %v6601_v15 }
 0x187   : > { %v4837_v22 = vsel %vm1189_vm11, 1.0, %v9163_v5  ;;  %vm1185_vm11 = vcmp.eq.s32.totalorder %v9167_v57, %v6601_v15 }
 0x188   : > { %5014 = vmatpush.msk.msrb.mxu3 %vm1103_vm0, %v8956_v50  ;;  %5047 = vmatpush.msk.msrb.mxu2 %vm1165_vm14, %v8956_v50  ;;  %vm1157_vm0 = vcmp.eq.s32.totalorder %v6320_v29, %v6601_v15  ;;  %vm1155_vm14 = vcmp.eq.s32.totalorder %v6356_v35, %v6601_v15 }
 0x18a   : > { %1549 = vmatmul.f32.gmra.mxu3 %v6921_v8  ;;  %5048 = vmatpush.msk.msrb.mxu2 %vm1163_vm3, %v8956_v50  ;;  %vm1095_vm3 = vcmp.eq.s32.totalorder %v6176_v6, %v6601_v15 }
 0x18b   : > { %4951 = vmatmul.msk.f32.gmra.mxu2 %vm1406_vm6, %v6985_v54  ;;  %1705 = vmatmul.f32.vlgmr.msra.gmra.mxu0 %v6575_v2 }
 0x18c   : > { %5015 = vmatpush.msk.msrb.mxu3 %vm1101_vm9, %v8956_v50  ;;  %5049 = vmatpush.msk.msrb.mxu2 %vm1161_vm10, %v8956_v50  ;;  %vm1153_vm9 = vcmp.eq.s32.totalorder %v6371_v38, %v6601_v15  ;;  %vm1187_vm10 = vcmp.eq.s32.totalorder %v9164_v52, %v6601_v15 }
 0x18d   : > { %1786 = vmatmul.f32.gmra.mxu1 %v6654_v27  ;;  %5057 = vmatpush.msk.msra.mxu0 %vm1416_vm1, %v4837_v22 }
 0x18e   : > { %5016 = vmatpush.msk.msrb.mxu3 %vm1099_vm2, %v8956_v50  ;;  %5050 = vmatpush.msk.msrb.mxu2 %vm1159_vm8, %v8956_v50  ;;  %vm1093_vm2 = vcmp.eq.s32.totalorder %v6213_v12, %v6601_v15  ;;  %vm1151_vm8 = vcmp.eq.s32.totalorder %v6395_v47, %v6601_v15 }
 0x18f   : > { %5058 = vmatpush.msk.msra.mxu0 %vm1187_vm10, %v8956_v50 }
 0x190   : > { %5017 = vmatpush.msk.msrb.mxu3 %vm1097_vm7, %v8956_v50  ;;  %5051 = vmatpush.msk.msrb.mxu2 %vm1157_vm0, %v8956_v50  ;;  %vm1091_vm7 = vcmp.eq.s32.totalorder %v6239_v17, %v6601_v15  ;;  %vm1149_vm0 = vcmp.eq.s32.totalorder %v6407_v33, %v6601_v15 }
 0x191   : > { %5059 = vmatpush.msk.msra.mxu0 %vm1185_vm11, %v8956_v50 }
 0x192   : > { %1653 = vmatmul.f32.vlgmr.msra.gmra.mxu3 %v9165_v36  ;;  %5052 = vmatpush.msk.msrb.mxu2 %vm1155_vm14, %v8956_v50  ;;  %vm1183_vm14 = vcmp.eq.s32.totalorder %v9168_v14, %v6601_v15 }
 0x193   : > { %1679 = vmatmul.f32.vlgmr.msra.gmra.mxu2 %v6515_v63  ;;  %1708 = vmatmul.f32.gmra.mxu0 %v6772_v56 }
 0x194   : > { %5018 = vmatpush.msk.msrb.mxu3 %vm1095_vm3, %v8956_v50  ;;  %5053 = vmatpush.msk.msrb.mxu2 %vm1153_vm9, %v8956_v50  ;;  %vm1147_vm3 = vcmp.eq.s32.totalorder %v6421_v34, %v6601_v15  ;;  %vm1089_vm9 = vcmp.eq.s32.totalorder %v6253_v20, %v6601_v15 }
 0x195   : > { %1789 = vmatmul.f32.gmra.mxu1 %v6865_v62  ;;  %5060 = vmatpush.msk.msra.mxu0 %vm1183_vm14, %v8956_v50 }
 0x196   : > { %5019 = vmatpush.msk.msrb.mxu3 %vm1093_vm2, %v8956_v50  ;;  %5054 = vmatpush.msk.msrb.mxu2 %vm1151_vm8, %v8956_v50  ;;  %vm1181_vm2 = vcmp.eq.s32.totalorder %v9149_v42, %v6601_v15  ;;  %vm1087_vm8 = vcmp.eq.s32.totalorder %v6268_v23, %v6601_v15 }
 0x197   : > { %5061 = vmatpush.msk.msra.mxu0 %vm1181_vm2, %v8956_v50 }
 0x198   : > { %5020 = vmatpush.msk.msrb.mxu3 %vm1091_vm7, %v8956_v50  ;;  %5055 = vmatpush.msk.msrb.mxu2 %vm1149_vm0, %v8956_v50  ;;  %vm1179_vm7 = vcmp.eq.s32.totalorder %v9170_v37, %v6601_v15  ;;  %vm1085_vm0 = vcmp.eq.s32.totalorder %v9146_v55, %v6601_v15 }
 0x199   : > { %5062 = vmatpush.msk.msra.mxu0 %vm1179_vm7, %v8956_v50 }
 0x19a   : > { %1656 = vmatmul.f32.gmra.mxu3 %v9169_v60  ;;  %5056 = vmatpush.msk.msrb.mxu2 %vm1147_vm3, %v8956_v50  ;;  %vm1083_vm3 = vcmp.eq.s32.totalorder %v9150_v11, %v6601_v15 }
 0x19b   : > { %1682 = vmatmul.f32.gmra.mxu2 %v6654_v27  ;;  %1711 = vmatmul.f32.gmra.mxu0 %v6992_v9 }
 0x19c   : > { %5021 = vmatpush.msk.msrb.mxu3 %vm1089_vm9, %v8956_v50  ;;  %5283 = vmatpush.msk.msra.mxu2 %vm1416_vm1, %v4837_v22 }
 0x19e   : > { %5022 = vmatpush.msk.msrb.mxu3 %vm1087_vm8, %v8956_v50  ;;  %5284 = vmatpush.msk.msra.mxu2 %vm1187_vm10, %v8956_v50 }
 0x1a0   : > { %5023 = vmatpush.msk.msrb.mxu3 %vm1085_vm0, %v8956_v50  ;;  %5285 = vmatpush.msk.msra.mxu2 %vm1185_vm11, %v8956_v50  ;;  %vm1914_vm0 = vcmask 146432  }
 0x1a2   : > { %1659 = vmatmul.f32.gmra.mxu3 %v6921_v8  ;;  %5286 = vmatpush.msk.msra.mxu2 %vm1183_vm14, %v8956_v50 }
 0x1a3   : > { %1685 = vmatmul.f32.gmra.mxu2 %v6865_v62  ;;  %5006 = vmatmul.msk.f32.vlgmr.msrb.gmra.mxu0 %vm1406_vm6, %v9166_v1 }
 0x1a4   : > { %5024 = vmatpush.msk.msrb.mxu3 %vm1083_vm3, %v8956_v50  ;;  %5287 = vmatpush.msk.msra.mxu2 %vm1181_vm2, %v8956_v50 }
 0x1a6   : > { %5288 = vmatpush.msk.msra.mxu2 %vm1179_vm7, %v8956_v50 }
 0x1aa   : > { %1757 = vmatmul.f32.vlgmr.msrb.gmra.mxu3 %v9165_v36 }
 0x1ab   : > { %5007 = vmatmul.msk.f32.gmra.mxu0 %vm1406_vm6, %v6763_v26  ;;  %1809 = vmatmul.f32.vlgmr.msrb.gmra.mxu2 %v6575_v2 }
 0x1b2   : > { %1760 = vmatmul.f32.gmra.mxu3 %v9169_v60 }
 0x1b3   : > { %5008 = vmatmul.msk.f32.gmra.mxu0 %vm1406_vm6, %v6985_v54  ;;  %1812 = vmatmul.f32.gmra.mxu2 %v6772_v56 }
 0x1b7   : > { %v1466_v27 = vpop.f32.mrf.mxu1 }
 0x1b8   : > { %v1440_v29 = vpop.f32.mrf.mxu0 }
 0x1b9   : > { %v1467_v17 = vadd.f32 %v1466_v27, %v1440_v29 }
 0x1ba   : > { %1763 = vmatmul.f32.gmra.mxu3 %v6921_v8 }
 0x1bb   : > { %1815 = vmatmul.f32.gmra.mxu2 %v6992_v9  ;;  %5063 = vmatmul.msk.f32.vlgmr.msra.gmra.mxu0 %vm1406_vm6, %v9166_v1 }
 0x1c3   : > { %5064 = vmatmul.msk.f32.gmra.mxu0 %vm1406_vm6, %v6763_v26  ;;  %5065 = vmatmul.msk.f32.vlgmr.msra.gmra.mxu2 %vm1406_vm6, %v6985_v54  ;;  %vm1930_vm6 = vcmask 1041408  }
 0x1c5   : > { %v1518_v35 = vpop.f32.mrf.mxu3 }
 0x1c6   : > { %v1492_v38 = vpop.f32.mrf.mxu2 }
 0x1c7   : > { %v1493_v3 = vadd.f32 %v1492_v38, %v1467_v17 }
 0x1c9   : > { %v1519_v44 = vadd.f32 %v1518_v35, %v1493_v3 }
 0x1ca   : > { %v1469_v53 = vpop.f32.mrf.mxu1 }
 0x1d0   : > { %v1443_v34 = vpop.f32.mrf.mxu0 }
 0x1db   : > { %v1859_v35 = vpop.permute.xlu2 %1858 }
 0x1dd   : > { %v7215_v33 = vpop.f32.mrf.mxu3 }
 0x1de   : > { %v1495_v63 = vpop.f32.mrf.mxu2 }
 0x1e2   : > { %v1472_v49 = vpop.f32.mrf.mxu1 }
 0x1e8   : > { %v1446_v47 = vpop.f32.mrf.mxu0 }
 0x1e9   : > { %v1473_v25 = vadd.f32 %v1472_v49, %v1446_v47 }
 0x1ea   : > { %v1596_v41 = vpop.f32.mrf.mxu1 }
 0x1f0   : > { %v1570_v2 = vpop.f32.mrf.mxu0 }
 0x1f2   : > { %v1599_v52 = vpop.f32.mrf.mxu1 }
 0x1f5   : > { %v1524_v15 = vpop.f32.mrf.mxu3 }
 0x1f6   : > { %v1498_v42 = vpop.f32.mrf.mxu2 }
 0x1f7   : > { %v1499_v55 = vadd.f32 %v1498_v42, %v1473_v25 }
 0x1f8   : > { %v1573_v45 = vpop.f32.mrf.mxu0 }
 0x1f9   : > { %v1525_v61 = vadd.f32 %v1524_v15, %v1499_v55 }
 0x1fa   : > { %v7223_v60 = vpop.f32.mrf.mxu1 }
 0x1fd   : > { %v1544_v56 = vpop.f32.mrf.mxu3 }
 0x1fe   : > { %v1622_v32 = vpop.f32.mrf.mxu2  ;;  %v1571_v58 = vadd.f32 %v1570_v2, %v1544_v56 }
 0x200   : > { %v7217_v26 = vpop.f32.mrf.mxu0  ;;  %v1597_v47 = vadd.f32 %v1596_v41, %v1571_v58 }
 0x202   : > { %v1784_v11 = vpop.f32.mrf.mxu1 }
 0x205   : > { %v1547_v62 = vpop.f32.mrf.mxu3 }
 0x206   : > { %v7219_v8 = vpop.f32.mrf.mxu2  ;;  %v1574_v38 = vadd.f32 %v1573_v45, %v1547_v62 }
 0x208   : > { %v1706_v7 = vpop.f32.mrf.mxu0 }
 0x20d   : > { %v1550_v28 = vpop.f32.mrf.mxu3 }
 0x20e   : > { %v7221_v54 = vpop.f32.mrf.mxu2 }
 0x210   : > { %v1709_v9 = vpop.f32.mrf.mxu0 }
 0x215   : > { %v1654_v31 = vpop.f32.mrf.mxu3 }
 0x216   : > { %v1680_v16 = vpop.f32.mrf.mxu2 }
 0x217   : > { %v1681_v23 = vadd.f32 %v1680_v16, %v1654_v31  ;;  %v1470_v31 = vadd.f32 %v1469_v53, %v1443_v34  ;;  %v1787_v16 = vpop.f32.mrf.mxu1 }
 0x218   : > { %v1712_v36 = vpop.f32.mrf.mxu0 }
 0x219   : > { %v1707_v19 = vadd.f32 %v1706_v7, %v1681_v23  ;;  %v1496_v55 = vadd.f32 %v1495_v63, %v1470_v31  ;;  %v1854_v23 = vpop.permute.xlu0 %1853  ;;  %v9173_v31 = vld [vmem:[#allocation29_spill] sm:$0xff] }
 0x21d   : > { %v1657_v1 = vpop.f32.mrf.mxu3 }
 0x21e   : > { %v1683_v57 = vpop.f32.mrf.mxu2 }
 0x21f   : > { %v1684_v49 = vadd.f32 %v1683_v57, %v1657_v1  ;;  %v1790_v53 = vpop.f32.mrf.mxu1 }
 0x220   : > { %v1732_v14 = vpop.f32.mrf.mxu0 }
 0x221   : > { %v1733_v51 = vadd.f32 %v1732_v14, %v1707_v19 }
 0x223   : > { %v1845_v27 = vmax.f32 %v1519_v44, %v1733_v51  ;;  %v1522_v51 = vadd.f32 %v7215_v33, %v1496_v55  ;;  %v2201_v55 = vld [vmem:[%s8843_s4 + $0x8] sm:$0xff] }
 0x225   : > { %v1660_v37 = vpop.f32.mrf.mxu3 }
 0x226   : > { %v1686_v22 = vpop.f32.mrf.mxu2 }
 0x227   : > { %v1687_v50 = vadd.f32 %v1686_v22, %v1660_v37  ;;  %v2202_v22 = vld [vmem:[%s8843_s4 + $0x10] sm:$0xff] }
 0x228   : > { %v1735_v30 = vpop.f32.mrf.mxu0 }
 0x229   : > { %v1713_v6 = vadd.f32 %v1712_v36, %v1687_v50 }
 0x22d   : > { %v1758_v20 = vpop.f32.mrf.mxu3 }
 0x22e   : > { %v1810_v12 = vpop.f32.mrf.mxu2  ;;  %v1785_v46 = vadd.f32 %v1784_v11, %v1758_v20  ;;  %v1710_v20 = vadd.f32 %v1709_v9, %v1684_v49  ;;  %v1577_v11 = vadd.f32 %v7217_v26, %v1550_v28  ;;  %v9171_v49 = vld [vmem:[#allocation22_spill] sm:$0xff] }
 0x22f   : > { %vm9176_vm10 = vcmp.eq.s32.totalorder %v6153_v4, %v9171_v49  ;;  %vm9178_vm11 = vcmp.eq.s32.totalorder %v6216_v13, %v9171_v49  ;;  %vm9179_vm14 = vcmp.eq.s32.totalorder %v6247_v18, %v9171_v49  ;;  %vm9180_vm9 = vcmp.eq.s32.totalorder %v6256_v21, %v9171_v49 }
 0x230   : > { %v1738_v0 = vpop.f32.mrf.mxu0  ;;  %v1811_v50 = vadd.f32 %v1810_v12, %v1785_v46  ;;  %v1736_v58 = vadd.f32 %v1735_v30, %v1710_v20  ;;  %v1600_v46 = vadd.f32 %v1599_v52, %v1574_v38  ;;  %v1603_v26 = vadd.f32 %v7223_v60, %v1577_v11  ;;  %v1878_v38 = vld [vmem:[%s8842_s3] sm:$0xff] }
 0x231   : > { %v1739_v48 = vadd.f32 %v1738_v0, %v1713_v6  ;;  %v1623_v6 = vadd.f32 %v1622_v32, %v1597_v47  ;;  %vm9181_vm2 = vcmp.eq.s32.totalorder %v6271_v24, %v9171_v49  ;;  %vm9182_vm8 = vcmp.eq.s32.totalorder %v9147_v39, %v9171_v49 }
 0x232   : > { %v1847_v63 = vmax.f32 %v1522_v51, %v1736_v58  ;;  %v1626_v45 = vadd.f32 %v7219_v8, %v1600_v46  ;;  %v1629_v8 = vadd.f32 %v7221_v54, %v1603_v26  ;;  %v2203_v54 = vld [vmem:[%s8843_s4 + $0x18] sm:$0xff]  ;;  %v7343_v46 = vld [vmem:[%s8842_s3 + $0x20] sm:$0xf]  ;;  %v9185_v26 = vld [vmem:[#allocation46_spill] sm:$0xff] }
 0x233   : > { %v1849_v43 = vmax.f32 %v1525_v61, %v1739_v48  ;;  %vm9191_vm3 = vcmp.eq.s32.totalorder %v9173_v31, %v9185_v26 }
 0x234   : > { %v1868_v28 = vadd.f32 %v1859_v35, %v1847_v63  ;;  %v5066_v63 = vld [vmem:[%s8842_s3 + $0x28] sm:$0xff] }
 0x235   : > { %v1761_v37 = vpop.f32.mrf.mxu3  ;;  %v1870_v42 = vadd.f32 %v1864_v40, %v1849_v43  ;;  %v1866_v43 = vadd.f32 %v1854_v23, %v1845_v27  ;;  %v2204_v27 = vld [vmem:[%s8843_s4 + $0x20] sm:$0xf] }
 0x236   : > { %v1813_v29 = vpop.f32.mrf.mxu2  ;;  %v1788_v3 = vadd.f32 %v1787_v16, %v1761_v37  ;;  %v7242_v1 = vmax.f32 %v1868_v28, 0.0  ;;  %v4674_v37 = vsel %vm808_vm12, 1.0, %v9163_v5  ;;  %v2200_v16 = vld [vmem:[%s8843_s4] sm:$0xff]  ;;  %v4782_v28 = vsel %vm1134_vm5, 1.0, %v9163_v5  ;;  %v9192_v5 = vld [vmem:[#allocation24_spill] sm:$0xff] }
 0x237   : > { %v7225_v17 = vmax.f32 %v1870_v42, 0.0  ;;  %v7233_v34 = vmax.f32 %v1866_v43, 0.0  ;;  %v9172_v42 = vmov 1.0  }
 0x238   : > { %v1836_v0 = vpop.f32.mrf.mxu0  ;;  %v1814_v2 = vadd.f32 %v1813_v29, %v1788_v3  ;;  %v9174_v29 = vld [vmem:[#allocation32_spill] sm:$0xff] }
 0x239   : > { %v1837_v61 = vadd.f32 %v1836_v0, %v1811_v50  ;;  %2096 = vrot.lane.b32.xlu0 %v7225_v17, %s5712_s21  ;;  %1903 = vrot.lane.b32.xlu2 %v7225_v17, %s5711_s12  ;;  %vm9175_vm12 = vcmp.eq.s32.totalorder %v9174_v29, %v9171_v49  ;;  %v9183_v50 = vld [vmem:[#allocation48_spill] sm:$0xff] }
 0x23a   : > { %vm9184_vm7 = vcmp.eq.s32.totalorder %v9183_v50, %v9171_v49  ;;  %v7325_v0 = vld [vmem:[%s8842_s3 + $0x10] sm:$0xff] }
 0x23b   : > { %v1846_v44 = vmax.f32 %v1623_v6, %v1837_v61  ;;  %v7332_v61 = vld [vmem:[%s8842_s3 + $0x18] sm:$0xff] }
 0x23d   : > { %v1867_v12 = vadd.f32 %v1854_v23, %v1846_v44  ;;  %v1764_v48 = vpop.f32.mrf.mxu3  ;;  %v7318_v23 = vld [vmem:[%s8842_s3 + $0x8] sm:$0xff] }
 0x23e   : > { %v1816_v19 = vpop.f32.mrf.mxu2  ;;  %v1791_v32 = vadd.f32 %v1790_v53, %v1764_v48 }
 0x23f   : > { %v1873_v15 = vmax.f32 %v1867_v12, 0.0 }
 0x240   : > { %v1839_v56 = vpop.f32.mrf.mxu0  ;;  %v1817_v9 = vadd.f32 %v1816_v19, %v1791_v32 }
 0x241   : > { %v1840_v62 = vadd.f32 %v1839_v56, %v1814_v2  ;;  %v5445_v7 = vpack.i.bf16 %v1873_v15, %v7233_v34  ;;  %v5435_v33 = vpack.i.bf16 %v7233_v34, %v1873_v15 }
 0x243   : > { %v1848_v41 = vmax.f32 %v1626_v45, %v1840_v62  ;;  %5446 = vrot.lane.b32.xlu0 %v5445_v7, %s5712_s21  ;;  %5436 = vrot.lane.b32.xlu2 %v5435_v33, %s5711_s12 }
 0x245   : > { %v1869_v52 = vadd.f32 %v1859_v35, %v1848_v41 }
 0x246   : > { %v1842_v36 = vpop.f32.mrf.mxu2 }
 0x247   : > { %v1875_v57 = vmax.f32 %v1869_v52, 0.0  ;;  %v1843_v14 = vadd.f32 %v1842_v36, %v1817_v9  ;;  %v5068_v9 = vld [vmem:[%s8842_s3 + $0x38] sm:$0xff]  ;;  %v5069_v36 = vld [vmem:[%s8842_s3 + $0x40] sm:$0xff] }
 0x248   : > { %v9186_v52 = vld [vmem:[#allocation21_spill] sm:$0xff] }
 0x249   : > { %v1850_v60 = vmax.f32 %v1629_v8, %v1843_v14  ;;  %v5440_v30 = vpack.i.bf16 %v1875_v57, %v7242_v1  ;;  %vm9190_vm5 = vcmp.eq.s32.totalorder %v9186_v52, %v9185_v26  ;;  %v9200_v8 = vld [vmem:[#allocation26_spill] sm:$0xff]  ;;  %v9216_v14 = vld [vmem:[#allocation36_spill] sm:$0xff] }
 0x24b   : > { %2372 = vperm.xlu0 %5429, %v2202_v22   ;;  %5441 = vrot.lane.b32.xlu2 %v5440_v30, %s5712_s21  ;;  %v1871_v25 = vadd.f32 %v1864_v40, %v1850_v60  ;;  %v5430_v40 = vpack.i.bf16 %v7242_v1, %v1875_v57  ;;  %v9224_v22 = vld [vmem:[#allocation40_spill] sm:$0xff]  ;;  %v9230_v60 = vld [vmem:[#allocation43_spill] sm:$0xff] }
 0x24c   : > { %v9237_v30 = vld [vmem:[#allocation20_spill] sm:$0xff] }
 0x24d   : > { %v1877_v47 = vmax.f32 %v1871_v25, 0.0  ;;  %v5096_v25 = vld [vmem:[%s8842_s3 + $0x58] sm:$0xff] }
 0x24f   : > { %1905 = vrot.lane.b32.xlu1 %v1877_v47, %s5711_s12  ;;  %5089 = vmatpush.msk.msrb.mxu2 %vm1930_vm6, %v1877_v47 }
 0x251   : > { %2064 = vmatpush.msrb.mxu2 %v1875_v57  ;;  %v9210_v57 = vld [vmem:[#allocation31_spill] sm:$0xff] }
 0x253   : > { %2065 = vmatpush.msrb.mxu2 %v1873_v15  ;;  %2377 = vperm.xlu2 %5428, %v2203_v54   ;;  %v5067_v15 = vld [vmem:[%s8842_s3 + $0x30] sm:$0xff]  ;;  %v5098_v54 = vld [vmem:[%s8842_s3 + $0x68] sm:$0xff] }
 0x254   : > { %5090 = vmatmul.msk.f32.vlgmr.msrb.gmra.mxu2 %vm1914_vm0, %v1878_v38 }
 0x255   : > { %5128 = vmatpush.msk.msra.mxu2 %vm1416_vm1, %v4674_v37  ;;  %v5099_v37 = vld [vmem:[%s8842_s3 + $0x70] sm:$0xf] }
 0x257   : > { %5129 = vmatpush.msk.msra.mxu2 %vm806_vm15, %v9172_v42  ;;  %5431 = vrot.lane.b32.xlu1 %v5430_v40, %s5711_s12  ;;  %vm9177_vm15 = vcmp.eq.s32.totalorder %v6179_v10, %v9171_v49 }
 0x259   : > { %5130 = vmatpush.msk.msra.mxu2 %vm9175_vm12, %v9172_v42  ;;  %vm9194_vm12 = vcmp.eq.s32.totalorder %v9188_v59, %v9185_v26 }
 0x25b   : > { %5131 = vmatpush.msk.msra.mxu2 %vm9176_vm10, %v9172_v42  ;;  %2362 = vperm.xlu2 %5428, %v2200_v16   ;;  %vm9195_vm10 = vcmp.eq.s32.totalorder %v9174_v29, %v9185_v26 }
 0x25c   : > { %5091 = vmatmul.msk.f32.gmra.mxu2 %vm1914_vm0, %v7318_v23 }
 0x25d   : > { %5132 = vmatpush.msk.msra.mxu2 %vm9177_vm15, %v9172_v42 }
 0x25f   : > { %5133 = vmatpush.msk.msra.mxu2 %vm9178_vm11, %v9172_v42  ;;  %2098 = vrot.lane.b32.xlu1 %v1877_v47, %s5712_s21  ;;  %vm9198_vm11 = vcmp.eq.s32.totalorder %v9192_v5, %v9185_v26  ;;  %v5097_v47 = vld [vmem:[%s8842_s3 + $0x60] sm:$0xff] }
 0x261   : > { %5134 = vmatpush.msk.msra.mxu2 %vm9179_vm14, %v9172_v42  ;;  %vm9199_vm14 = vcmp.eq.s32.totalorder %v6153_v4, %v9185_v26  ;;  %v9206_v4 = vld [vmem:[#allocation28_spill] sm:$0xff] }
 0x263   : > { %5135 = vmatpush.msk.msra.mxu2 %vm9180_vm9, %v9172_v42  ;;  %vm9201_vm9 = vcmp.eq.s32.totalorder %v9200_v8, %v9171_v49 }
 0x264   : > { %5092 = vmatmul.msk.f32.gmra.mxu2 %vm1914_vm0, %v7325_v0 }
 0x265   : > { %5136 = vmatpush.msk.msra.mxu2 %vm9181_vm2, %v9172_v42 }
 0x267   : > { %5137 = vmatpush.msk.msra.mxu2 %vm9182_vm8, %v9172_v42  ;;  %2382 = vperm.xlu1 %5427, %v2204_v27  }
 0x269   : > { %5138 = vmatpush.msk.msra.mxu2 %vm9184_vm7, %v9172_v42  ;;  %vm9205_vm7 = vcmp.eq.s32.totalorder %v6179_v10, %v9185_v26  ;;  %v5070_v10 = vld [vmem:[%s8842_s3 + $0x48] sm:$0xf] }
 0x26c   : > { %5093 = vmatmul.msk.f32.gmra.mxu2 %vm1914_vm0, %v7332_v61 }
 0x26f   : > { %2367 = vperm.xlu1 %5427, %v2201_v55  }
 0x274   : > { %5094 = vmatmul.msk.f32.gmra.mxu2 %vm1914_vm0, %v7343_v46 }
 0x293   : > { %v1904_v6 = vpop.permute.xlu2 %1903 }
 0x29d   : > { %v5437_v58 = vpop.permute.xlu2 %5436 }
 0x29e   : > { %v5439_v51 = vunpack.i.h.bf16 %v5437_v58  ;;  %v5438_v12 = vunpack.i.l.bf16 %v5437_v58 }
 0x2a0   : > { %v1907_v2 = vsel %vm565_vm13, %v5439_v51, %v5438_v12 }
 0x2a5   : > { %v5442_v35 = vpop.permute.xlu2 %5441 }
 0x2a6   : > { %v5444_v53 = vunpack.i.h.bf16 %v5442_v35  ;;  %v5443_v56 = vunpack.i.l.bf16 %v5442_v35 }
 0x2a8   : > { %v2101_v41 = vsel %vm659_vm4, %v5443_v56, %v5444_v53 }
 0x2ab   : > { %v2097_v3 = vpop.permute.xlu0 %2096 }
 0x2b5   : > { %v5447_v45 = vpop.permute.xlu0 %5446 }
 0x2b6   : > { %v5449_v62 = vunpack.i.h.bf16 %v5447_v45  ;;  %v5448_v7 = vunpack.i.l.bf16 %v5447_v45 }
 0x2c1   : > { %v1906_v20 = vpop.permute.xlu1 %1905 }
 0x2c2   : > { %v1909_v43 = vsel %vm565_vm13, %v1904_v6, %v1906_v20  ;;  %5077 = vmatpush.msk.msrb.mxu0 %vm1930_vm6, %v1906_v20 }
 0x2c3   : > { %5071 = vmatpush.msk.msrb.mxu1 %vm1930_vm6, %v1909_v43  ;;  %5289 = vmatpush.msk.msra.mxu3 %vm1930_vm6, %v1909_v43 }
 0x2c9   : > { %v5432_v44 = vpop.permute.xlu1 %5431 }
 0x2ca   : > { %v5434_v11 = vunpack.i.h.bf16 %v5432_v44  ;;  %v5433_v48 = vunpack.i.l.bf16 %v5432_v44 }
 0x2cc   : > { %1981 = vmatpush.msrb.mxu0 %v5433_v48  ;;  %v1908_v19 = vsel %vm565_vm13, %v5434_v11, %v5433_v48  ;;  %vm9187_vm13 = vcmp.eq.s32.totalorder %v9186_v52, %v9171_v49 }
 0x2cd   : > { %1949 = vmatpush.msrb.mxu1 %v1908_v19  ;;  %5290 = vmatpush.msra.mxu3 %v1908_v19 }
 0x2ce   : > { %1982 = vmatpush.msrb.mxu0 %v5438_v12 }
 0x2cf   : > { %1950 = vmatpush.msrb.mxu1 %v1907_v2  ;;  %5291 = vmatpush.msra.mxu3 %v1907_v2 }
 0x2d0   : > { %5078 = vmatmul.msk.f32.vlgmr.msrb.gmra.mxu0 %vm1914_vm0, %v5066_v63  ;;  %5072 = vmatmul.msk.f32.vlgmr.msrb.gmra.mxu1 %vm1914_vm0, %v5066_v63 }
 0x2d1   : > { %5073 = vmatmul.msk.f32.vlgmr.msra.gmra.mxu3 %vm1914_vm0, %v5067_v15  ;;  %5083 = vmatpush.msk.msra.mxu1 %vm1930_vm6, %v7225_v17  ;;  %v2099_v32 = vpop.permute.xlu1 %2098  ;;  %v2100_v17 = vsel %vm659_vm4, %v5448_v7, %v5449_v62 }
 0x2d2   : > { %v2102_v33 = vsel %vm659_vm4, %v2097_v3, %v2099_v32  ;;  %5106 = vmatpush.msk.msra.mxu0 %vm1930_vm6, %v2099_v32  ;;  %vm9189_vm4 = vcmp.eq.s32.totalorder %v9188_v59, %v9171_v49 }
 0x2d3   : > { %2032 = vmatpush.msra.mxu1 %v7242_v1  ;;  %5100 = vmatpush.msk.msrb.mxu3 %vm1930_vm6, %v2102_v33  ;;  %vm9193_vm6 = vcmp.eq.s32.totalorder %v9192_v5, %v9171_v49  ;;  %v9202_v1 = vld [vmem:[#allocation27_spill] sm:$0xff] }
 0x2d4   : > { %2172 = vmatpush.msra.mxu0 %v5444_v53  ;;  %vm9203_vm2 = vcmp.eq.s32.totalorder %v9202_v1, %v9171_v49 }
 0x2d5   : > { %2033 = vmatpush.msra.mxu1 %v7233_v34  ;;  %2140 = vmatpush.msrb.mxu3 %v2101_v41  ;;  %v9196_v34 = vld [vmem:[#allocation25_spill] sm:$0xff] }
 0x2d6   : > { %2173 = vmatpush.msra.mxu0 %v5449_v62  ;;  %vm9197_vm15 = vcmp.eq.s32.totalorder %v9196_v34, %v9171_v49  ;;  %vm9204_vm8 = vcmp.eq.s32.totalorder %v9196_v34, %v9185_v26 }
 0x2d7   : > { %5112 = vmatpush.msk.msrb.mxu1 %vm9187_vm13, %v9172_v42  ;;  %2141 = vmatpush.msrb.mxu3 %v2100_v17  ;;  %vm9207_vm13 = vcmp.eq.s32.totalorder %v9206_v4, %v9171_v49 }
 0x2d8   : > { %5160 = vmatpush.msk.msrb.mxu0 %vm1416_vm1, %v4782_v28  ;;  %5084 = vmatmul.msk.f32.vlgmr.msra.gmra.mxu1 %vm1914_vm0, %v1878_v38 }
 0x2d9   : > { %5079 = vmatmul.msk.f32.gmra.mxu0 %vm1914_vm0, %v5067_v15  ;;  %5074 = vmatmul.msk.f32.gmra.mxu3 %vm1914_vm0, %v5068_v9 }
 0x2da   : > { %5113 = vmatpush.msk.msrb.mxu1 %vm9189_vm4, %v9172_v42  ;;  %5144 = vmatpush.msk.msra.mxu3 %vm9190_vm5, %v9172_v42  ;;  %vm9208_vm4 = vcmp.eq.s32.totalorder %v9200_v8, %v9185_v26  ;;  %vm9209_vm5 = vcmp.eq.s32.totalorder %v6216_v13, %v9185_v26  ;;  %v9214_v13 = vld [vmem:[#allocation34_spill] sm:$0xff] }
 0x2db   : > { %5161 = vmatpush.msk.msrb.mxu0 %vm9191_vm3, %v9172_v42  ;;  %vm9211_vm3 = vcmp.eq.s32.totalorder %v9210_v57, %v9171_v49 }
 0x2dc   : > { %5114 = vmatpush.msk.msrb.mxu1 %vm9193_vm6, %v9172_v42  ;;  %5145 = vmatpush.msk.msra.mxu3 %vm9194_vm12, %v9172_v42  ;;  %vm9212_vm6 = vcmp.eq.s32.totalorder %v9202_v1, %v9185_v26  ;;  %vm9213_vm12 = vcmp.eq.s32.totalorder %v6247_v18, %v9185_v26  ;;  %v9220_v18 = vld [vmem:[#allocation38_spill] sm:$0xff] }
 0x2dd   : > { %5162 = vmatpush.msk.msrb.mxu0 %vm9195_vm10, %v9172_v42  ;;  %vm9215_vm10 = vcmp.eq.s32.totalorder %v9214_v13, %v9171_v49 }
 0x2de   : > { %5115 = vmatpush.msk.msrb.mxu1 %vm9197_vm15, %v9172_v42  ;;  %5146 = vmatpush.msk.msra.mxu3 %vm9198_vm11, %v9172_v42  ;;  %vm9217_vm15 = vcmp.eq.s32.totalorder %v9216_v14, %v9171_v49  ;;  %vm9218_vm11 = vcmp.eq.s32.totalorder %v9206_v4, %v9185_v26 }
 0x2df   : > { %5163 = vmatpush.msk.msrb.mxu0 %vm9199_vm14, %v9172_v42  ;;  %vm9219_vm14 = vcmp.eq.s32.totalorder %v6256_v21, %v9185_v26  ;;  %v5095_v21 = vld [vmem:[%s8842_s3 + $0x50] sm:$0xff] }
 0x2e0   : > { %5116 = vmatpush.msk.msrb.mxu1 %vm9201_vm9, %v9172_v42  ;;  %5147 = vmatpush.msk.msra.mxu3 %vm9204_vm8, %v9172_v42  ;;  %vm9221_vm9 = vcmp.eq.s32.totalorder %v9220_v18, %v9171_v49  ;;  %vm9223_vm8 = vcmp.eq.s32.totalorder %v6271_v24, %v9185_v26  ;;  %v9228_v24 = vld [vmem:[#allocation42_spill] sm:$0xff] }
 0x2e1   : > { %5080 = vmatmul.msk.f32.gmra.mxu0 %vm1914_vm0, %v5068_v9  ;;  %5085 = vmatmul.msk.f32.gmra.mxu1 %vm1914_vm0, %v7318_v23 }
 0x2e2   : > { %5075 = vmatmul.msk.f32.gmra.mxu3 %vm1914_vm0, %v5069_v36  ;;  %5117 = vmatpush.msk.msrb.mxu1 %vm9203_vm2, %v9172_v42  ;;  %vm9222_vm2 = vcmp.eq.s32.totalorder %v9210_v57, %v9185_v26 }
 0x2e3   : > { %5164 = vmatpush.msk.msrb.mxu0 %vm9205_vm7, %v9172_v42  ;;  %5148 = vmatpush.msk.msra.mxu3 %vm9208_vm4, %v9172_v42  ;;  %vm9225_vm7 = vcmp.eq.s32.totalorder %v9224_v22, %v9171_v49  ;;  %vm9227_vm4 = vcmp.eq.s32.totalorder %v9147_v39, %v9185_v26  ;;  %v9234_v39 = vld [vmem:[#allocation45_spill] sm:$0xff] }
 0x2e4   : > { %5118 = vmatpush.msk.msrb.mxu1 %vm9207_vm13, %v9172_v42  ;;  %vm9226_vm13 = vcmp.eq.s32.totalorder %v9214_v13, %v9185_v26 }
 0x2e5   : > { %5165 = vmatpush.msk.msrb.mxu0 %vm9209_vm5, %v9172_v42  ;;  %5149 = vmatpush.msk.msra.mxu3 %vm9212_vm6, %v9172_v42  ;;  %vm9229_vm5 = vcmp.eq.s32.totalorder %v9228_v24, %v9171_v49  ;;  %vm9232_vm6 = vcmp.eq.s32.totalorder %v9216_v14, %v9185_v26 }
 0x2e6   : > { %5119 = vmatpush.msk.msrb.mxu1 %vm9211_vm3, %v9172_v42  ;;  %vm9231_vm3 = vcmp.eq.s32.totalorder %v9230_v60, %v9171_v49 }
 0x2e7   : > { %5166 = vmatpush.msk.msrb.mxu0 %vm9213_vm12, %v9172_v42  ;;  %5150 = vmatpush.msk.msra.mxu3 %vm9218_vm11, %v9172_v42  ;;  %vm9233_vm12 = vcmp.eq.s32.totalorder %v9183_v50, %v9185_v26  ;;  %vm9238_vm11 = vcmp.eq.s32.totalorder %v9237_v30, %v9171_v49 }
 0x2e8   : > { %5120 = vmatpush.msk.msrb.mxu1 %vm9215_vm10, %v9172_v42  ;;  %vm9235_vm10 = vcmp.eq.s32.totalorder %v9234_v39, %v9171_v49 }
 0x2e9   : > { %5081 = vmatmul.msk.f32.gmra.mxu0 %vm1914_vm0, %v5069_v36  ;;  %5086 = vmatmul.msk.f32.gmra.mxu1 %vm1914_vm0, %v7325_v0  ;;  %v2067_v0 = vpop.f32.mrf.mxu2 }
 0x2ea   : > { %5076 = vmatmul.msk.f32.gmra.mxu3 %vm1914_vm0, %v5070_v10  ;;  %5121 = vmatpush.msk.msrb.mxu1 %vm9217_vm15, %v9172_v42  ;;  %vm9236_vm15 = vcmp.eq.s32.totalorder %v9220_v18, %v9185_v26 }
 0x2eb   : > { %5167 = vmatpush.msk.msrb.mxu0 %vm9219_vm14, %v9172_v42  ;;  %5151 = vmatpush.msk.msra.mxu3 %vm9222_vm2, %v9172_v42  ;;  %vm9239_vm14 = vcmp.eq.s32.totalorder %v9224_v22, %v9185_v26  ;;  %vm9241_vm2 = vcmp.eq.s32.totalorder %v9228_v24, %v9185_v26 }
 0x2ec   : > { %5122 = vmatpush.msk.msrb.mxu1 %vm9221_vm9, %v9172_v42  ;;  %vm9240_vm9 = vcmp.eq.s32.totalorder %v9196_v34, %v9171_v49 }
 0x2ed   : > { %5168 = vmatpush.msk.msrb.mxu0 %vm9223_vm8, %v9172_v42  ;;  %5152 = vmatpush.msk.msra.mxu3 %vm9226_vm13, %v9172_v42  ;;  %vm9242_vm8 = vcmp.eq.s32.totalorder %v9200_v8, %v9171_v49  ;;  %vm9244_vm13 = vcmp.eq.s32.totalorder %v9202_v1, %v9171_v49 }
 0x2ee   : > { %5123 = vmatpush.msk.msrb.mxu1 %vm9225_vm7, %v9172_v42  ;;  %vm9243_vm7 = vcmp.eq.s32.totalorder %v9230_v60, %v9185_v26 }
 0x2ef   : > { %5169 = vmatpush.msk.msrb.mxu0 %vm9227_vm4, %v9172_v42  ;;  %5153 = vmatpush.msk.msra.mxu3 %vm9232_vm6, %v9172_v42  ;;  %vm9245_vm4 = vcmp.eq.s32.totalorder %v9234_v39, %v9185_v26  ;;  %vm9248_vm6 = vcmp.eq.s32.totalorder %v9210_v57, %v9171_v49 }
 0x2f0   : > { %5124 = vmatpush.msk.msrb.mxu1 %vm9229_vm5, %v9172_v42  ;;  %vm9246_vm5 = vcmp.eq.s32.totalorder %v9206_v4, %v9171_v49 }
 0x2f1   : > { %5082 = vmatmul.msk.f32.gmra.mxu0 %vm1914_vm0, %v5070_v10  ;;  %5087 = vmatmul.msk.f32.gmra.mxu1 %vm1914_vm0, %v7332_v61  ;;  %v2070_v43 = vpop.f32.mrf.mxu2 }
 0x2f2   : > { %5101 = vmatmul.msk.f32.vlgmr.msrb.gmra.mxu3 %vm1914_vm0, %v5095_v21  ;;  %5125 = vmatpush.msk.msrb.mxu1 %vm9231_vm3, %v9172_v42  ;;  %vm9247_vm3 = vcmp.eq.s32.totalorder %v9237_v30, %v9185_v26 }
 0x2f3   : > { %5170 = vmatpush.msk.msrb.mxu0 %vm9233_vm12, %v9172_v42  ;;  %5154 = vmatpush.msk.msra.mxu3 %vm9236_vm15, %v9172_v42  ;;  %vm9249_vm12 = vcmp.eq.s32.totalorder %v9214_v13, %v9171_v49  ;;  %vm9251_vm15 = vcmp.eq.s32.totalorder %v9220_v18, %v9171_v49 }
 0x2f4   : > { %5126 = vmatpush.msk.msrb.mxu1 %vm9235_vm10, %v9172_v42  ;;  %vm9250_vm10 = vcmp.eq.s32.totalorder %v9216_v14, %v9171_v49 }
 0x2f5   : > { %5155 = vmatpush.msk.msra.mxu3 %vm9239_vm14, %v9172_v42  ;;  %vm9253_vm14 = vcmp.eq.s32.totalorder %v9228_v24, %v9171_v49 }
 0x2f6   : > { %5127 = vmatpush.msk.msrb.mxu1 %vm9238_vm11, %v9172_v42  ;;  %vm9252_vm11 = vcmp.eq.s32.totalorder %v9224_v22, %v9171_v49 }
 0x2f7   : > { %5156 = vmatpush.msk.msra.mxu3 %vm9241_vm2, %v9172_v42  ;;  %vm9255_vm2 = vcmp.eq.s32.totalorder %v9234_v39, %v9171_v49 }
 0x2f9   : > { %5107 = vmatmul.msk.f32.vlgmr.msra.gmra.mxu0 %vm1914_vm0, %v5095_v21  ;;  %5088 = vmatmul.msk.f32.gmra.mxu1 %vm1914_vm0, %v7343_v46  ;;  %v2073_v35 = vpop.f32.mrf.mxu2 }
 0x2fa   : > { %5102 = vmatmul.msk.f32.gmra.mxu3 %vm1914_vm0, %v5096_v25  ;;  %5224 = vmatpush.msk.msra.mxu0 %vm9240_vm9, %v9172_v42  ;;  %vm9254_vm9 = vcmp.eq.s32.totalorder %v9230_v60, %v9171_v49 }
 0x2fb   : > { %5157 = vmatpush.msk.msra.mxu3 %vm9243_vm7, %v9172_v42  ;;  %vm2433_vm7 = vcmask 293888  }
 0x2fc   : > { %5225 = vmatpush.msk.msra.mxu0 %vm9242_vm8, %v9172_v42  ;;  %vm9256_vm8 = vcmp.eq.s32.totalorder %v9237_v30, %v9171_v49 }
 0x2fd   : > { %5158 = vmatpush.msk.msra.mxu3 %vm9245_vm4, %v9172_v42  ;;  %vm9259_vm4 = vcmp.eq.s32.totalorder %v9202_v1, %v9185_v26  ;;  %v5208_v1 = vld [vmem:[%s8844_s5 + $0xa8] sm:$0xff] }
 0x2fe   : > { %5226 = vmatpush.msk.msra.mxu0 %vm9244_vm13, %v9172_v42  ;;  %vm9258_vm13 = vcmp.eq.s32.totalorder %v9200_v8, %v9185_v26  ;;  %v5178_v8 = vld [vmem:[%s8844_s5 + $0x58] sm:$0xff] }
 0x2ff   : > { %5159 = vmatpush.msk.msra.mxu3 %vm9247_vm3, %v9172_v42  ;;  %vm9261_vm3 = vcmp.eq.s32.totalorder %v9210_v57, %v9185_v26  ;;  %v5179_v57 = vld [vmem:[%s8844_s5 + $0x60] sm:$0xff] }
 0x300   : > { %5227 = vmatpush.msk.msra.mxu0 %vm9246_vm5, %v9172_v42  ;;  %vm9260_vm5 = vcmp.eq.s32.totalorder %v9206_v4, %v9185_v26  ;;  %v2402_v4 = vld [vmem:[%s8844_s5 + $0x38] sm:$0xff] }
 0x301   : > { %5108 = vmatmul.msk.f32.gmra.mxu0 %vm1914_vm0, %v5096_v25  ;;  %v2076_v28 = vpop.f32.mrf.mxu2 }
 0x302   : > { %5103 = vmatmul.msk.f32.gmra.mxu3 %vm1914_vm0, %v5097_v47  ;;  %5228 = vmatpush.msk.msra.mxu0 %vm9248_vm6, %v9172_v42  ;;  %vm9262_vm6 = vcmp.eq.s32.totalorder %v9214_v13, %v9185_v26  ;;  %v5209_v13 = vld [vmem:[%s8844_s5 + $0xb0] sm:$0xff] }
 0x304   : > { %5229 = vmatpush.msk.msra.mxu0 %vm9249_vm12, %v9172_v42  ;;  %vm9263_vm12 = vcmp.eq.s32.totalorder %v9216_v14, %v9185_v26  ;;  %v2403_v14 = vld [vmem:[%s8844_s5 + $0x40] sm:$0xff] }
 0x306   : > { %5230 = vmatpush.msk.msra.mxu0 %vm9250_vm10, %v9172_v42  ;;  %vm9264_vm10 = vcmp.eq.s32.totalorder %v9220_v18, %v9185_v26  ;;  %v5180_v18 = vld [vmem:[%s8844_s5 + $0x68] sm:$0xff] }
 0x308   : > { %5231 = vmatpush.msk.msra.mxu0 %vm9251_vm15, %v9172_v42  ;;  %vm9265_vm15 = vcmp.eq.s32.totalorder %v9224_v22, %v9185_v26  ;;  %v5210_v22 = vld [vmem:[%s8844_s5 + $0xb8] sm:$0xff] }
 0x309   : > { %5109 = vmatmul.msk.f32.gmra.mxu0 %vm1914_vm0, %v5097_v47  ;;  %v2079_v10 = vpop.f32.mrf.mxu2 }
 0x30a   : > { %5104 = vmatmul.msk.f32.gmra.mxu3 %vm1914_vm0, %v5098_v54  ;;  %5232 = vmatpush.msk.msra.mxu0 %vm9252_vm11, %v9172_v42  ;;  %vm9266_vm11 = vcmp.eq.s32.totalorder %v9228_v24, %v9185_v26  ;;  %v5181_v24 = vld [vmem:[%s8844_s5 + $0x70] sm:$0xff] }
 0x30c   : > { %5233 = vmatpush.msk.msra.mxu0 %vm9253_vm14, %v9172_v42  ;;  %vm9267_vm14 = vcmp.eq.s32.totalorder %v9230_v60, %v9185_v26  ;;  %v5212_v60 = vld [vmem:[%s8844_s5 + $0xc8] sm:$0xff] }
 0x30e   : > { %5234 = vmatpush.msk.msra.mxu0 %vm9254_vm9, %v9172_v42  ;;  %vm9268_vm9 = vcmp.eq.s32.totalorder %v9234_v39, %v9185_v26  ;;  %v5183_v39 = vld [vmem:[%s8844_s5 + $0x80] sm:$0xff] }
 0x310   : > { %5235 = vmatpush.msk.msra.mxu0 %vm9255_vm2, %v9172_v42  ;;  %vm9269_vm2 = vcmp.eq.s32.totalorder %v9237_v30, %v9185_v26  ;;  %v5213_v30 = vld [vmem:[%s8844_s5 + $0xd0] sm:$0xff] }
 0x311   : > { %5110 = vmatmul.msk.f32.gmra.mxu0 %vm1914_vm0, %v5098_v54 }
 0x312   : > { %5105 = vmatmul.msk.f32.gmra.mxu3 %vm1914_vm0, %v5099_v37  ;;  %5236 = vmatpush.msk.msra.mxu0 %vm9256_vm8, %v9172_v42  ;;  %vm9007_vm8 = vcmask 850944  }
 0x319   : > { %5111 = vmatmul.msk.f32.gmra.mxu0 %vm1914_vm0, %v5099_v37  ;;  %vm9008_vm0 = vcmask 687104  }
 0x34d   : > { %v1984_v40 = vpop.f32.mrf.mxu0  ;;  %v1952_v50 = vpop.f32.mrf.mxu1 }
 0x34e   : > { %v2068_v3 = vadd.f32 %v2067_v0, %v1984_v40 }
 0x354   : > { %v1955_v31 = vpop.f32.mrf.mxu3 }
 0x355   : > { %v2035_v23 = vpop.f32.mrf.mxu1 }
 0x356   : > { %v1987_v16 = vpop.f32.mrf.mxu0  ;;  %v2036_v58 = vadd.f32 %v2035_v23, %v1952_v50 }
 0x357   : > { %v2071_v11 = vadd.f32 %v2070_v43, %v1987_v16 }
 0x35c   : > { %v1958_v29 = vpop.f32.mrf.mxu3 }
 0x35e   : > { %v1990_v27 = vpop.f32.mrf.mxu0  ;;  %v2038_v61 = vpop.f32.mrf.mxu1 }
 0x35f   : > { %v2039_v12 = vadd.f32 %v2038_v61, %v1955_v31  ;;  %v2074_v53 = vadd.f32 %v2073_v35, %v1990_v27 }
 0x365   : > { %v1961_v55 = vpop.f32.mrf.mxu3 }
 0x366   : > { %v1993_v38 = vpop.f32.mrf.mxu0  ;;  %v2041_v48 = vpop.f32.mrf.mxu1 }
 0x367   : > { %v2042_v45 = vadd.f32 %v2041_v48, %v1958_v29  ;;  %v2077_v17 = vadd.f32 %v2076_v28, %v1993_v38 }
 0x36d   : > { %v1964_v6 = vpop.f32.mrf.mxu3 }
 0x36e   : > { %v1996_v20 = vpop.f32.mrf.mxu0  ;;  %v2044_v7 = vpop.f32.mrf.mxu1 }
 0x36f   : > { %v2045_v41 = vadd.f32 %v2044_v7, %v1961_v55  ;;  %v2080_v25 = vadd.f32 %v2079_v10, %v1996_v20 }
 0x375   : > { %v2143_v49 = vpop.f32.mrf.mxu3 }
 0x376   : > { %v2190_v44 = vadd.f32 %v2143_v49, %v2036_v58  ;;  %v2175_v46 = vpop.f32.mrf.mxu0  ;;  %v2047_v36 = vpop.f32.mrf.mxu1 }
 0x377   : > { %v2191_v51 = vadd.f32 %v2175_v46, %v2068_v3  ;;  %v2048_v21 = vadd.f32 %v2047_v36, %v1964_v6  ;;  %v2383_v3 = vpop.permute.xlu1 %2382 }
 0x378   : > { %2240 = vmatmul.f32.vlgmr.msrb.gmra.mxu1 %v2190_v44  ;;  %2307 = vmatmul.f32.vlgmr.msra.gmra.mxu3 %v2190_v44 }
 0x379   : > { %5139 = vmatmul.msk.f32.vlgmr.msra.gmra.mxu2 %vm9008_vm0, %v2191_v51  ;;  %5171 = vmatmul.msk.f32.vlgmr.msrb.gmra.mxu0 %vm9008_vm0, %v2191_v51 }
 0x37d   : > { %v2146_v19 = vpop.f32.mrf.mxu3 }
 0x37e   : > { %v2178_v63 = vpop.f32.mrf.mxu0  ;;  %v2192_v2 = vadd.f32 %v2146_v19, %v2039_v12  ;;  %v2378_v12 = vpop.permute.xlu2 %2377 }
 0x37f   : > { %v2193_v15 = vadd.f32 %v2178_v63, %v2071_v11  ;;  %v2368_v7 = vpop.permute.xlu1 %2367 }
 0x380   : > { %2243 = vmatmul.f32.gmra.mxu1 %v2192_v2  ;;  %2310 = vmatmul.f32.gmra.mxu3 %v2192_v2  ;;  %v2373_v2 = vpop.permute.xlu0 %2372 }
 0x381   : > { %5140 = vmatmul.msk.f32.gmra.mxu2 %vm9008_vm0, %v2193_v15  ;;  %5172 = vmatmul.msk.f32.gmra.mxu0 %vm9008_vm0, %v2193_v15 }
 0x385   : > { %v2149_v56 = vpop.f32.mrf.mxu3 }
 0x386   : > { %v2181_v32 = vpop.f32.mrf.mxu0  ;;  %v2194_v62 = vadd.f32 %v2149_v56, %v2042_v45 }
 0x387   : > { %v2195_v33 = vadd.f32 %v2181_v32, %v2074_v53 }
 0x388   : > { %2246 = vmatmul.f32.gmra.mxu1 %v2194_v62  ;;  %2313 = vmatmul.f32.gmra.mxu3 %v2194_v62 }
 0x389   : > { %5141 = vmatmul.msk.f32.gmra.mxu2 %vm9008_vm0, %v2195_v33  ;;  %5173 = vmatmul.msk.f32.gmra.mxu0 %vm9008_vm0, %v2195_v33 }
 0x38d   : > { %v2152_v9 = vpop.f32.mrf.mxu3 }
 0x38e   : > { %v2196_v52 = vadd.f32 %v2152_v9, %v2045_v41  ;;  %v2184_v59 = vpop.f32.mrf.mxu0 }
 0x38f   : > { %v2197_v5 = vadd.f32 %v2184_v59, %v2077_v17 }
 0x390   : > { %2249 = vmatmul.f32.gmra.mxu1 %v2196_v52  ;;  %2316 = vmatmul.f32.gmra.mxu3 %v2196_v52 }
 0x391   : > { %5142 = vmatmul.msk.f32.gmra.mxu2 %vm9008_vm0, %v2197_v5  ;;  %5174 = vmatmul.msk.f32.gmra.mxu0 %vm9008_vm0, %v2197_v5 }
 0x395   : > { %v2155_v47 = vpop.f32.mrf.mxu3 }
 0x396   : > { %v2198_v54 = vadd.f32 %v2155_v47, %v2048_v21  ;;  %v2187_v37 = vpop.f32.mrf.mxu0 }
 0x397   : > { %v2199_v40 = vadd.f32 %v2187_v37, %v2080_v25  ;;  %v2363_v25 = vpop.permute.xlu2 %2362 }
 0x398   : > { %2252 = vmatmul.f32.gmra.mxu1 %v2198_v54  ;;  %2319 = vmatmul.f32.gmra.mxu3 %v2198_v54 }
 0x399   : > { %5143 = vmatmul.msk.f32.gmra.mxu2 %vm9008_vm0, %v2199_v40  ;;  %5175 = vmatmul.msk.f32.gmra.mxu0 %vm9008_vm0, %v2199_v40 }
 0x3f5   : > { %v2241_v31 = vpop.f32.mrf.mxu1 }
 0x3f6   : > { %v2340_v16 = vpop.f32.mrf.mxu0 }
 0x3fb   : > { %v2308_v29 = vpop.f32.mrf.mxu3 }
 0x3fc   : > { %v2273_v27 = vpop.f32.mrf.mxu2  ;;  %v2341_v15 = vadd.f32 %v2340_v16, %v2308_v29 }
 0x3fd   : > { %v2244_v50 = vpop.f32.mrf.mxu1  ;;  %v2274_v45 = vadd.f32 %v2273_v27, %v2241_v31  ;;  %v2687_v27 = vld [vmem:[%s8845_s6 + $0x8] sm:$0xff] }
 0x3fe   : > { %v2343_v55 = vpop.f32.mrf.mxu0 }
 0x3ff   : > { %v2355_v33 = vmax.f32 %v2274_v45, %v2341_v15 }
 0x401   : > { %v2385_v47 = vadd.f32 %v2363_v25, %v2355_v33  ;;  %v5206_v33 = vld [vmem:[%s8844_s5 + $0x98] sm:$0xff] }
 0x403   : > { %v2311_v38 = vpop.f32.mrf.mxu3  ;;  %v2390_v31 = vmax.f32 %v2385_v47, 0.0 }
 0x404   : > { %v2276_v23 = vpop.f32.mrf.mxu2  ;;  %v2344_v19 = vadd.f32 %v2343_v55, %v2311_v38  ;;  %v2686_v55 = vld [vmem:[%s8845_s6] sm:$0xff]  ;;  %v2692_v38 = vld [vmem:[%s8845_s6 + $0x30] sm:$0xff] }
 0x405   : > { %v2247_v6 = vpop.f32.mrf.mxu1  ;;  %v2277_v35 = vadd.f32 %v2276_v23, %v2244_v50  ;;  %v2688_v50 = vld [vmem:[%s8845_s6 + $0x10] sm:$0xff]  ;;  %v2690_v23 = vld [vmem:[%s8845_s6 + $0x20] sm:$0xff] }
 0x406   : > { %v2346_v0 = vpop.f32.mrf.mxu0 }
 0x407   : > { %v2356_v32 = vmax.f32 %v2277_v35, %v2344_v19 }
 0x409   : > { %v2386_v36 = vadd.f32 %v2368_v7, %v2356_v32  ;;  %v5176_v7 = vld [vmem:[%s8844_s5 + $0x48] sm:$0xff] }
 0x40b   : > { %v2314_v20 = vpop.f32.mrf.mxu3  ;;  %v2391_v37 = vmax.f32 %v2386_v36, 0.0 }
 0x40c   : > { %v2279_v61 = vpop.f32.mrf.mxu2  ;;  %v2347_v43 = vadd.f32 %v2346_v0, %v2314_v20  ;;  %v2689_v0 = vld [vmem:[%s8845_s6 + $0x18] sm:$0xff] }
 0x40d   : > { %v2280_v58 = vadd.f32 %v2279_v61, %v2247_v6  ;;  %v2250_v44 = vpop.f32.mrf.mxu1  ;;  %v5460_v29 = vpack.i.bf16 %v2390_v31, %v2391_v37  ;;  %v2694_v6 = vld [vmem:[%s8845_s6 + $0x40] sm:$0xff]  ;;  %v2693_v20 = vld [vmem:[%s8845_s6 + $0x38] sm:$0xff]  ;;  %v2691_v61 = vld [vmem:[%s8845_s6 + $0x28] sm:$0xff] }
 0x40e   : > { %v2349_v49 = vpop.f32.mrf.mxu0 }
 0x40f   : > { %v2357_v46 = vmax.f32 %v2280_v58, %v2347_v43  ;;  %v2395_v58 = vld [vmem:[%s8844_s5] sm:$0xff] }
 0x411   : > { %v2387_v53 = vadd.f32 %v2373_v2, %v2357_v46 }
 0x413   : > { %v2317_v51 = vpop.f32.mrf.mxu3  ;;  %v2392_v28 = vmax.f32 %v2387_v53, 0.0  ;;  %v2399_v53 = vld [vmem:[%s8844_s5 + $0x20] sm:$0xff] }
 0x414   : > { %v2350_v11 = vadd.f32 %v2349_v49, %v2317_v51  ;;  %v2282_v48 = vpop.f32.mrf.mxu2 }
 0x415   : > { %v2283_v63 = vadd.f32 %v2282_v48, %v2250_v44  ;;  %v2253_v52 = vpop.f32.mrf.mxu1  ;;  %v2397_v44 = vld [vmem:[%s8844_s5 + $0x10] sm:$0xff] }
 0x416   : > { %v2352_v17 = vpop.f32.mrf.mxu0 }
 0x417   : > { %v2358_v56 = vmax.f32 %v2283_v63, %v2350_v11  ;;  %v2398_v11 = vld [vmem:[%s8844_s5 + $0x18] sm:$0xff]  ;;  %v5205_v63 = vld [vmem:[%s8844_s5 + $0x90] sm:$0xff] }
 0x419   : > { %v2388_v62 = vadd.f32 %v2378_v12, %v2358_v56 }
 0x41b   : > { %v2393_v41 = vmax.f32 %v2388_v62, 0.0  ;;  %v2320_v9 = vpop.f32.mrf.mxu3 }
 0x41c   : > { %v2353_v59 = vadd.f32 %v2352_v17, %v2320_v9  ;;  %v2285_v5 = vpop.f32.mrf.mxu2  ;;  %v5207_v17 = vld [vmem:[%s8844_s5 + $0xa0] sm:$0xff]  ;;  %v5184_v9 = vld [vmem:[%s8844_s5 + $0x88] sm:$0xff] }
 0x41d   : > { %v2286_v10 = vadd.f32 %v2285_v5, %v2253_v52  ;;  %v5450_v21 = vpack.i.bf16 %v2392_v28, %v2393_v41 }
 0x41f   : > { %v2359_v54 = vmax.f32 %v2286_v10, %v2353_v59  ;;  %5451 = vrot.lane.b32.xlu1 %v5450_v21, %s5712_s21 }
 0x421   : > { %v2389_v40 = vadd.f32 %v2383_v3, %v2359_v54  ;;  %v2396_v3 = vld [vmem:[%s8844_s5 + $0x8] sm:$0xff] }
 0x423   : > { %v2394_v16 = vmax.f32 %v2389_v40, 0.0 }
 0x425   : > { %2427 = vrot.lane.b32.xlu2 %v2394_v16, %s5711_s12  ;;  %2598 = vrot.lane.b32.xlu0 %v2394_v16, %s5712_s21 }
 0x426   : > { %5195 = vmatpush.msk.msrb.mxu2 %vm1416_vm1, %v2394_v16 }
 0x427   : > { %5461 = vrot.lane.b32.xlu1 %v5460_v29, %s5712_s21  ;;  %s8992_s21 = smov 88  }
 0x428   : > { %2548 = vmatpush.msrb.mxu2 %v2393_v41  ;;  %v5177_v41 = vld [vmem:[%s8844_s5 + $0x50] sm:$0xff] }
 0x42a   : > { %2549 = vmatpush.msrb.mxu2 %v2392_v28  ;;  %v2400_v28 = vld [vmem:[%s8844_s5 + $0x28] sm:$0xff] }
 0x42c   : > { %2550 = vmatpush.msrb.mxu2 %v2391_v37 }
 0x42d   : > { %5466 = vrot.lane.b32.xlu2 %v5460_v29, %s5711_s12  ;;  %5456 = vrot.lane.b32.xlu0 %v5450_v21, %s5711_s12  ;;  %s8990_s12 = smov 60  }
 0x42e   : > { %2551 = vmatpush.msrb.mxu2 %v2390_v31 }
 0x42f   : > { %2827 = vperm.xlu1 %5427, %v2687_v27   ;;  %5196 = vmatmul.msk.f32.vlgmr.msrb.gmra.mxu2 %vm2433_vm7, %v2395_v58 }
 0x435   : > { %2832 = vperm.xlu2 %5428, %v2688_v50   ;;  %2822 = vperm.xlu0 %5429, %v2686_v55  }
 0x437   : > { %2852 = vperm.xlu1 %5427, %v2692_v38   ;;  %5197 = vmatmul.msk.f32.gmra.mxu2 %vm2433_vm7, %v2396_v3 }
 0x43d   : > { %2842 = vperm.xlu2 %5428, %v2690_v23   ;;  %2837 = vperm.xlu0 %5429, %v2689_v0  }
 0x43f   : > { %2862 = vperm.xlu1 %5427, %v2694_v6   ;;  %5198 = vmatmul.msk.f32.gmra.mxu2 %vm2433_vm7, %v2397_v44 }
 0x445   : > { %2857 = vperm.xlu2 %5428, %v2693_v20   ;;  %2847 = vperm.xlu0 %5429, %v2691_v61  }
 0x447   : > { %5199 = vmatmul.msk.f32.gmra.mxu2 %vm2433_vm7, %v2398_v11 }
 0x44f   : > { %5200 = vmatmul.msk.f32.gmra.mxu2 %vm2433_vm7, %v2399_v53 }
 0x457   : > { %5201 = vmatmul.msk.f32.gmra.mxu2 %vm2433_vm7, %v2400_v28 }
 0x47f   : > { %v2428_v43 = vpop.permute.xlu2 %2427 }
 0x480   : > { %5185 = vmatpush.msk.msra.mxu1 %vm1416_vm1, %v2428_v43 }
 0x487   : > { %v5467_v45 = vpop.permute.xlu2 %5466 }
 0x488   : > { %v5468_v32 = vunpack.i.l.bf16 %v5467_v45  ;;  %v5469_v62 = vunpack.i.h.bf16 %v5467_v45 }
 0x491   : > { %v5452_v49 = vpop.permute.xlu1 %5451 }
 0x492   : > { %v5453_v51 = vunpack.i.l.bf16 %v5452_v49  ;;  %v5454_v48 = vunpack.i.h.bf16 %v5452_v49 }
 0x497   : > { %v2599_v46 = vpop.permute.xlu0 %2598 }
 0x498   : > { %5214 = vmatpush.msk.msrb.mxu3 %vm1416_vm1, %v2599_v46  ;;  %vm9257_vm1 = vcmp.eq.s32.totalorder %v9196_v34, %v9185_v26  ;;  %v2401_v34 = vld [vmem:[%s8844_s5 + $0x30] sm:$0xff]  ;;  %v5182_v26 = vld [vmem:[%s8844_s5 + $0x78] sm:$0xff] }
 0x499   : > { %v5462_v12 = vpop.permute.xlu1 %5461  ;;  %5202 = vmatmul.msk.f32.gmra.mxu2 %vm2433_vm7, %v2401_v34 }
 0x49a   : > { %2645 = vmatpush.msrb.mxu3 %v5453_v51  ;;  %v5463_v19 = vunpack.i.l.bf16 %v5462_v12  ;;  %v5464_v35 = vunpack.i.h.bf16 %v5462_v12 }
 0x49c   : > { %2646 = vmatpush.msrb.mxu3 %v5454_v48 }
 0x49e   : > { %2647 = vmatpush.msrb.mxu3 %v5463_v19 }
 0x49f   : > { %v5457_v2 = vpop.permute.xlu0 %5456 }
 0x4a0   : > { %v5458_v15 = vunpack.i.l.bf16 %v5457_v2  ;;  %2648 = vmatpush.msrb.mxu3 %v5464_v35  ;;  %v5459_v56 = vunpack.i.h.bf16 %v5457_v2 }
 0x4a1   : > { %5215 = vmatmul.msk.f32.vlgmr.msrb.gmra.mxu3 %vm2433_vm7, %v5205_v63  ;;  %5203 = vmatmul.msk.f32.gmra.mxu2 %vm2433_vm7, %v2402_v4 }
 0x4a2   : > { %2475 = vmatpush.msra.mxu1 %v5458_v15 }
 0x4a4   : > { %2476 = vmatpush.msra.mxu1 %v5459_v56 }
 0x4a6   : > { %2477 = vmatpush.msra.mxu1 %v5468_v32 }
 0x4a7   : > { %v2823_v34 = vpop.permute.xlu0 %2822 }
 0x4a8   : > { %2478 = vmatpush.msra.mxu1 %v5469_v62 }
 0x4a9   : > { %5186 = vmatmul.msk.f32.vlgmr.msra.gmra.mxu1 %vm2433_vm7, %v5176_v7  ;;  %5216 = vmatmul.msk.f32.gmra.mxu3 %vm2433_vm7, %v5206_v33 }
 0x4aa   : > { %5246 = vmatpush.msk.msrb.mxu1 %vm9257_vm1, %v9172_v42  ;;  %5204 = vmatmul.msk.f32.gmra.mxu2 %vm2433_vm7, %v2403_v14  ;;  %v2828_v14 = vpop.permute.xlu1 %2827 }
 0x4ac   : > { %5247 = vmatpush.msk.msrb.mxu1 %vm9258_vm13, %v9172_v42 }
 0x4ae   : > { %5248 = vmatpush.msk.msrb.mxu1 %vm9259_vm4, %v9172_v42 }
 0x4b0   : > { %5249 = vmatpush.msk.msrb.mxu1 %vm9260_vm5, %v9172_v42 }
 0x4b1   : > { %5187 = vmatmul.msk.f32.gmra.mxu1 %vm2433_vm7, %v5177_v41  ;;  %5217 = vmatmul.msk.f32.gmra.mxu3 %vm2433_vm7, %v5207_v17 }
 0x4b2   : > { %5250 = vmatpush.msk.msrb.mxu1 %vm9261_vm3, %v9172_v42  ;;  %v2553_v52 = vpop.f32.mrf.mxu2 }
 0x4b4   : > { %5251 = vmatpush.msk.msrb.mxu1 %vm9262_vm6, %v9172_v42 }
 0x4b6   : > { %5252 = vmatpush.msk.msrb.mxu1 %vm9263_vm12, %v9172_v42 }
 0x4b8   : > { %5253 = vmatpush.msk.msrb.mxu1 %vm9264_vm10, %v9172_v42 }
 0x4b9   : > { %5188 = vmatmul.msk.f32.gmra.mxu1 %vm2433_vm7, %v5178_v8  ;;  %5218 = vmatmul.msk.f32.gmra.mxu3 %vm2433_vm7, %v5208_v1 }
 0x4ba   : > { %5254 = vmatpush.msk.msrb.mxu1 %vm9265_vm15, %v9172_v42  ;;  %v2556_v59 = vpop.f32.mrf.mxu2 }
 0x4bc   : > { %5255 = vmatpush.msk.msrb.mxu1 %vm9266_vm11, %v9172_v42 }
 0x4be   : > { %5256 = vmatpush.msk.msrb.mxu1 %vm9267_vm14, %v9172_v42 }
 0x4c0   : > { %5257 = vmatpush.msk.msrb.mxu1 %vm9268_vm9, %v9172_v42 }
 0x4c1   : > { %5189 = vmatmul.msk.f32.gmra.mxu1 %vm2433_vm7, %v5179_v57  ;;  %5219 = vmatmul.msk.f32.gmra.mxu3 %vm2433_vm7, %v5209_v13 }
 0x4c2   : > { %5258 = vmatpush.msk.msrb.mxu1 %vm9269_vm2, %v9172_v42  ;;  %v5211_v42 = vld [vmem:[%s8844_s5 + $0xc0] sm:$0xff]  ;;  %v2559_v21 = vpop.f32.mrf.mxu2  ;;  %vm9006_vm2 = vcmask 654336  }
 0x4c9   : > { %5190 = vmatmul.msk.f32.gmra.mxu1 %vm2433_vm7, %v5180_v18  ;;  %5220 = vmatmul.msk.f32.gmra.mxu3 %vm2433_vm7, %v5210_v22 }
 0x4ca   : > { %v2562_v31 = vpop.f32.mrf.mxu2 }
 0x4d1   : > { %5191 = vmatmul.msk.f32.gmra.mxu1 %vm2433_vm7, %v5181_v24  ;;  %5221 = vmatmul.msk.f32.gmra.mxu3 %vm2433_vm7, %v5211_v42  ;;  %v9270_v24 = vlaneseq }
 0x4d2   : > { %v2565_v38 = vpop.f32.mrf.mxu2 }
 0x4d3   : > { %vm7868_vm1 = vcmp.lt.s32.totalorder %v9270_v24, 52  ;;  %vm7935_vm13 = vcmp.ge.s32.totalorder %v9270_v24, 52  ;;  %vm7940_vm4 = vcmp.lt.s32.totalorder %v9270_v24, 104  ;;  %vm2915_vm5 = vcmp.ge.s32.totalorder %v9270_v24, 104 }
 0x4d4   : > { %vm2916_vm3 = vcmp.lt.s32.totalorder %v9270_v24, 156  ;;  %vm7953_vm6 = vmand %vm7935_vm13, %vm7940_vm4  ;;  %vm2924_vm12 = vcmp.ge.s32.totalorder %v9270_v24, 28  ;;  %vm2925_vm10 = vcmp.lt.s32.totalorder %v9270_v24, 80  ;;  %vm2936_vm14 = vcmp.ge.s32.totalorder %v9270_v24, 80 }
 0x4d5   : > { %vm7961_vm15 = vmand %vm2915_vm5, %vm2916_vm3  ;;  %vm2937_vm9 = vcmp.lt.s32.totalorder %v9270_v24, 132  ;;  %vm7995_vm13 = vcmp.lt.s32.totalorder %v9270_v24, 56  ;;  %vm8002_vm4 = vcmp.ge.s32.totalorder %v9270_v24, 56  ;;  %vm8007_vm5 = vcmp.lt.s32.totalorder %v9270_v24, 108 }
 0x4d6   : > { %vm7967_vm11 = vmand %vm2924_vm12, %vm2925_vm10  ;;  %vm8012_vm3 = vcmp.ge.s32.totalorder %v9270_v24, 108  ;;  %vm8017_vm12 = vcmp.lt.s32.totalorder %v9270_v24, 160 }
 0x4d9   : > { %5192 = vmatmul.msk.f32.gmra.mxu1 %vm2433_vm7, %v5182_v26  ;;  %5222 = vmatmul.msk.f32.gmra.mxu3 %vm2433_vm7, %v5212_v60 }
 0x4da   : > { %v2568_v43 = vpop.f32.mrf.mxu2 }
 0x4e1   : > { %5193 = vmatmul.msk.f32.gmra.mxu1 %vm2433_vm7, %v5183_v39  ;;  %5223 = vmatmul.msk.f32.gmra.mxu3 %vm2433_vm7, %v5213_v30 }
 0x4e9   : > { %5194 = vmatmul.msk.f32.gmra.mxu1 %vm2433_vm7, %v5184_v9  ;;  %vm2883_vm7 = vcmask 424960  }
 0x51c   : > { %v2571_v51 = vpop.f32.mrf.mxu2 }
 0x524   : > { %v2650_v5 = vpop.f32.mrf.mxu3  ;;  %v2574_v63 = vpop.f32.mrf.mxu2 }
 0x526   : > { %v2480_v36 = vpop.f32.mrf.mxu1 }
 0x527   : > { %v2554_v10 = vadd.f32 %v2553_v52, %v2480_v36 }
 0x529   : > { %v2677_v25 = vadd.f32 %v2650_v5, %v2554_v10  ;;  %v2833_v5 = vpop.permute.xlu2 %2832 }
 0x52b   : > { %5237 = vmatmul.msk.f32.vlgmr.msra.gmra.mxu0 %vm9007_vm8, %v2677_v25  ;;  %5259 = vmatmul.msk.f32.vlgmr.msrb.gmra.mxu1 %vm9007_vm8, %v2677_v25 }
 0x52c   : > { %v2653_v47 = vpop.f32.mrf.mxu3 }
 0x52d   : > { %v2577_v56 = vpop.f32.mrf.mxu2 }
 0x52e   : > { %v2483_v54 = vpop.f32.mrf.mxu1 }
 0x52f   : > { %v2557_v37 = vadd.f32 %v2556_v59, %v2483_v54 }
 0x531   : > { %v2678_v40 = vadd.f32 %v2653_v47, %v2557_v37 }
 0x533   : > { %5238 = vmatmul.msk.f32.gmra.mxu0 %vm9007_vm8, %v2678_v40  ;;  %5260 = vmatmul.msk.f32.gmra.mxu1 %vm9007_vm8, %v2678_v40 }
 0x534   : > { %v2656_v16 = vpop.f32.mrf.mxu3 }
 0x536   : > { %v2486_v29 = vpop.f32.mrf.mxu1 }
 0x537   : > { %v2560_v27 = vadd.f32 %v2559_v21, %v2486_v29 }
 0x539   : > { %v2679_v50 = vadd.f32 %v2656_v16, %v2560_v27 }
 0x53b   : > { %5239 = vmatmul.msk.f32.gmra.mxu0 %vm9007_vm8, %v2679_v50  ;;  %5261 = vmatmul.msk.f32.gmra.mxu1 %vm9007_vm8, %v2679_v50 }
 0x53c   : > { %v2659_v55 = vpop.f32.mrf.mxu3 }
 0x53e   : > { %v2489_v23 = vpop.f32.mrf.mxu1 }
 0x53f   : > { %v2563_v0 = vadd.f32 %v2562_v31, %v2489_v23  ;;  %v2838_v31 = vpop.permute.xlu0 %2837 }
 0x541   : > { %v2680_v6 = vadd.f32 %v2659_v55, %v2563_v0 }
 0x543   : > { %5240 = vmatmul.msk.f32.gmra.mxu0 %vm9007_vm8, %v2680_v6  ;;  %5262 = vmatmul.msk.f32.gmra.mxu1 %vm9007_vm8, %v2680_v6  ;;  %v2843_v6 = vpop.permute.xlu2 %2842 }
 0x544   : > { %v2662_v20 = vpop.f32.mrf.mxu3 }
 0x546   : > { %v2492_v61 = vpop.f32.mrf.mxu1 }
 0x547   : > { %v2566_v58 = vadd.f32 %v2565_v38, %v2492_v61 }
 0x549   : > { %v2681_v3 = vadd.f32 %v2662_v20, %v2566_v58 }
 0x54b   : > { %5241 = vmatmul.msk.f32.gmra.mxu0 %vm9007_vm8, %v2681_v3  ;;  %5263 = vmatmul.msk.f32.gmra.mxu1 %vm9007_vm8, %v2681_v3 }
 0x54c   : > { %v2665_v49 = vpop.f32.mrf.mxu3 }
 0x54e   : > { %v2495_v44 = vpop.f32.mrf.mxu1 }
 0x54f   : > { %v2569_v46 = vadd.f32 %v2568_v43, %v2495_v44 }
 0x551   : > { %v2682_v12 = vadd.f32 %v2665_v49, %v2569_v46 }
 0x553   : > { %5242 = vmatmul.msk.f32.gmra.mxu0 %vm9007_vm8, %v2682_v12  ;;  %5264 = vmatmul.msk.f32.gmra.mxu1 %vm9007_vm8, %v2682_v12 }
 0x554   : > { %v2668_v11 = vpop.f32.mrf.mxu3 }
 0x556   : > { %v2498_v48 = vpop.f32.mrf.mxu1 }
 0x557   : > { %v2572_v19 = vadd.f32 %v2571_v51, %v2498_v48  ;;  %v2848_v51 = vpop.permute.xlu0 %2847 }
 0x559   : > { %v2683_v35 = vadd.f32 %v2668_v11, %v2572_v19 }
 0x55b   : > { %5243 = vmatmul.msk.f32.gmra.mxu0 %vm9007_vm8, %v2683_v35  ;;  %5265 = vmatmul.msk.f32.gmra.mxu1 %vm9007_vm8, %v2683_v35 }
 0x55c   : > { %v2671_v2 = vpop.f32.mrf.mxu3 }
 0x55e   : > { %v2501_v15 = vpop.f32.mrf.mxu1 }
 0x55f   : > { %v2575_v45 = vadd.f32 %v2574_v63, %v2501_v15 }
 0x561   : > { %v2684_v53 = vadd.f32 %v2671_v2, %v2575_v45 }
 0x563   : > { %5244 = vmatmul.msk.f32.gmra.mxu0 %vm9007_vm8, %v2684_v53  ;;  %5266 = vmatmul.msk.f32.gmra.mxu1 %vm9007_vm8, %v2684_v53  ;;  %v2853_v53 = vpop.permute.xlu1 %2852 }
 0x564   : > { %v2674_v62 = vpop.f32.mrf.mxu3 }
 0x566   : > { %v2504_v32 = vpop.f32.mrf.mxu1 }
 0x567   : > { %v2578_v7 = vadd.f32 %v2577_v56, %v2504_v32 }
 0x569   : > { %v2685_v33 = vadd.f32 %v2674_v62, %v2578_v7 }
 0x56b   : > { %5245 = vmatmul.msk.f32.gmra.mxu0 %vm9007_vm8, %v2685_v33  ;;  %5267 = vmatmul.msk.f32.gmra.mxu1 %vm9007_vm8, %v2685_v33 }
 0x5a8   : > { %v2740_v28 = vpop.f32.mrf.mxu0  ;;  %v2784_v41 = vpop.f32.mrf.mxu1 }
 0x5a9   : > { %v2811_v17 = vmax.f32 %v2740_v28, %v2784_v41 }
 0x5ab   : > { %v2865_v8 = vadd.f32 %v2823_v34, %v2811_v17  ;;  %v2858_v34 = vpop.permute.xlu2 %2857 }
 0x5ad   : > { %v2874_v1 = vmax.f32 %v2865_v8, 0.0 }
 0x5af   : > { %2884 = vst.msk [vmem:[#allocation2] sm:$0xff] %vm2883_vm7, %v2874_v1 }
 0x5b0   : > { %v2743_v4 = vpop.f32.mrf.mxu0  ;;  %v2787_v57 = vpop.f32.mrf.mxu1 }
 0x5b1   : > { %v2812_v13 = vmax.f32 %v2743_v4, %v2787_v57 }
 0x5b3   : > { %v2866_v18 = vadd.f32 %v2828_v14, %v2812_v13 }
 0x5b5   : > { %v2875_v22 = vmax.f32 %v2866_v18, 0.0 }
 0x5b6   : > { %v2919_v26 = vld [vmem:[#allocation2 + $0x3] sm:$0x1]  ;;  %v2908_v60 = vld [vmem:[#allocation2 + $0x2] sm:$0x1]  ;;  %v2899_v39 = vld [vmem:[#allocation2 + $0x1] sm:$0x1] }
 0x5b7   : > { %2885 = vst.msk [vmem:[#allocation2 + $0x8] sm:$0xff] %vm2883_vm7, %v2875_v22  ;;  %2921 = vrot.lane.b32.xlu2 %v2919_v26, %s5715_s26  ;;  %2910 = vrot.lane.b32.xlu1 %v2908_v60, %s9002_s28  ;;  %v2893_v52 = vld [vmem:[#allocation2] sm:$0x1]  ;;  %v2949_v21 = vld [vmem:[#allocation2 + $0x6] sm:$0x1]  ;;  %v2863_v26 = vpop.permute.xlu1 %2862 }
 0x5b8   : > { %2901 = vrot.lane.b32.xlu0 %v2899_v39, %s5717_s16  ;;  %v2746_v30 = vpop.f32.mrf.mxu0  ;;  %v2790_v9 = vpop.f32.mrf.mxu1  ;;  %2898 = vst.msk [vmem:[#allocation3] sm:$0x1] %vm7868_vm1, %v2893_v52  ;;  %v2928_v25 = vld [vmem:[#allocation2 + $0x4] sm:$0x1]  ;;  %v2958_v47 = vld [vmem:[#allocation2 + $0x7] sm:$0x1] }
 0x5b9   : > { %v2813_v59 = vmax.f32 %v2746_v30, %v2790_v9  ;;  %v2940_v27 = vld [vmem:[#allocation2 + $0x5] sm:$0x1] }
 0x5bb   : > { %v2867_v36 = vadd.f32 %v2833_v5, %v2813_v59 }
 0x5bd   : > { %v2876_v10 = vmax.f32 %v2867_v36, 0.0 }
 0x5be   : > { %v3008_v50 = vld [vmem:[#allocation2 + $0xc] sm:$0x1]  ;;  %v2979_v55 = vld [vmem:[#allocation2 + $0x9] sm:$0x1]  ;;  %v3029_v43 = vld [vmem:[#allocation2 + $0xe] sm:$0x1] }
 0x5bf   : > { %2886 = vst.msk [vmem:[#allocation2 + $0x10] sm:$0xff] %vm2883_vm7, %v2876_v10  ;;  %2951 = vrot.lane.b32.xlu2 %v2949_v21, %s9004_s8  ;;  %2930 = vrot.lane.b32.xlu1 %v2928_v25, %s5719_s9  ;;  %v2970_v58 = vld [vmem:[#allocation2 + $0x8] sm:$0x1]  ;;  %v2990_v3 = vld [vmem:[#allocation2 + $0xa] sm:$0x1] }
 0x5c0   : > { %2960 = vrot.lane.b32.xlu0 %v2958_v47, %s5720_s10  ;;  %v2749_v54 = vpop.f32.mrf.mxu0  ;;  %v2793_v37 = vpop.f32.mrf.mxu1  ;;  %v3041_v48 = vld [vmem:[#allocation2 + $0xf] sm:$0x1]  ;;  %v2999_v19 = vld [vmem:[#allocation2 + $0xb] sm:$0x1]  ;;  %v3020_v35 = vld [vmem:[#allocation2 + $0xd] sm:$0x1] }
 0x5c1   : > { %v2814_v40 = vmax.f32 %v2749_v54, %v2793_v37  ;;  %v3718_v54 = vld [vmem:[#allocation7 + $0x780] sm:$0xff]  ;;  %v3719_v37 = vld [vmem:[#allocation7 + $0x788] sm:$0xff] }
 0x5c2   : > { %3849 = vmatpush.xpose.msra.mxu2 %v3718_v54  ;;  %3869 = vmatpush.xpose.msra.mxu3 %v3719_v37  ;;  %v3690_v37 = vld [vmem:[#allocation7 + $0x6a0] sm:$0xff] }
 0x5c3   : > { %v2868_v16 = vadd.f32 %v2838_v31, %v2814_v40  ;;  %v3721_v40 = vld [vmem:[#allocation7 + $0x798] sm:$0xff] }
 0x5c4   : > { %3909 = vmatpush.xpose.msrb.mxu0 %v3721_v40  ;;  %v3692_v40 = vld [vmem:[#allocation7 + $0x6b0] sm:$0xff] }
 0x5c5   : > { %v2877_v29 = vmax.f32 %v2868_v16, 0.0 }
 0x5c6   : > { %v3071_v62 = vld [vmem:[#allocation2 + $0x12] sm:$0x1]  ;;  %v3059_v7 = vld [vmem:[#allocation2 + $0x11] sm:$0x1]  ;;  %v3050_v33 = vld [vmem:[#allocation2 + $0x10] sm:$0x1] }
 0x5c7   : > { %2887 = vst.msk [vmem:[#allocation2 + $0x18] sm:$0xff] %vm2883_vm7, %v2877_v29  ;;  %2942 = vrot.lane.b32.xlu1 %v2940_v27, %s5721_s19  ;;  %3010 = vrot.lane.b32.xlu2 %v3008_v50, %s5722_s25  ;;  %v3101_v4 = vld [vmem:[#allocation2 + $0x15] sm:$0x1]  ;;  %v3080_v57 = vld [vmem:[#allocation2 + $0x13] sm:$0x1]  ;;  %v3688_v29 = vld [vmem:[#allocation7 + $0x690] sm:$0xff] }
 0x5c8   : > { %2981 = vrot.lane.b32.xlu0 %v2979_v55, %s5723_s29  ;;  %v2752_v38 = vpop.f32.mrf.mxu0  ;;  %v2796_v23 = vpop.f32.mrf.mxu1  ;;  %v3110_v13 = vld [vmem:[#allocation2 + $0x16] sm:$0x1]  ;;  %v3092_v30 = vld [vmem:[#allocation2 + $0x14] sm:$0x1]  ;;  %v3122_v59 = vld [vmem:[#allocation2 + $0x17] sm:$0x1]  ;;  %3850 = vmatpush.xpose.msra.mxu2 %v3688_v29 }
 0x5c9   : > { %v2815_v0 = vmax.f32 %v2752_v38, %v2796_v23  ;;  %v3689_v27 = vld [vmem:[#allocation7 + $0x698] sm:$0xff]  ;;  %v3691_v50 = vld [vmem:[#allocation7 + $0x6a8] sm:$0xff]  ;;  %v3658_v55 = vld [vmem:[#allocation7 + $0x5a0] sm:$0xff] }
 0x5ca   : > { %3870 = vmatpush.xpose.msra.mxu3 %v3689_v27  ;;  %3910 = vmatpush.xpose.msrb.mxu0 %v3691_v50  ;;  %v3659_v38 = vld [vmem:[#allocation7 + $0x5a8] sm:$0xff]  ;;  %v3660_v27 = vld [vmem:[#allocation7 + $0x5b0] sm:$0xff]  ;;  %v3662_v50 = vld [vmem:[#allocation7 + $0x5c0] sm:$0xff] }
 0x5cb   : > { %v2869_v20 = vadd.f32 %v2843_v6, %v2815_v0  ;;  %v3661_v6 = vld [vmem:[#allocation7 + $0x5b8] sm:$0xff] }
 0x5cc   : > { %3851 = vmatpush.xpose.msra.mxu2 %v3658_v55 }
 0x5cd   : > { %v2878_v61 = vmax.f32 %v2869_v20, 0.0 }
 0x5ce   : > { %v3182_v9 = vld [vmem:[#allocation2 + $0x1d] sm:$0x1]  ;;  %v3131_v52 = vld [vmem:[#allocation2 + $0x18] sm:$0x1]  ;;  %v3161_v36 = vld [vmem:[#allocation2 + $0x1b] sm:$0x1]  ;;  %3871 = vmatpush.xpose.msra.mxu3 %v3659_v38  ;;  %3911 = vmatpush.xpose.msrb.mxu0 %v3661_v6 }
 0x5cf   : > { %2888 = vst.msk [vmem:[#allocation2 + $0x20] sm:$0xff] %vm2883_vm7, %v2878_v61  ;;  %3031 = vrot.lane.b32.xlu2 %v3029_v43, %s8992_s21  ;;  %2972 = vrot.lane.b32.xlu1 %v2970_v58, %s8999_s7  ;;  %s8996_s21 = smov 68   ;;  %s5740_s7 = smov 124   ;;  %v3143_v21 = vld [vmem:[#allocation2 + $0x19] sm:$0x1]  ;;  %v3628_v61 = vld [vmem:[#allocation7 + $0x4b0] sm:$0xff] }
 0x5d0   : > { %2992 = vrot.lane.b32.xlu0 %v2990_v3, %s5726_s30  ;;  %v2755_v49 = vpop.f32.mrf.mxu0  ;;  %v2799_v44 = vpop.f32.mrf.mxu1  ;;  %v3203_v47 = vld [vmem:[#allocation2 + $0x1f] sm:$0x1]  ;;  %v3152_v31 = vld [vmem:[#allocation2 + $0x1a] sm:$0x1]  ;;  %v3173_v23 = vld [vmem:[#allocation2 + $0x1c] sm:$0x1]  ;;  %3852 = vmatpush.xpose.msra.mxu2 %v3628_v61 }
 0x5d1   : > { %v2816_v46 = vmax.f32 %v2755_v49, %v2799_v44  ;;  %v3629_v43 = vld [vmem:[#allocation7 + $0x4b8] sm:$0xff]  ;;  %v3631_v3 = vld [vmem:[#allocation7 + $0x4c8] sm:$0xff]  ;;  %v3598_v44 = vld [vmem:[#allocation7 + $0x3c0] sm:$0xff] }
 0x5d2   : > { %3872 = vmatpush.xpose.msra.mxu3 %v3629_v43  ;;  %3912 = vmatpush.xpose.msrb.mxu0 %v3631_v3  ;;  %v3723_v49 = vld [vmem:[#allocation7 + $0x7a8] sm:$0xff]  ;;  %v3665_v38 = vld [vmem:[#allocation7 + $0x5d8] sm:$0xff]  ;;  %v3632_v3 = vld [vmem:[#allocation7 + $0x4d0] sm:$0xff] }
 0x5d3   : > { %v2870_v12 = vadd.f32 %v2848_v51, %v2816_v46  ;;  %3949 = vmatpush.xpose.msra.mxu1 %v3723_v49  ;;  %v3599_v46 = vld [vmem:[#allocation7 + $0x3c8] sm:$0xff]  ;;  %v3601_v51 = vld [vmem:[#allocation7 + $0x3d8] sm:$0xff] }
 0x5d4   : > { %3853 = vmatpush.xpose.msra.mxu2 %v3598_v44 }
 0x5d5   : > { %v2879_v11 = vmax.f32 %v2870_v12, 0.0  ;;  %v3194_v12 = vld [vmem:[#allocation2 + $0x1e] sm:$0x1] }
 0x5d6   : > { %v3212_v15 = vld [vmem:[#allocation2 + $0x20] sm:$0x1]  ;;  %v3220_v5 = vld [vmem:[#allocation2 + $0x22] sm:$0x1]  ;;  %v3214_v25 = vld [vmem:[#allocation2 + $0x21] sm:$0x1]  ;;  %3873 = vmatpush.xpose.msra.mxu3 %v3599_v46  ;;  %3913 = vmatpush.xpose.msrb.mxu0 %v3601_v51 }
 0x5d7   : > { %2889 = vst.msk [vmem:[#allocation2 + $0x28] sm:$0xff] %vm2883_vm7, %v2879_v11  ;;  %3043 = vrot.lane.b32.xlu2 %v3041_v48, %s8989_s14  ;;  %3001 = vrot.lane.b32.xlu1 %v2999_v19, %s8990_s12  ;;  %s8993_s14 = smov 40   ;;  %s8994_s12 = smov 116   ;;  %v3254_v16 = vld [vmem:[#allocation2 + $0x27] sm:$0x1]  ;;  %v9341_v46 = vmov 0 }
 0x5d8   : > { %3022 = vrot.lane.b32.xlu0 %v3020_v35, %s8991_s13  ;;  %v2758_v63 = vpop.f32.mrf.mxu0  ;;  %v2802_v2 = vpop.f32.mrf.mxu1  ;;  %3213 = vst.msk [vmem:[#allocation3 + $0xd] sm:$0x1] %vm7868_vm1, %v3212_v15  ;;  %s8995_s13 = smov 64   ;;  %v3234_v42 = vld [vmem:[#allocation2 + $0x24] sm:$0x1]  ;;  %v3693_v48 = vld [vmem:[#allocation7 + $0x6b8] sm:$0xff] }
 0x5d9   : > { %v2817_v45 = vmax.f32 %v2758_v63, %v2802_v2  ;;  %v3248_v0 = vld [vmem:[#allocation2 + $0x26] sm:$0x1]  ;;  %v3228_v20 = vld [vmem:[#allocation2 + $0x23] sm:$0x1]  ;;  %v3242_v19 = vld [vmem:[#allocation2 + $0x25] sm:$0x1]  ;;  %3950 = vmatpush.xpose.msra.mxu1 %v3693_v48 }
 0x5da   : > { %v3568_v35 = vld [vmem:[#allocation7 + $0x2d0] sm:$0xff]  ;;  %v3569_v63 = vld [vmem:[#allocation7 + $0x2d8] sm:$0xff]  ;;  %v3571_v15 = vld [vmem:[#allocation7 + $0x2e8] sm:$0xff]  ;;  %v9343_v51 = vmov 0 }
 0x5db   : > { %v2871_v56 = vadd.f32 %v2853_v53, %v2817_v45  ;;  %3854 = vmatpush.xpose.msra.mxu2 %v3568_v35  ;;  %3874 = vmatpush.xpose.msra.mxu3 %v3569_v63  ;;  %v3663_v45 = vld [vmem:[#allocation7 + $0x5c8] sm:$0xff]  ;;  %v3538_v53 = vld [vmem:[#allocation7 + $0x1e0] sm:$0xff] }
 0x5dc   : > { %3914 = vmatpush.xpose.msrb.mxu0 %v3571_v15  ;;  %v3727_v35 = vld [vmem:[#allocation7 + $0x7c8] sm:$0xff] }
 0x5dd   : > { %v2880_v32 = vmax.f32 %v2871_v56, 0.0  ;;  %3951 = vmatpush.xpose.msra.mxu1 %v3663_v45  ;;  %v3539_v56 = vld [vmem:[#allocation7 + $0x1e8] sm:$0xff]  ;;  %v9349_v45 = vmov 0 }
 0x5de   : > { %v3268_v11 = vld [vmem:[#allocation2 + $0x29] sm:$0x1] }
 0x5df   : > { %2890 = vst.msk [vmem:[#allocation2 + $0x30] sm:$0xff] %vm2883_vm7, %v2880_v32  ;;  %3073 = vrot.lane.b32.xlu2 %v3071_v62, %s8993_s14  ;;  %3061 = vrot.lane.b32.xlu1 %v3059_v7, %s8994_s12  ;;  %s8997_s14 = smov 92   ;;  %s8998_s12 = smov 120   ;;  %v3541_v32 = vld [vmem:[#allocation7 + $0x1f8] sm:$0xff] }
 0x5e0   : > { %3052 = vrot.lane.b32.xlu0 %v3050_v33, %s8995_s13  ;;  %v2761_v28 = vpop.f32.mrf.mxu0  ;;  %v2805_v41 = vpop.f32.mrf.mxu1  ;;  %s9001_s13 = smov 16   ;;  %v3288_v62 = vld [vmem:[#allocation2 + $0x2c] sm:$0x1]  ;;  %v3276_v7 = vld [vmem:[#allocation2 + $0x2a] sm:$0x1]  ;;  %3855 = vmatpush.xpose.msra.mxu2 %v3538_v53  ;;  %v3600_v53 = vld [vmem:[#allocation7 + $0x3d0] sm:$0xff] }
 0x5e1   : > { %v2818_v17 = vmax.f32 %v2761_v28, %v2805_v41  ;;  %3875 = vmatpush.xpose.msra.mxu3 %v3539_v56  ;;  %v3633_v33 = vld [vmem:[#allocation7 + $0x4d8] sm:$0xff]  ;;  %3915 = vmatpush.xpose.msrb.mxu0 %v3541_v32  ;;  %v3508_v41 = vld [vmem:[#allocation7 + $0xf0] sm:$0xff]  ;;  %v3602_v56 = vld [vmem:[#allocation7 + $0x3e0] sm:$0xff] }
 0x5e2   : > { %v3262_v28 = vld [vmem:[#allocation2 + $0x28] sm:$0x1]  ;;  %3952 = vmatpush.xpose.msra.mxu1 %v3633_v33 }
 0x5e3   : > { %v2872_v8 = vadd.f32 %v2858_v34, %v2818_v17  ;;  %v3509_v17 = vld [vmem:[#allocation7 + $0xf8] sm:$0xff] }
 0x5e4   : > { %3856 = vmatpush.xpose.msra.mxu2 %v3508_v41  ;;  %v3605_v33 = vld [vmem:[#allocation7 + $0x3f8] sm:$0xff] }
 0x5e5   : > { %v2881_v1 = vmax.f32 %v2872_v8, 0.0  ;;  %v3511_v8 = vld [vmem:[#allocation7 + $0x108] sm:$0xff]  ;;  %3876 = vmatpush.xpose.msra.mxu3 %v3509_v17 }
 0x5e6   : > { %3916 = vmatpush.xpose.msrb.mxu0 %v3511_v8  ;;  %v3316_v29 = vld [vmem:[#allocation2 + $0x30] sm:$0x1]  ;;  %v3322_v55 = vld [vmem:[#allocation2 + $0x31] sm:$0x1]  ;;  %v3330_v44 = vld [vmem:[#allocation2 + $0x32] sm:$0x1] }
 0x5e7   : > { %2891 = vst.msk [vmem:[#allocation2 + $0x38] sm:$0xff] %vm2883_vm7, %v2881_v1  ;;  %3103 = vrot.lane.b32.xlu2 %v3101_v4, %s8996_s21  ;;  %3082 = vrot.lane.b32.xlu1 %v3080_v57, %s8997_s14  ;;  %s9000_s21 = smov 100   ;;  %s5738_s14 = smov 96   ;;  %v3603_v1 = vld [vmem:[#allocation7 + $0x3e8] sm:$0xff]  ;;  %v3478_v4 = vld [vmem:[#allocation7] sm:$0xff]  ;;  %v9314_v8 = vmov 0 }
 0x5e8   : > { %3112 = vrot.lane.b32.xlu0 %v3110_v13, %s8998_s12  ;;  %v2764_v14 = vpop.f32.mrf.mxu0  ;;  %v2808_v18 = vpop.f32.mrf.mxu1  ;;  %s5739_s12 = smov 44   ;;  %v3479_v57 = vld [vmem:[#allocation7 + $0x8] sm:$0xff]  ;;  %v3302_v13 = vld [vmem:[#allocation2 + $0x2e] sm:$0x1]  ;;  %3953 = vmatpush.xpose.msra.mxu1 %v3603_v1  ;;  %v3697_v1 = vld [vmem:[#allocation7 + $0x6d8] sm:$0xff] }
 0x5e9   : > { %v2819_v22 = vmax.f32 %v2764_v14, %v2808_v18  ;;  %3857 = vmatpush.xpose.msra.mxu2 %v3478_v4  ;;  %3877 = vmatpush.xpose.msra.mxu3 %v3479_v57  ;;  %v3356_v63 = vld [vmem:[#allocation2 + $0x36] sm:$0x1]  ;;  %v3572_v14 = vld [vmem:[#allocation7 + $0x2f0] sm:$0xff]  ;;  %v3364_v48 = vld [vmem:[#allocation2 + $0x37] sm:$0x1] }
 0x5ea   : > { %v3575_v18 = vld [vmem:[#allocation7 + $0x308] sm:$0xff] }
 0x5eb   : > { %v2873_v60 = vadd.f32 %v2863_v26, %v2819_v22  ;;  %v3481_v22 = vld [vmem:[#allocation7 + $0x18] sm:$0xff] }
 0x5ec   : > { %v3296_v26 = vld [vmem:[#allocation2 + $0x2d] sm:$0x1]  ;;  %3917 = vmatpush.xpose.msrb.mxu0 %v3481_v22  ;;  %v3350_v22 = vld [vmem:[#allocation2 + $0x35] sm:$0x1] }
 0x5ed   : > { %v2882_v39 = vmax.f32 %v2873_v60, 0.0  ;;  %v3720_v60 = vld [vmem:[#allocation7 + $0x790] sm:$0xff] }
 0x5ee   : > { %3889 = vmatpush.xpose.msrb.mxu2 %v3720_v60  ;;  %v9318_v60 = vmov 0 }
 0x5ef   : > { %2892 = vst.msk [vmem:[#allocation2 + $0x40] sm:$0xff] %vm2883_vm7, %v2882_v39  ;;  %3094 = vrot.lane.b32.xlu1 %v3092_v30, %s9001_s13  ;;  %3184 = vrot.lane.b32.xlu2 %v3182_v9, %s9000_s21  ;;  %s5741_s21 = smov 20   ;;  %s9003_s13 = smov 76   ;;  %v3722_v39 = vld [vmem:[#allocation7 + $0x7a0] sm:$0xff]  ;;  %v3282_v30 = vld [vmem:[#allocation2 + $0x2b] sm:$0x1]  ;;  %vm7984_vm7 = vmand %vm2936_vm14, %vm2937_vm9 }
 0x5f0   : > { %3133 = vrot.lane.b32.xlu0 %v3131_v52, %s5738_s14  ;;  %v3725_v9 = vld [vmem:[#allocation7 + $0x7b8] sm:$0xff]  ;;  %3929 = vmatpush.xpose.msrb.mxu3 %v3722_v39  ;;  %vm9005_vm14 = vcmask 883712   ;;  %vm8036_vm9 = vmand %vm8002_vm4, %vm8007_vm5  ;;  %vm8064_vm4 = vcmp.lt.s32.totalorder %v9270_v24, 84  ;;  %v3370_v39 = vld [vmem:[#allocation2 + $0x38] sm:$0x1]  ;;  %vm8069_vm5 = vcmp.ge.s32.totalorder %v9270_v24, 84 }
 0x5f1   : > { %v3573_v52 = vld [vmem:[#allocation7 + $0x2f8] sm:$0xff]  ;;  %3989 = vmatpush.xpose.msra.mxu0 %v3725_v9  ;;  %v9319_v60 = vsel %vm8064_vm4, 4294967295, %v9318_v60  ;;  %v3667_v9 = vld [vmem:[#allocation7 + $0x5e8] sm:$0xff] }
 0x5f2   : > { %3954 = vmatpush.xpose.msra.mxu1 %v3573_v52  ;;  %3890 = vmatpush.xpose.msrb.mxu2 %v3690_v37  ;;  %v3344_v37 = vld [vmem:[#allocation2 + $0x34] sm:$0x1] }
 0x5f4   : > { %3930 = vmatpush.xpose.msrb.mxu3 %v3692_v40  ;;  %v3545_v40 = vld [vmem:[#allocation7 + $0x218] sm:$0xff] }
 0x5f6   : > { %v3424_v10 = vld [vmem:[#allocation2 + $0x40] sm:$0x1]  ;;  %3891 = vmatpush.xpose.msrb.mxu2 %v3660_v27 }
 0x5f7   : > { %3124 = vrot.lane.b32.xlu1 %v3122_v59, %s5739_s12  ;;  %3222 = vrot.lane.b32.xlu2 %v3220_v5, %s9002_s28  ;;  %3425 = vst.msk [vmem:[#allocation3 + $0x1a] sm:$0x1] %vm7868_vm1, %v3424_v10  ;;  %s5743_s28 = smov 72   ;;  %v9281_v59 = vmov 0  ;;  %vm7990_vm1 = vcmp.ge.s32.totalorder %v9270_v24, 4 }
 0x5f8   : > { %3163 = vrot.lane.b32.xlu0 %v3161_v36, %s5740_s7  ;;  %v9282_v59 = vsel %vm7953_vm6, 4294967295, %v9281_v59  ;;  %3931 = vmatpush.xpose.msrb.mxu3 %v3662_v50  ;;  %vm8027_vm10 = vmand %vm7990_vm1, %vm7995_vm13  ;;  %vm8059_vm13 = vcmp.ge.s32.totalorder %v9270_v24, 32  ;;  %v3510_v50 = vld [vmem:[#allocation7 + $0x100] sm:$0xff] }
 0x5f9   : > { %vm8046_vm1 = vmand %vm8012_vm3, %vm8017_vm12  ;;  %vm8074_vm3 = vcmp.lt.s32.totalorder %v9270_v24, 136  ;;  %vm8079_vm12 = vcmp.ge.s32.totalorder %v9270_v24, 8 }
 0x5fa   : > { %v9315_v8 = vsel %vm8046_vm1, 4294967295, %v9314_v8 }
 0x5fc   : > { %3932 = vmatpush.xpose.msrb.mxu3 %v3632_v3  ;;  %v3550_v3 = vld [vmem:[#allocation7 + $0x240] sm:$0xff] }
 0x5ff   : > { %3145 = vrot.lane.b32.xlu1 %v3143_v21, %s5741_s21  ;;  %3216 = vrot.lane.b32.xlu2 %v3214_v25, %s5717_s16  ;;  %v9283_v21 = vmov 0 }
 0x600   : > { %3205 = vrot.lane.b32.xlu0 %v3203_v47, %s9003_s13  ;;  %s5744_s13 = smov 48   ;;  %v9284_v21 = vsel %vm7961_vm15, 4294967295, %v9283_v21  ;;  %v9286_v47 = vmov 0  ;;  %3933 = vmatpush.xpose.msrb.mxu3 %v3602_v56 }
 0x601   : > { %9285 = vst [vmem:[#allocation30_spill] sm:$0xff] %v9284_v21  ;;  %v9287_v47 = vsel %vm7967_vm11, 4294967295, %v9286_v47  ;;  %v3574_v21 = vld [vmem:[#allocation7 + $0x300] sm:$0xff] }
 0x602   : > { %9288 = vst [vmem:[#allocation33_spill] sm:$0xff] %v9287_v47 }
 0x604   : > { %3934 = vmatpush.xpose.msrb.mxu3 %v3572_v14  ;;  %v3384_v14 = vld [vmem:[#allocation2 + $0x3a] sm:$0x1] }
 0x607   : > { %3154 = vrot.lane.b32.xlu1 %v3152_v31, %s5743_s28  ;;  %3256 = vrot.lane.b32.xlu2 %v3254_v16, %s5720_s10  ;;  %v3310_v31 = vld [vmem:[#allocation2 + $0x2f] sm:$0x1]  ;;  %v3695_v16 = vld [vmem:[#allocation7 + $0x6c8] sm:$0xff] }
 0x608   : > { %3236 = vrot.lane.b32.xlu0 %v3234_v42, %s5719_s9  ;;  %v3543_v42 = vld [vmem:[#allocation7 + $0x208] sm:$0xff]  ;;  %3990 = vmatpush.xpose.msra.mxu0 %v3695_v16 }
 0x609   : > { %3955 = vmatpush.xpose.msra.mxu1 %v3543_v42  ;;  %v3637_v42 = vld [vmem:[#allocation7 + $0x4f8] sm:$0xff] }
 0x60c   : > { %3991 = vmatpush.xpose.msra.mxu0 %v3665_v38  ;;  %v3515_v38 = vld [vmem:[#allocation7 + $0x128] sm:$0xff] }
 0x60f   : > { %3175 = vrot.lane.b32.xlu1 %v3173_v23, %s5744_s13  ;;  %3250 = vrot.lane.b32.xlu2 %v3248_v0, %s9004_s8  ;;  %s5745_s8 = smov 24   ;;  %v3513_v23 = vld [vmem:[#allocation7 + $0x118] sm:$0xff] }
 0x610   : > { %3230 = vrot.lane.b32.xlu0 %v3228_v20, %s5715_s26  ;;  %v9292_v20 = vmov 0  ;;  %3956 = vmatpush.xpose.msra.mxu1 %v3513_v23  ;;  %v3390_v23 = vld [vmem:[#allocation2 + $0x3b] sm:$0x1] }
 0x611   : > { %v7922_v58 = vpop.permute.xlu2 %2921  ;;  %v9293_v20 = vsel %vm7984_vm7, 4294967295, %v9292_v20 }
 0x612   : > { %9294 = vst [vmem:[#allocation35_spill] sm:$0xff] %v9293_v20 }
 0x617   : > { %3196 = vrot.lane.b32.xlu1 %v3194_v12, %s5745_s8  ;;  %3270 = vrot.lane.b32.xlu2 %v3268_v11, %s5723_s29  ;;  %s9273_s29 = smov 32   ;;  %v3635_v12 = vld [vmem:[#allocation7 + $0x4e8] sm:$0xff] }
 0x618   : > { %3244 = vrot.lane.b32.xlu0 %v3242_v19, %s5721_s19  ;;  %v3483_v11 = vld [vmem:[#allocation7 + $0x28] sm:$0xff]  ;;  %3992 = vmatpush.xpose.msra.mxu0 %v3635_v12  ;;  %v3480_v12 = vld [vmem:[#allocation7 + $0x10] sm:$0xff]  ;;  %v9345_v19 = vmov 0 }
 0x619   : > { %v7927_v2 = vpop.permute.xlu2 %2951  ;;  %3957 = vmatpush.xpose.msra.mxu1 %v3483_v11  ;;  %v3482_v11 = vld [vmem:[#allocation7 + $0x20] sm:$0xff] }
 0x61c   : > { %3993 = vmatpush.xpose.msra.mxu0 %v3605_v33 }
 0x61d   : > { %4029 = vmatpush.xpose.msrb.mxu1 %v3727_v35  ;;  %v9347_v35 = vmov 0 }
 0x61f   : > { %3290 = vrot.lane.b32.xlu1 %v3288_v62, %s5722_s25  ;;  %3278 = vrot.lane.b32.xlu2 %v3276_v7, %s5726_s30  ;;  %s9278_s25 = smov 88   ;;  %s9279_s30 = smov 36   ;;  %v3336_v62 = vld [vmem:[#allocation2 + $0x33] sm:$0x1]  ;;  %v9309_v7 = vmov 0 }
 0x620   : > { %3264 = vrot.lane.b32.xlu0 %v3262_v28, %s9273_s29  ;;  %s9280_s29 = smov 60   ;;  %v9310_v7 = vsel %vm8027_vm10, 4294967295, %v9309_v7  ;;  %v9312_v28 = vmov 0  ;;  %3994 = vmatpush.xpose.msra.mxu0 %v3575_v18  ;;  %v9365_v18 = vmov 0 }
 0x621   : > { %v7932_v34 = vpop.permute.xlu2 %3010  ;;  %v9313_v28 = vsel %vm8036_vm9, 4294967295, %v9312_v28  ;;  %4030 = vmatpush.xpose.msrb.mxu1 %v3697_v1  ;;  %v3404_v1 = vld [vmem:[#allocation2 + $0x3d] sm:$0x1] }
 0x624   : > { %3995 = vmatpush.xpose.msra.mxu0 %v3545_v40 }
 0x625   : > { %4031 = vmatpush.xpose.msrb.mxu1 %v3667_v9 }
 0x627   : > { %3304 = vrot.lane.b32.xlu1 %v3302_v13, %s9278_s25  ;;  %3298 = vrot.lane.b32.xlu2 %v3296_v26, %s9279_s30  ;;  %s9289_s25 = smov 12   ;;  %s9290_s30 = smov 64   ;;  %v3570_v13 = vld [vmem:[#allocation7 + $0x2e0] sm:$0xff]  ;;  %v9316_v26 = vmov 0 }
 0x628   : > { %3284 = vrot.lane.b32.xlu0 %v3282_v30, %s9280_s29  ;;  %s9291_s29 = smov 116   ;;  %v9317_v26 = vsel %vm8059_vm13, 4294967295, %v9316_v26  ;;  %v9322_v30 = vmov 0  ;;  %3996 = vmatpush.xpose.msra.mxu0 %v3515_v38  ;;  %v9378_v38 = vmov 0 }
 0x629   : > { %v2911_v5 = vpop.permute.xlu1 %2910  ;;  %v7959_v36 = vpop.permute.xlu2 %3031  ;;  %v9323_v30 = vsel %vm8074_vm3, 4294967295, %v9322_v30  ;;  %4032 = vmatpush.xpose.msrb.mxu1 %v3637_v42 }
 0x62a   : > { %v2912_v10 = vrot.slane %v2911_v5, 7  ;;  %v2902_v25 = vpop.permute.xlu0 %2901  ;;  %v3033_v15 = vrot.slane %v7959_v36, 7 }
 0x62b   : > { %2907 = vst.msk [vmem:[#allocation3] sm:$0x1] %vm7953_vm6, %v2902_v25  ;;  %v3540_v25 = vld [vmem:[#allocation7 + $0x1f0] sm:$0xff] }
 0x62c   : > { %v2913_v54 = vsel %vm9007_vm8, %v2912_v10, %v2911_v5  ;;  %v9324_v5 = vmov 0  ;;  %v9326_v10 = vmov 0  ;;  %vm9331_vm8 = vmand %vm8059_vm13, %vm8064_vm4  ;;  %vm8159_vm4 = vcmp.ge.s32.totalorder %v9270_v24, 88 }
 0x62d   : > { %2918 = vst.msk [vmem:[#allocation3] sm:$0x3] %vm7961_vm15, %v2913_v54  ;;  %v9325_v5 = vsel %vm8079_vm12, 4294967295, %v9324_v5  ;;  %v3542_v54 = vld [vmem:[#allocation7 + $0x200] sm:$0xff]  ;;  %v9346_v19 = vsel %vm8159_vm4, 4294967295, %v9345_v19  ;;  %vm8164_vm13 = vcmp.lt.s32.totalorder %v9270_v24, 140 }
 0x62e   : > { %2927 = vst.msk [vmem:[#allocation3 + $0x1] sm:$0x1] %vm7967_vm11, %v7922_v58  ;;  %v3630_v58 = vld [vmem:[#allocation7 + $0x4c0] sm:$0xff]  ;;  %3935 = vmatpush.xpose.msrb.mxu3 %v3542_v54  ;;  %v9348_v35 = vsel %vm8164_vm13, 4294967295, %v9347_v35 }
 0x62f   : > { %3312 = vrot.lane.b32.xlu1 %v3310_v31, %s9289_s25  ;;  %3318 = vrot.lane.b32.xlu2 %v3316_v29, %s9290_s30  ;;  %s9307_s25 = smov 40   ;;  %s9308_s30 = smov 120  }
 0x630   : > { %3324 = vrot.lane.b32.xlu0 %v3322_v55, %s9291_s29  ;;  %3892 = vmatpush.xpose.msrb.mxu2 %v3630_v58  ;;  %s9311_s29 = smov 92   ;;  %v3512_v55 = vld [vmem:[#allocation7 + $0x110] sm:$0xff] }
 0x631   : > { %v2931_v0 = vpop.permute.xlu1 %2930  ;;  %v7982_v6 = vpop.permute.xlu2 %3043  ;;  %v3548_v58 = vld [vmem:[#allocation7 + $0x230] sm:$0xff] }
 0x632   : > { %v2932_v61 = vrot.slane %v2931_v0, 7  ;;  %v2961_v43 = vpop.permute.xlu0 %2960  ;;  %3936 = vmatpush.xpose.msrb.mxu3 %v3512_v55  ;;  %v9376_v55 = vmov 0 }
 0x633   : > { %v2962_v32 = vrot.slane %v2961_v43, 7 }
 0x634   : > { %v2934_v49 = vsel %vm9006_vm2, %v2932_v61, %v2931_v0  ;;  %3893 = vmatpush.xpose.msrb.mxu2 %v3600_v53  ;;  %vm9330_vm2 = vcmask 687104   ;;  %v9351_v53 = vmov 0  ;;  %v3675_v61 = vld [vmem:[#allocation7 + $0x628] sm:$0xff] }
 0x635   : > { %2939 = vst.msk [vmem:[#allocation3 + $0x1] sm:$0x3] %vm7984_vm7, %v2934_v49  ;;  %v2964_v57 = vsel %vm9005_vm14, %v2962_v32, %v2961_v43  ;;  %vm8084_vm14 = vcmp.lt.s32.totalorder %v9270_v24, 60  ;;  %v3378_v43 = vld [vmem:[#allocation2 + $0x39] sm:$0x1] }
 0x636   : > { %v9327_v10 = vsel %vm8084_vm14, 4294967295, %v9326_v10  ;;  %vm9012_vm0 = vmand %vm8079_vm12, %vm8084_vm14  ;;  %vm8137_vm14 = vcmp.lt.s32.totalorder %v9270_v24, 164  ;;  %v3607_v49 = vld [vmem:[#allocation7 + $0x408] sm:$0xff]  ;;  %vm8148_vm12 = vcmp.lt.s32.totalorder %v9270_v24, 88  ;;  %3937 = vmatpush.xpose.msrb.mxu3 %v3482_v11  ;;  %v3642_v11 = vld [vmem:[#allocation7 + $0x520] sm:$0xff] }
 0x637   : > { %3332 = vrot.lane.b32.xlu1 %v3330_v44, %s9307_s25  ;;  %3358 = vrot.lane.b32.xlu2 %v3356_v63, %s9308_s30  ;;  %s9328_s25 = smov 68   ;;  %s9329_s30 = smov 16   ;;  %v3012_v44 = vrot.slane %v7932_v34, 7  ;;  %v9344_v51 = vsel %vm8148_vm12, 4294967295, %v9343_v51  ;;  %v3485_v63 = vld [vmem:[#allocation7 + $0x38] sm:$0xff] }
 0x638   : > { %3338 = vrot.lane.b32.xlu0 %v3336_v62, %s9311_s29  ;;  %3894 = vmatpush.xpose.msrb.mxu2 %v3570_v13  ;;  %v3547_v13 = vld [vmem:[#allocation7 + $0x228] sm:$0xff] }
 0x639   : > { %v2943_v41 = vpop.permute.xlu1 %2942  ;;  %v8040_v17 = vpop.permute.xlu2 %3073  ;;  %4033 = vmatpush.xpose.msrb.mxu1 %v3607_v49  ;;  %3997 = vmatpush.xpose.msra.mxu0 %v3485_v63  ;;  %v9385_v63 = vmov 0 }
 0x63a   : > { %2948 = vst.msk [vmem:[#allocation3 + $0x2] sm:$0x1] %vm8027_vm10, %v2943_v41  ;;  %v2982_v4 = vpop.permute.xlu0 %2981 }
 0x63b   : > { %2957 = vst.msk [vmem:[#allocation3 + $0x2] sm:$0x1] %vm8036_vm9, %v7927_v2  ;;  %v9320_v2 = vmov 0  ;;  %v2983_v52 = vrot.slane %v2982_v4, 7  ;;  %vm8180_vm9 = vcmp.lt.s32.totalorder %v9270_v24, 64 }
 0x63c   : > { %2969 = vst.msk [vmem:[#allocation3 + $0x2] sm:$0x3] %vm8046_vm1, %v2964_v57  ;;  %v9321_v2 = vsel %vm8069_vm5, 4294967295, %v9320_v2  ;;  %3895 = vmatpush.xpose.msrb.mxu2 %v3540_v25  ;;  %vm9332_vm1 = vmand %vm8069_vm5, %vm8074_vm3  ;;  %vm8175_vm3 = vcmp.ge.s32.totalorder %v9270_v24, 12  ;;  %v9352_v53 = vsel %vm8180_vm9, 4294967295, %v9351_v53  ;;  %vm9353_vm5 = vcmask 916480  }
 0x63d   : > { %v2984_v29 = vsel %vm9330_vm2, %v2983_v52, %v2982_v4  ;;  %vm8122_vm2 = vcmp.ge.s32.totalorder %v9270_v24, 60  ;;  %v9350_v45 = vsel %vm8175_vm3, 4294967295, %v9349_v45  ;;  %v3014_v62 = vsel %vm9353_vm5, %v3012_v44, %v7932_v34  ;;  %v3577_v34 = vld [vmem:[#allocation7 + $0x318] sm:$0xff]  ;;  %v3426_v57 = vld [vmem:[#allocation2 + $0x41] sm:$0x1] }
 0x63e   : > { %4034 = vmatpush.xpose.msrb.mxu1 %v3577_v34  ;;  %vm8223_vm5 = vcmp.ge.s32.totalorder %v9270_v24, 64  ;;  %v9391_v34 = vmov 0  ;;  %v3488_v4 = vld [vmem:[#allocation7 + $0x50] sm:$0xff] }
 0x63f   : > { %3352 = vrot.lane.b32.xlu1 %v3350_v22, %s9328_s25  ;;  %3372 = vrot.lane.b32.xlu2 %v3370_v39, %s5738_s14  ;;  %v9367_v22 = vmov 0  ;;  %v9371_v39 = vmov 0 }
 0x640   : > { %3346 = vrot.lane.b32.xlu0 %v3344_v37, %s9329_s30  ;;  %3896 = vmatpush.xpose.msrb.mxu2 %v3510_v50  ;;  %v3517_v37 = vld [vmem:[#allocation7 + $0x138] sm:$0xff]  ;;  %v3398_v50 = vld [vmem:[#allocation2 + $0x3c] sm:$0x1]  ;;  %s5644_s30 = scalar_lea.hbm %s8850_s11, 2 }
 0x641   : > { %v2973_v31 = vpop.permute.xlu1 %2972  ;;  %v8099_v16 = vpop.permute.xlu2 %3103 }
 0x642   : > { %v2993_v27 = vpop.permute.xlu0 %2992  ;;  %2978 = vst.msk [vmem:[#allocation3 + $0x3] sm:$0x1] %vm9331_vm8, %v2973_v31  ;;  %vm8127_vm8 = vcmp.lt.s32.totalorder %v9270_v24, 112  ;;  %4035 = vmatpush.xpose.msrb.mxu1 %v3547_v13  ;;  %v3432_v31 = vld [vmem:[#allocation2 + $0x42] sm:$0x1] }
 0x643   : > { %2989 = vst.msk [vmem:[#allocation3 + $0x3] sm:$0x3] %vm9332_vm1, %v2984_v29  ;;  %vm8132_vm1 = vcmp.ge.s32.totalorder %v9270_v24, 112  ;;  %vm9354_vm11 = vmand %vm8122_vm2, %vm8127_vm8  ;;  %v3440_v29 = vld [vmem:[#allocation2 + $0x43] sm:$0x1] }
 0x644   : > { %2998 = vst.msk [vmem:[#allocation3 + $0x4] sm:$0x1] %vm9012_vm0, %v2993_v27  ;;  %vm8143_vm0 = vcmp.ge.s32.totalorder %v9270_v24, 36  ;;  %3897 = vmatpush.xpose.msrb.mxu2 %v3480_v12  ;;  %vm9355_vm10 = vmand %vm8132_vm1, %vm8137_vm14  ;;  %v3487_v27 = vld [vmem:[#allocation7 + $0x48] sm:$0xff] }
 0x645   : > { %v9342_v46 = vsel %vm8143_vm0, 4294967295, %v9341_v46  ;;  %vm9357_vm7 = vmand %vm8143_vm0, %vm8148_vm12  ;;  %vm9374_vm0 = vcmask 949248  }
 0x646   : > { %4036 = vmatpush.xpose.msrb.mxu1 %v3517_v37 }
 0x647   : > { %3392 = vrot.lane.b32.xlu1 %v3390_v23, %s5740_s7  ;;  %3380 = vrot.lane.b32.xlu2 %v3378_v43, %s5741_s21  ;;  %s9364_s21 = smov 100  }
 0x648   : > { %3366 = vrot.lane.b32.xlu0 %v3364_v48, %s5739_s12  ;;  %v9383_v48 = vmov 0  ;;  %s4491_s12 = scalar_lea.sflag [#allocation6], %s5924_s23 }
 0x649   : > { %v3002_v56 = vpop.permute.xlu1 %3001  ;;  %v8188_v32 = vpop.permute.xlu2 %3184 }
 0x64a   : > { %v3023_v33 = vpop.permute.xlu0 %3022  ;;  %3007 = vst.msk [vmem:[#allocation3 + $0x4] sm:$0x1] %vm9354_vm11, %v3002_v56  ;;  %vm9356_vm11 = vcmask 719872   ;;  %4037 = vmatpush.xpose.msrb.mxu1 %v3487_v27  ;;  %v3466_v56 = vld [vmem:[#allocation2 + $0x47] sm:$0x1] }
 0x64b   : > { %3019 = vst.msk [vmem:[#allocation3 + $0x4] sm:$0x3] %vm9355_vm10, %v3014_v62  ;;  %v3035_v41 = vsel %vm9356_vm11, %v3033_v15, %v7959_v36  ;;  %vm9358_vm10 = vmand %vm8159_vm4, %vm8164_vm13  ;;  %vm8228_vm11 = vcmp.lt.s32.totalorder %v9270_v24, 116  ;;  %vm8246_vm13 = vcmp.lt.s32.totalorder %v9270_v24, 168  ;;  %v9387_v15 = vmov 0  ;;  %v3490_v36 = vld [vmem:[#allocation7 + $0x60] sm:$0xff] }
 0x64c   : > { %3028 = vst.msk [vmem:[#allocation3 + $0x5] sm:$0x1] %vm9357_vm7, %v3023_v33  ;;  %vm9363_vm7 = vmand %vm8175_vm3, %vm8180_vm9  ;;  %v9368_v22 = vsel %vm8246_vm13, 4294967295, %v9367_v22  ;;  %vm8256_vm9 = vcmp.ge.s32.totalorder %v9270_v24, 40  ;;  %vm8261_vm3 = vcmp.lt.s32.totalorder %v9270_v24, 92  ;;  %v9389_v33 = vmov 0 }
 0x64d   : > { %3040 = vst.msk [vmem:[#allocation3 + $0x5] sm:$0x3] %vm9358_vm10, %v3035_v41  ;;  %vm8241_vm10 = vcmp.ge.s32.totalorder %v9270_v24, 116  ;;  %v9372_v39 = vsel %vm8261_vm3, 4294967295, %v9371_v39  ;;  %vm9373_vm12 = vmand %vm8223_vm5, %vm8228_vm11  ;;  %v3454_v62 = vld [vmem:[#allocation2 + $0x45] sm:$0x1] }
 0x64e   : > { %3049 = vst.msk [vmem:[#allocation3 + $0x6] sm:$0x1] %vm9363_vm7, %v7982_v6  ;;  %v9366_v18 = vsel %vm8241_vm10, 4294967295, %v9365_v18  ;;  %v9369_v6 = vmov 0  ;;  %vm9033_vm7 = vmand %vm8241_vm10, %vm8246_vm13  ;;  %vm8380_vm10 = vcmp.ge.s32.totalorder %v9270_v24, 44 }
 0x64f   : > { %3406 = vrot.lane.b32.xlu1 %v3404_v1, %s9364_s21  ;;  %3428 = vrot.lane.b32.xlu2 %v3426_v57, %s5717_s16  ;;  %v9370_v6 = vsel %vm8256_vm9, 4294967295, %v9369_v6  ;;  %vm9032_vm4 = vmand %vm8256_vm9, %vm8261_vm3  ;;  %vm8314_vm9 = vcmp.ge.s32.totalorder %v9270_v24, 16  ;;  %v3446_v1 = vld [vmem:[#allocation2 + $0x44] sm:$0x1]  ;;  %s9404_s16 = smov 76  }
 0x650   : > { %3386 = vrot.lane.b32.xlu0 %v3384_v14, %s5743_s28  ;;  %s9375_s28 = smov 104  }
 0x651   : > { %v3062_v9 = vpop.permute.xlu1 %3061  ;;  %v3223_v52 = vpop.permute.xlu2 %3222 }
 0x652   : > { %v3063_v25 = vrot.slane %v3062_v9, 7  ;;  %v3053_v54 = vpop.permute.xlu0 %3052  ;;  %v3224_v42 = vrot.slane %v3223_v52, 7 }
 0x653   : > { %3058 = vst.msk [vmem:[#allocation3 + $0x6] sm:$0x1] %vm9373_vm12, %v3053_v54  ;;  %vm8298_vm12 = vcmp.lt.s32.totalorder %v9270_v24, 144  ;;  %v9395_v54 = vmov 0 }
 0x654   : > { %v3065_v40 = vsel %vm9374_vm0, %v3063_v25, %v3062_v9  ;;  %vm8293_vm0 = vcmp.ge.s32.totalorder %v9270_v24, 92  ;;  %v9379_v38 = vsel %vm8298_vm12, 4294967295, %v9378_v38  ;;  %v9393_v25 = vmov 0 }
 0x655   : > { %3070 = vst.msk [vmem:[#allocation3 + $0x6] sm:$0x3] %vm9033_vm7, %v3065_v40  ;;  %v9377_v55 = vsel %vm8293_vm0, 4294967295, %v9376_v55  ;;  %vm9380_vm7 = vcmask 850944   ;;  %vm9040_vm3 = vmand %vm8293_vm0, %vm8298_vm12  ;;  %vm8344_vm12 = vcmp.lt.s32.totalorder %v9270_v24, 172  ;;  %vm9045_vm0 = vcmask 982016  }
 0x656   : > { %3079 = vst.msk [vmem:[#allocation3 + $0x7] sm:$0x1] %vm9032_vm4, %v8040_v17  ;;  %vm9037_vm4 = vcmask 752640   ;;  %v3225_v43 = vsel %vm9380_vm7, %v3224_v42, %v3223_v52  ;;  %vm8319_vm7 = vcmp.lt.s32.totalorder %v9270_v24, 68  ;;  %v9392_v34 = vsel %vm8344_vm12, 4294967295, %v9391_v34 }
 0x657   : > { %3434 = vrot.lane.b32.xlu1 %v3432_v31, %s9375_s28  ;;  %3442 = vrot.lane.b32.xlu2 %v3440_v29, %s5715_s26  ;;  %v9384_v48 = vsel %vm8319_vm7, 4294967295, %v9383_v48  ;;  %v9394_v25 = vsel %vm8380_vm10, 4294967295, %v9393_v25  ;;  %v9400_v42 = vmov 0  ;;  %s9403_s26 = smov 56  }
 0x658   : > { %3400 = vrot.lane.b32.xlu0 %v3398_v50, %s5744_s13  ;;  %v3724_v50 = vld [vmem:[#allocation7 + $0x7b0] sm:$0xff] }
 0x659   : > { %v3083_v17 = vpop.permute.xlu1 %3082  ;;  %v3217_v23 = vpop.permute.xlu2 %3216 }
 0x65a   : > { %v3084_v49 = vrot.slane %v3083_v17, 7  ;;  %v3113_v44 = vpop.permute.xlu0 %3112  ;;  %3219 = vst.msk [vmem:[#allocation3 + $0xd] sm:$0x1] %vm7953_vm6, %v3217_v23  ;;  %vm8339_vm6 = vcmp.ge.s32.totalorder %v9270_v24, 120  ;;  %v3729_v23 = vld [vmem:[#allocation7 + $0x7d8] sm:$0xff] }
 0x65b   : > { %3227 = vst.msk [vmem:[#allocation3 + $0xd] sm:$0x3] %vm7961_vm15, %v3225_v43  ;;  %vm8329_vm15 = vcmp.ge.s32.totalorder %v9270_v24, 68  ;;  %v9390_v33 = vsel %vm8339_vm6, 4294967295, %v9389_v33  ;;  %v3114_v41 = vrot.slane %v3113_v44, 7 }
 0x65c   : > { %v3086_v12 = vsel %vm9037_vm4, %v3084_v49, %v3083_v17  ;;  %v9386_v63 = vsel %vm8329_vm15, 4294967295, %v9385_v63  ;;  %vm8334_vm4 = vcmp.lt.s32.totalorder %v9270_v24, 120  ;;  %v3726_v17 = vld [vmem:[#allocation7 + $0x7c0] sm:$0xff]  ;;  %v3412_v43 = vld [vmem:[#allocation2 + $0x3e] sm:$0x1] }
 0x65d   : > { %3091 = vst.msk [vmem:[#allocation3 + $0x7] sm:$0x3] %vm9040_vm3, %v3086_v12  ;;  %v9388_v15 = vsel %vm8334_vm4, 4294967295, %v9387_v15  ;;  %vm9047_vm3 = vmand %vm8314_vm9, %vm8319_vm7  ;;  %v3116_v9 = vsel %vm9045_vm0, %v3114_v41, %v3113_v44  ;;  %vm8385_vm7 = vcmp.lt.s32.totalorder %v9270_v24, 96  ;;  %v3418_v49 = vld [vmem:[#allocation2 + $0x3f] sm:$0x1] }
 0x65e   : > { %vm9046_vm13 = vmand %vm8329_vm15, %vm8334_vm4  ;;  %v9396_v54 = vsel %vm8385_vm7, 4294967295, %v9395_v54  ;;  %v3460_v41 = vld [vmem:[#allocation2 + $0x46] sm:$0x1]  ;;  %vm8500_vm4 = vcmp.ge.s32.totalorder %v9270_v24, 48  ;;  %vm9434_vm15 = vcmask 818176  }
 0x65f   : > { %3468 = vrot.lane.b32.xlu1 %v3466_v56, %s5720_s10  ;;  %3456 = vrot.lane.b32.xlu2 %v3454_v62, %s5721_s19  ;;  %vm9397_vm0 = vmand %vm8339_vm6, %vm8344_vm12  ;;  %v3731_v56 = vld [vmem:[#allocation7 + $0x7e8] sm:$0xff]  ;;  %s4499_s10 = scalar_lea.hbm %s8850_s11, %s5830_s24  ;;  %s464_s19 = scalar_lea.vmem [#allocation13], %s5924_s23 }
 0x660   : > { %3448 = vrot.lane.b32.xlu0 %v3446_v1, %s5719_s9  ;;  %vm9051_vm12 = vmand %vm8380_vm10, %vm8385_vm7  ;;  %s4501_s7 = sshll.u32 %s464_s19, 4  ;;  %s4503_s14 = sshll.u32 %s4499_s10, 4  ;;  %s4502_s7 = int_to_ptr.vmem [resolvable:$true] %s4501_s7  ;;  %s4504_s14 = int_to_ptr.hbm [resolvable:$true] %s4503_s14 }
 0x661   : > { %v3095_v57 = vpop.permute.xlu1 %3094  ;;  %v8359_v13 = vpop.permute.xlu2 %3256  ;;  %s5638_s13 = sshra.s32 %s4504_s14, 4  ;;  %s5639_s13 = int_to_ptr.hbm [resolvable:$true] %s5638_s13 }
 0x662   : > { %3100 = vst.msk [vmem:[#allocation3 + $0x8] sm:$0x1] %vm9047_vm3, %v3095_v57  ;;  %v3134_v14 = vpop.permute.xlu0 %3133  ;;  %vm8403_vm3 = vcmp.lt.s32.totalorder %v9270_v24, 148  ;;  %v3694_v57 = vld [vmem:[#allocation7 + $0x6c0] sm:$0xff]  ;;  %s5640_s29 = scalar_lea.hbm %s5639_s13, 1  ;;  %p5645_p12 = scmp.lt.s32.totalorder %s5639_s13, %s8850_s11 }
 0x663   : > { %3109 = vst.msk [vmem:[#allocation3 + $0x8] sm:$0x1] %vm9046_vm13, %v8099_v16  ;;  %vm8395_vm13 = vcmp.ge.s32.totalorder %v9270_v24, 96  ;;  %v9398_v16 = vmov 0  ;;  %v9401_v42 = vsel %vm8403_vm3, 4294967295, %v9400_v42  ;;  %v3135_v29 = vrot.slane %v3134_v14, 7  ;;  %p5641_p1 = scmp.ne.s32.totalorder %s5639_s13, %s5640_s29  ;;  %p5646_p7 = scmp.lt.s32.totalorder %s5644_s30, %s5640_s29 }
 0x664   : > { %v8377_v52 = vld [vmem:[#allocation3] sm:$0xff]  ;;  %3121 = vst.msk [vmem:[#allocation3 + $0x8] sm:$0x3] %vm9397_vm0, %v3116_v9  ;;  %v9399_v16 = vsel %vm8395_vm13, 4294967295, %v9398_v16  ;;  %vm9050_vm0 = vcmask 785408   ;;  %vm9052_vm6 = vmand %vm8395_vm13, %vm8403_vm3  ;;  %v3696_v9 = vld [vmem:[#allocation7 + $0x6d0] sm:$0xff] }
 0x665   : > { %v3753_v37 = vperm.slane %v8377_v52, 0  ;;  %v3754_v40 = vperm.slane %v8377_v52, 1  ;;  %v3756_v31 = vperm.slane %v8377_v52, 3  ;;  %9402 = vst [vmem:[#allocation37_spill] sm:$0xff] %v9401_v42  ;;  %v3758_v27 = vperm.slane %v8377_v52, 5  ;;  %v3516_v42 = vld [vmem:[#allocation7 + $0x130] sm:$0xff]  ;;  %p5642_p3 = pnand %p5641_p1, %p5893_p4  ;;  %p5647_p8 = por %p5646_p7, %p5645_p12 }
 0x666   : > { %v3137_v62 = vsel %vm9050_vm0, %v3135_v29, %v3134_v14  ;;  %vm8433_vm0 = vcmp.ge.s32.totalorder %v9270_v24, 20  ;;  %v9405_v14 = vmov 0  ;;  %v3757_v29 = vperm.slane %v8377_v52, 4 }
 0x667   : > { %3858 = vmatmul.f32.vlgmr.msra.gmra.mxu2 %v3753_v37  ;;  %3878 = vmatmul.f32.vlgmr.msra.gmra.mxu3 %v3754_v40  ;;  %v3699_v37 = vld [vmem:[#allocation7 + $0x6e8] sm:$0xff]  ;;  %v9406_v14 = vsel %vm8433_vm0, 4294967295, %v9405_v14  ;;  %v9408_v40 = vmov 0  ;;  %vm8459_vm3 = vcmp.ge.s32.totalorder %v9270_v24, 72  ;;  %vm8464_vm13 = vcmp.lt.s32.totalorder %v9270_v24, 124  ;;  %p5643_p5 = pneg %p5642_p3 }
 0x668   : > { %3918 = vmatmul.f32.vlgmr.msrb.gmra.mxu0 %v3756_v31  ;;  %3958 = vmatmul.f32.vlgmr.msra.gmra.mxu1 %v3758_v27  ;;  %9407 = vst [vmem:[#allocation39_spill] sm:$0xff] %v9406_v14  ;;  %v3755_v31 = vperm.slane %v8377_v52, 2  ;;  %v3701_v27 = vld [vmem:[#allocation7 + $0x6f8] sm:$0xff]  ;;  %vm9067_vm7 = vmand %vm8459_vm3, %vm8464_vm13  ;;  %v3579_v14 = vld [vmem:[#allocation7 + $0x328] sm:$0xff] }
 0x669   : > { %3969 = vmatpush.xpose.msra.mxu2 %v3724_v50  ;;  %4009 = vmatpush.xpose.msra.mxu3 %v3726_v17  ;;  %v3125_v44 = vpop.permute.xlu1 %3124  ;;  %v8416_v12 = vpop.permute.xlu2 %3250  ;;  %v3664_v50 = vld [vmem:[#allocation7 + $0x5d0] sm:$0xff]  ;;  %v3760_v17 = vperm.slane %v8377_v52, 7  ;;  %p5648_p9 = pnand %p5647_p8, %p5643_p5 }
 0x66a   : > { %4069 = vmatpush.xpose.msrb.mxu0 %v3729_v23  ;;  %3414 = vrot.lane.b32.xlu0 %v3412_v43, %s5745_s8  ;;  %3130 = vst.msk [vmem:[#allocation3 + $0x9] sm:$0x1] %vm9051_vm12, %v3125_v44  ;;  %v3164_v1 = vpop.permute.xlu0 %3163  ;;  %vm8438_vm12 = vcmp.lt.s32.totalorder %v9270_v24, 72  ;;  %v3666_v23 = vld [vmem:[#allocation7 + $0x5e0] sm:$0xff]  ;;  %v3669_v43 = vld [vmem:[#allocation7 + $0x5f8] sm:$0xff] }
 0x66b   : > { %3462 = vrot.lane.b32.xlu1 %v3460_v41, %s9403_s26  ;;  %3420 = vrot.lane.b32.xlu2 %v3418_v49, %s9404_s16  ;;  %3142 = vst.msk [vmem:[#allocation3 + $0x9] sm:$0x3] %vm9052_vm6, %v3137_v62  ;;  %v9409_v40 = vsel %vm8438_vm12, 4294967295, %v9408_v40  ;;  %vm9055_vm6 = vmand %vm8433_vm0, %vm8438_vm12  ;;  %v3634_v41 = vld [vmem:[#allocation7 + $0x4e0] sm:$0xff]  ;;  %vm8474_vm12 = vcmp.lt.s32.totalorder %v9270_v24, 176  ;;  %vm9064_vm0 = vcmask 1014784  }
 0x66c   : > { %9410 = vst [vmem:[#allocation41_spill] sm:$0xff] %v9409_v40  ;;  %4109 = vmatpush.xpose.msra.mxu1 %v3731_v56  ;;  %v3671_v56 = vld [vmem:[#allocation7 + $0x608] sm:$0xff]  ;;  %v3576_v40 = vld [vmem:[#allocation7 + $0x310] sm:$0xff] }
 0x66d   : > { %3970 = vmatpush.xpose.msra.mxu2 %v3694_v57  ;;  %4010 = vmatpush.xpose.msra.mxu3 %v3696_v9  ;;  %v3636_v57 = vld [vmem:[#allocation7 + $0x4f0] sm:$0xff]  ;;  %v3639_v9 = vld [vmem:[#allocation7 + $0x508] sm:$0xff] }
 0x66e   : > { %4070 = vmatpush.xpose.msrb.mxu0 %v3699_v37  ;;  %v9411_v37 = vmov 0 }
 0x66f   : > { %3898 = vmatmul.f32.vlgmr.msrb.gmra.mxu2 %v3755_v31  ;;  %3938 = vmatmul.f32.vlgmr.msrb.gmra.mxu3 %v3757_v29  ;;  %v9412_v37 = vsel %vm8459_vm3, 4294967295, %v9411_v37  ;;  %v9414_v31 = vmov 0  ;;  %v3641_v29 = vld [vmem:[#allocation7 + $0x518] sm:$0xff]  ;;  %vm9433_vm3 = vnez %v9287_v47 }
 0x670   : > { %3998 = vmatmul.f32.vlgmr.msra.gmra.mxu0 %v3760_v17  ;;  %4110 = vmatpush.xpose.msra.mxu1 %v3701_v27  ;;  %9413 = vst [vmem:[#allocation53_spill] sm:$0xff] %v9412_v37  ;;  %v9415_v31 = vsel %vm8464_vm13, 4294967295, %v9414_v31  ;;  %v9417_v27 = vmov 0  ;;  %v3165_v17 = vrot.slane %v3164_v1, 7  ;;  %v3514_v37 = vld [vmem:[#allocation7 + $0x120] sm:$0xff]  ;;  %vm9432_vm13 = vcmask 654336  }
 0x671   : > { %3971 = vmatpush.xpose.msra.mxu2 %v3664_v50  ;;  %4011 = vmatpush.xpose.msra.mxu3 %v3666_v23  ;;  %v3146_v49 = vpop.permute.xlu1 %3145  ;;  %v8449_v44 = vpop.permute.xlu2 %3270  ;;  %9416 = vst [vmem:[#allocation44_spill] sm:$0xff] %v9415_v31  ;;  %v9420_v50 = vmov 0  ;;  %v3604_v23 = vld [vmem:[#allocation7 + $0x3f0] sm:$0xff] }
 0x672   : > { %4071 = vmatpush.xpose.msrb.mxu0 %v3669_v43  ;;  %3151 = vst.msk [vmem:[#allocation3 + $0xa] sm:$0x1] %vm9055_vm6, %v3146_v49  ;;  %v8456_v62 = vpop.permute.xlu0 %3205  ;;  %vm8469_vm6 = vcmp.ge.s32.totalorder %v9270_v24, 124  ;;  %v9421_v50 = vsel %vm8474_vm12, 4294967295, %v9420_v50  ;;  %v3606_v43 = vld [vmem:[#allocation7 + $0x400] sm:$0xff]  ;;  %v3609_v49 = vld [vmem:[#allocation7 + $0x418] sm:$0xff] }
 0x673   : > { %v9418_v27 = vsel %vm8469_vm6, 4294967295, %v9417_v27  ;;  %9422 = vst [vmem:[#allocation54_spill] sm:$0xff] %v9421_v50  ;;  %vm9066_vm10 = vmand %vm8469_vm6, %vm8474_vm12  ;;  %v3549_v50 = vld [vmem:[#allocation7 + $0x238] sm:$0xff]  ;;  %vm8519_vm12 = vcmp.lt.s32.totalorder %v9270_v24, 152 }
 0x674   : > { %4111 = vmatpush.xpose.msra.mxu1 %v3671_v56  ;;  %9419 = vst [vmem:[#allocation47_spill] sm:$0xff] %v9418_v27  ;;  %v3551_v27 = vld [vmem:[#allocation7 + $0x248] sm:$0xff] }
 0x675   : > { %3972 = vmatpush.xpose.msra.mxu2 %v3634_v41  ;;  %4012 = vmatpush.xpose.msra.mxu3 %v3636_v57  ;;  %v3611_v57 = vld [vmem:[#allocation7 + $0x428] sm:$0xff] }
 0x676   : > { %4072 = vmatpush.xpose.msrb.mxu0 %v3639_v9  ;;  %v3167_v9 = vsel %vm9064_vm0, %v3165_v17, %v3164_v1  ;;  %v9423_v1 = vmov 0  ;;  %vm8505_vm0 = vcmp.lt.s32.totalorder %v9270_v24, 100  ;;  %v9425_v17 = vmov 0 }
 0x677   : > { %v9424_v1 = vsel %vm8500_vm4, 4294967295, %v9423_v1  ;;  %v9426_v17 = vsel %vm8505_vm0, 4294967295, %v9425_v17 }
 0x678   : > { %4112 = vmatpush.xpose.msra.mxu1 %v3641_v29 }
 0x679   : > { %3973 = vmatpush.xpose.msra.mxu2 %v3604_v23  ;;  %4013 = vmatpush.xpose.msra.mxu3 %v3606_v43  ;;  %v3155_v56 = vpop.permute.xlu1 %3154  ;;  %v8486_v41 = vpop.permute.xlu2 %3278  ;;  %v3581_v23 = vld [vmem:[#allocation7 + $0x338] sm:$0xff]  ;;  %v3544_v43 = vld [vmem:[#allocation7 + $0x210] sm:$0xff] }
 0x67a   : > { %4073 = vmatpush.xpose.msrb.mxu0 %v3609_v49  ;;  %3160 = vst.msk [vmem:[#allocation3 + $0xa] sm:$0x1] %vm9067_vm7, %v3155_v56  ;;  %v3237_v29 = vpop.permute.xlu0 %3236  ;;  %v3546_v49 = vld [vmem:[#allocation7 + $0x220] sm:$0xff]  ;;  %vm8514_vm7 = vcmp.ge.s32.totalorder %v9270_v24, 100 }
 0x67b   : > { %3172 = vst.msk [vmem:[#allocation3 + $0xa] sm:$0x3] %vm9066_vm10, %v3167_v9  ;;  %v3238_v56 = vrot.slane %v3237_v29, 7  ;;  %vm9078_vm10 = vmand %vm8500_vm4, %vm8505_vm0  ;;  %v9427_v9 = vmov 0  ;;  %vm9435_vm0 = vnez %v9293_v20  ;;  %vm8548_vm4 = vcmp.lt.s32.totalorder %v9270_v24, 76  ;;  %v3491_v20 = vld [vmem:[#allocation7 + $0x68] sm:$0xff] }
 0x67c   : > { %4113 = vmatpush.xpose.msra.mxu1 %v3611_v57  ;;  %v9428_v9 = vsel %vm8514_vm7, 4294967295, %v9427_v9  ;;  %vm9083_vm6 = vmand %vm8514_vm7, %vm8519_vm12 }
 0x67d   : > { %3974 = vmatpush.xpose.msra.mxu2 %v3574_v21  ;;  %4014 = vmatpush.xpose.msra.mxu3 %v3576_v40  ;;  %v9429_v21 = vmov 0 }
 0x67e   : > { %4074 = vmatpush.xpose.msrb.mxu0 %v3579_v14  ;;  %v9430_v21 = vsel %vm8519_vm12, 4294967295, %v9429_v21  ;;  %v3186_v14 = vrot.slane %v8188_v32, 7  ;;  %vm9456_vm12 = vnez %v9327_v10  ;;  %v3613_v10 = vld [vmem:[#allocation7 + $0x438] sm:$0xff] }
 0x67f   : > { %9431 = vst [vmem:[#allocation55_spill] sm:$0xff] %v9430_v21  ;;  %v3759_v21 = vperm.slane %v8377_v52, 6 }
 0x680   : > { %4114 = vmatpush.xpose.msra.mxu1 %v3581_v23  ;;  %v3239_v23 = vsel %vm9432_vm13, %v3238_v56, %v3237_v29  ;;  %vm8553_vm13 = vcmp.ge.s32.totalorder %v9270_v24, 76  ;;  %v3521_v29 = vld [vmem:[#allocation7 + $0x158] sm:$0xff]  ;;  %v3728_v56 = vld [vmem:[#allocation7 + $0x7d0] sm:$0xff] }
 0x681   : > { %3975 = vmatpush.xpose.msra.mxu2 %v3544_v43  ;;  %4015 = vmatpush.xpose.msra.mxu3 %v3546_v49  ;;  %v3176_v40 = vpop.permute.xlu1 %3175  ;;  %v8524_v57 = vpop.permute.xlu2 %3298  ;;  %v3188_v43 = vsel %vm9434_vm15, %v3186_v14, %v8188_v32  ;;  %v9436_v49 = vmov 0  ;;  %vm8558_vm15 = vcmp.lt.s32.totalorder %v9270_v24, 128  ;;  %v9442_v32 = vmov 0  ;;  %v3733_v14 = vld [vmem:[#allocation7 + $0x7f8] sm:$0xff] }
 0x682   : > { %4075 = vmatpush.xpose.msrb.mxu0 %v3549_v50  ;;  %3181 = vst.msk [vmem:[#allocation3 + $0xb] sm:$0x1] %vm9078_vm10, %v3176_v40  ;;  %v3231_v31 = vpop.permute.xlu0 %3230  ;;  %v3519_v50 = vld [vmem:[#allocation7 + $0x148] sm:$0xff]  ;;  %vm8543_vm10 = vcmp.ge.s32.totalorder %v9270_v24, 24  ;;  %v9438_v40 = vmov 0  ;;  %v9443_v32 = vsel %vm8558_vm15, 4294967295, %v9442_v32 }
 0x683   : > { %3233 = vst.msk [vmem:[#allocation3 + $0xe] sm:$0x1] %vm9433_vm3, %v3231_v31  ;;  %v9437_v49 = vsel %vm8543_vm10, 4294967295, %v9436_v49  ;;  %v9439_v40 = vsel %vm8548_vm4, 4294967295, %v9438_v40  ;;  %v9440_v31 = vmov 0  ;;  %v3730_v24 = vld [vmem:[#allocation7 + $0x7e0] sm:$0xff]  ;;  %vm9087_vm3 = vmand %vm8553_vm13, %vm8558_vm15  ;;  %vm9452_vm15 = vnez %v9321_v2 }
 0x684   : > { %3241 = vst.msk [vmem:[#allocation3 + $0xe] sm:$0x3] %vm9435_vm0, %v3239_v23  ;;  %4115 = vmatpush.xpose.msra.mxu1 %v3551_v27  ;;  %v9441_v31 = vsel %vm8553_vm13, 4294967295, %v9440_v31  ;;  %v3489_v27 = vld [vmem:[#allocation7 + $0x58] sm:$0xff]  ;;  %vm9084_vm0 = vmand %vm8543_vm10, %vm8548_vm4  ;;  %v3258_v23 = vrot.slane %v8359_v13, 7  ;;  %vm9446_vm4 = vnez %v9313_v28  ;;  %vm9447_vm10 = vnez %v9315_v8 }
 0x685   : > { %3976 = vmatpush.xpose.msra.mxu2 %v3514_v37  ;;  %4016 = vmatpush.xpose.msra.mxu3 %v3516_v42  ;;  %3193 = vst.msk [vmem:[#allocation3 + $0xb] sm:$0x3] %vm9083_vm6, %v3188_v43  ;;  %v3484_v37 = vld [vmem:[#allocation7 + $0x30] sm:$0xff]  ;;  %v3486_v42 = vld [vmem:[#allocation7 + $0x40] sm:$0xff]  ;;  %vm9444_vm6 = vnez %v9310_v7  ;;  %vm9453_vm13 = vnez %v9323_v30 }
 0x686   : > { %4076 = vmatpush.xpose.msrb.mxu0 %v3519_v50 }
 0x688   : > { %4116 = vmatpush.xpose.msra.mxu1 %v3521_v29  ;;  %v3698_v29 = vld [vmem:[#allocation7 + $0x6e0] sm:$0xff] }
 0x689   : > { %3977 = vmatpush.xpose.msra.mxu2 %v3484_v37  ;;  %4017 = vmatpush.xpose.msra.mxu3 %v3486_v42  ;;  %v3197_v50 = vpop.permute.xlu1 %3196  ;;  %v8576_v43 = vpop.permute.xlu2 %3318  ;;  %v3700_v37 = vld [vmem:[#allocation7 + $0x6f0] sm:$0xff]  ;;  %v3703_v42 = vld [vmem:[#allocation7 + $0x708] sm:$0xff] }
 0x68a   : > { %4077 = vmatpush.xpose.msrb.mxu0 %v3489_v27  ;;  %3202 = vst.msk [vmem:[#allocation3 + $0xc] sm:$0x1] %vm9084_vm0, %v3197_v50  ;;  %v3245_v47 = vpop.permute.xlu0 %3244  ;;  %vm9445_vm0 = vcmask 883712   ;;  %v3673_v27 = vld [vmem:[#allocation7 + $0x618] sm:$0xff] }
 0x68b   : > { %3211 = vst.msk [vmem:[#allocation3 + $0xc] sm:$0x1] %vm9087_vm3, %v8456_v62  ;;  %v3259_v52 = vsel %vm9445_vm0, %v3258_v23, %v8359_v13  ;;  %v3272_v62 = vrot.slane %v8449_v44, 7  ;;  %vm9448_vm0 = vcmask 687104   ;;  %vm9449_vm3 = vnez %v9317_v26  ;;  %v3643_v23 = vld [vmem:[#allocation7 + $0x528] sm:$0xff] }
 0x68c   : > { %3247 = vst.msk [vmem:[#allocation3 + $0xf] sm:$0x1] %vm9444_vm6, %v3245_v47  ;;  %3978 = vmatmul.f32.vlgmr.msra.gmra.mxu2 %v3759_v21  ;;  %4117 = vmatpush.xpose.msra.mxu1 %v3491_v20  ;;  %v3668_v47 = vld [vmem:[#allocation7 + $0x5f0] sm:$0xff]  ;;  %v3670_v21 = vld [vmem:[#allocation7 + $0x600] sm:$0xff]  ;;  %vm9454_vm6 = vmand %vm9452_vm15, %vm9453_vm13 }
 0x68d   : > { %4049 = vmatpush.xpose.msrb.mxu2 %v3728_v56  ;;  %4089 = vmatpush.xpose.msrb.mxu3 %v3730_v24  ;;  %3253 = vst.msk [vmem:[#allocation3 + $0xf] sm:$0x1] %vm9446_vm4, %v8416_v12  ;;  %v3273_v24 = vsel %vm9448_vm0, %v3272_v62, %v8449_v44  ;;  %v3638_v12 = vld [vmem:[#allocation7 + $0x500] sm:$0xff]  ;;  %vm9455_vm0 = vnez %v9325_v5  ;;  %v3735_v44 = vld [vmem:[#allocation7 + $0x808] sm:$0xff]  ;;  %v3705_v62 = vld [vmem:[#allocation7 + $0x718] sm:$0xff] }
 0x68e   : > { %4149 = vmatpush.xpose.msra.mxu0 %v3733_v14  ;;  %3261 = vst.msk [vmem:[#allocation3 + $0xf] sm:$0x3] %vm9447_vm10, %v3259_v52  ;;  %vm9450_vm10 = vnez %v9319_v60  ;;  %v3640_v14 = vld [vmem:[#allocation7 + $0x510] sm:$0xff]  ;;  %vm9457_vm7 = vmand %vm9455_vm0, %vm9456_vm12  ;;  %v3610_v5 = vld [vmem:[#allocation7 + $0x420] sm:$0xff]  ;;  %vm9462_vm12 = vnez %v9342_v46 }
 0x68f   : > { %vm9451_vm4 = vmand %vm9449_vm3, %vm9450_vm10  ;;  %vm9460_vm3 = vcmask 719872   ;;  %v3553_v46 = vld [vmem:[#allocation7 + $0x258] sm:$0xff] }
 0x690   : > { %vm9461_vm10 = vmand %vm8132_vm1, %vm8137_vm14  ;;  %vm9468_vm14 = vnez %v9350_v45  ;;  %vm9469_vm1 = vnez %v9352_v53  ;;  %v3615_v53 = vld [vmem:[#allocation7 + $0x448] sm:$0xff] }
 0x691   : > { %4050 = vmatpush.xpose.msrb.mxu2 %v3698_v29  ;;  %4090 = vmatpush.xpose.msrb.mxu3 %v3700_v37  ;;  %v3291_v56 = vpop.permute.xlu1 %3290  ;;  %v8600_v20 = vpop.permute.xlu2 %3358  ;;  %v3608_v29 = vld [vmem:[#allocation7 + $0x410] sm:$0xff]  ;;  %vm9470_vm0 = vmand %vm9468_vm14, %vm9469_vm1  ;;  %vm9484_vm1 = vnez %v9384_v48 }
 0x692   : > { %4150 = vmatpush.xpose.msra.mxu0 %v3703_v42  ;;  %v3265_v13 = vpop.permute.xlu0 %3264  ;;  %v3292_v50 = vrot.slane %v3291_v56, 7  ;;  %v3644_v48 = vld [vmem:[#allocation7 + $0x530] sm:$0xff] }
 0x693   : > { %3267 = vst.msk [vmem:[#allocation3 + $0x10] sm:$0x1] %vm9451_vm4, %v3265_v13  ;;  %vm9459_vm4 = vmand %vm8122_vm2, %vm8127_vm8  ;;  %v3580_v13 = vld [vmem:[#allocation7 + $0x330] sm:$0xff]  ;;  %vm9465_vm2 = vnez %v9346_v19  ;;  %vm9466_vm8 = vnez %v9348_v35  ;;  %v3645_v35 = vld [vmem:[#allocation7 + $0x538] sm:$0xff] }
 0x694   : > { %3275 = vst.msk [vmem:[#allocation3 + $0x10] sm:$0x3] %vm9454_vm6, %v3273_v24  ;;  %vm9458_vm6 = vcmask 916480   ;;  %v3583_v24 = vld [vmem:[#allocation7 + $0x348] sm:$0xff]  ;;  %vm9467_vm15 = vmand %vm9465_vm2, %vm9466_vm8  ;;  %vm9480_vm2 = vcmask 752640   ;;  %vm9481_vm8 = vnez %v9377_v55 }
 0x695   : > { %4051 = vmatpush.xpose.msrb.mxu2 %v3668_v47  ;;  %4091 = vmatpush.xpose.msrb.mxu3 %v3670_v21  ;;  %3281 = vst.msk [vmem:[#allocation3 + $0x11] sm:$0x1] %vm9457_vm7, %v8486_v41  ;;  %v8620_v26 = vld [vmem:[#allocation3 + $0x8] sm:$0xff]  ;;  %v3293_v47 = vsel %vm9458_vm6, %v3292_v50, %v3291_v56  ;;  %vm9463_vm7 = vnez %v9344_v51  ;;  %vm9471_vm6 = vmand %vm8223_vm5, %vm8228_vm11  ;;  %v3737_v50 = vld [vmem:[#allocation7 + $0x818] sm:$0xff]  ;;  %vm9476_vm5 = vnez %v9370_v6  ;;  %vm9477_vm11 = vnez %v9372_v39 }
 0x696   : > { %4151 = vmatpush.xpose.msra.mxu0 %v3673_v27  ;;  %v3761_v60 = vperm.slane %v8620_v26, 0  ;;  %v3762_v2 = vperm.slane %v8620_v26, 1  ;;  %v3764_v30 = vperm.slane %v8620_v26, 3  ;;  %v3578_v21 = vld [vmem:[#allocation7 + $0x320] sm:$0xff]  ;;  %vm9464_vm13 = vmand %vm9462_vm12, %vm9463_vm7  ;;  %v3766_v0 = vperm.slane %v8620_v26, 5 }
 0x697   : > { %vm9478_vm7 = vmand %vm9476_vm5, %vm9477_vm11  ;;  %v3768_v39 = vperm.slane %v8620_v26, 7  ;;  %vm9491_vm5 = vnez %v9392_v34 }
 0x698   : > { %4018 = vmatmul.f32.vlgmr.msra.gmra.mxu3 %v3761_v60  ;;  %4038 = vmatmul.f32.vlgmr.msrb.gmra.mxu1 %v3762_v2  ;;  %v3732_v60 = vld [vmem:[#allocation7 + $0x7f0] sm:$0xff]  ;;  %v3734_v2 = vld [vmem:[#allocation7 + $0x800] sm:$0xff] }
 0x699   : > { %4052 = vmatpush.xpose.msrb.mxu2 %v3638_v12  ;;  %4092 = vmatpush.xpose.msrb.mxu3 %v3640_v14  ;;  %v3305_v41 = vpop.permute.xlu1 %3304  ;;  %v8625_v37 = vpop.permute.xlu2 %3372  ;;  %v3518_v12 = vld [vmem:[#allocation7 + $0x140] sm:$0xff]  ;;  %v3520_v14 = vld [vmem:[#allocation7 + $0x150] sm:$0xff] }
 0x69a   : > { %4152 = vmatpush.xpose.msra.mxu0 %v3643_v23  ;;  %4189 = vmatpush.xpose.msrb.mxu1 %v3735_v44  ;;  %v3306_v42 = vrot.slane %v3305_v41, 7  ;;  %v3285_v52 = vpop.permute.xlu0 %3284  ;;  %v3523_v23 = vld [vmem:[#allocation7 + $0x168] sm:$0xff] }
 0x69b   : > { %4078 = vmatmul.f32.vlgmr.msrb.gmra.mxu0 %v3764_v30  ;;  %3287 = vst.msk [vmem:[#allocation3 + $0x11] sm:$0x1] %vm9459_vm4, %v3285_v52  ;;  %vm9472_vm4 = vcmask 949248   ;;  %v3555_v52 = vld [vmem:[#allocation7 + $0x268] sm:$0xff] }
 0x69c   : > { %v3307_v27 = vsel %vm9460_vm3, %v3306_v42, %v3305_v41  ;;  %3295 = vst.msk [vmem:[#allocation3 + $0x11] sm:$0x3] %vm9461_vm10, %v3293_v47  ;;  %vm9473_vm3 = vnez %v9366_v18  ;;  %vm9474_vm10 = vnez %v9368_v22  ;;  %v3585_v22 = vld [vmem:[#allocation7 + $0x358] sm:$0xff]  ;;  %v3702_v41 = vld [vmem:[#allocation7 + $0x700] sm:$0xff]  ;;  %v3704_v42 = vld [vmem:[#allocation7 + $0x710] sm:$0xff] }
 0x69d   : > { %4053 = vmatpush.xpose.msrb.mxu2 %v3608_v29  ;;  %4093 = vmatpush.xpose.msrb.mxu3 %v3610_v5  ;;  %3301 = vst.msk [vmem:[#allocation3 + $0x12] sm:$0x1] %vm9464_vm13, %v8524_v57  ;;  %vm9475_vm12 = vmand %vm9473_vm3, %vm9474_vm10  ;;  %vm9479_vm13 = vnez %v9282_v59  ;;  %v3763_v5 = vperm.slane %v8620_v26, 2  ;;  %v3707_v59 = vld [vmem:[#allocation7 + $0x728] sm:$0xff]  ;;  %v3672_v47 = vld [vmem:[#allocation7 + $0x610] sm:$0xff]  ;;  %vm9488_vm3 = vnez %v9388_v15 }
 0x69e   : > { %4153 = vmatpush.xpose.msra.mxu0 %v3613_v10  ;;  %4190 = vmatpush.xpose.msrb.mxu1 %v3705_v62  ;;  %3309 = vst.msk [vmem:[#allocation3 + $0x12] sm:$0x3] %vm9467_vm15, %v3307_v27  ;;  %v3765_v10 = vperm.slane %v8620_v26, 4  ;;  %vm9482_vm15 = vnez %v9379_v38  ;;  %v3360_v62 = vrot.slane %v8600_v20, 7  ;;  %v3614_v15 = vld [vmem:[#allocation7 + $0x440] sm:$0xff] }
 0x69f   : > { %vm9483_vm14 = vmand %vm9481_vm8, %vm9482_vm15  ;;  %vm9497_vm8 = vnez %v9399_v16  ;;  %v3552_v16 = vld [vmem:[#allocation7 + $0x250] sm:$0xff] }
 0x6a0   : > { %4118 = vmatmul.f32.vlgmr.msra.gmra.mxu1 %v3766_v0  ;;  %v3647_v0 = vld [vmem:[#allocation7 + $0x548] sm:$0xff] }
 0x6a1   : > { %4054 = vmatpush.xpose.msrb.mxu2 %v3578_v21  ;;  %4094 = vmatpush.xpose.msrb.mxu3 %v3580_v13  ;;  %v3313_v51 = vpop.permute.xlu1 %3312  ;;  %v8651_v57 = vpop.permute.xlu2 %3380  ;;  %v3674_v21 = vld [vmem:[#allocation7 + $0x620] sm:$0xff]  ;;  %v3677_v13 = vld [vmem:[#allocation7 + $0x638] sm:$0xff] }
 0x6a2   : > { %4154 = vmatpush.xpose.msra.mxu0 %v3583_v24  ;;  %4191 = vmatpush.xpose.msrb.mxu1 %v3675_v61  ;;  %3315 = vst.msk [vmem:[#allocation3 + $0x13] sm:$0x1] %vm9470_vm0, %v3313_v51  ;;  %v3325_v19 = vpop.permute.xlu0 %3324  ;;  %v3525_v24 = vld [vmem:[#allocation7 + $0x178] sm:$0xff]  ;;  %vm9485_vm0 = vmand %vm8314_vm9, %vm9484_vm1  ;;  %v3374_v61 = vrot.slane %v8625_v37, 7  ;;  %vm9493_vm9 = vcmask 785408  }
 0x6a3   : > { %3321 = vst.msk [vmem:[#allocation3 + $0x13] sm:$0x1] %vm9471_vm6, %v8576_v43  ;;  %v3326_v56 = vrot.slane %v3325_v19, 7  ;;  %v3493_v43 = vld [vmem:[#allocation7 + $0x78] sm:$0xff]  ;;  %vm9486_vm6 = vcmask 982016  }
 0x6a4   : > { %v3361_v38 = vsel %vm9486_vm6, %v3360_v62, %v8600_v20  ;;  %v3495_v20 = vld [vmem:[#allocation7 + $0x88] sm:$0xff]  ;;  %v3709_v51 = vld [vmem:[#allocation7 + $0x738] sm:$0xff] }
 0x6a5   : > { %4055 = vmatpush.xpose.msrb.mxu2 %v3548_v58  ;;  %4095 = vmatpush.xpose.msrb.mxu3 %v3550_v3  ;;  %v3327_v45 = vsel %vm9472_vm4, %v3326_v56, %v3325_v19  ;;  %vm9487_vm4 = vnez %v9386_v63  ;;  %v3739_v58 = vld [vmem:[#allocation7 + $0x828] sm:$0xff]  ;;  %v3612_v63 = vld [vmem:[#allocation7 + $0x430] sm:$0xff] }
 0x6a6   : > { %4155 = vmatpush.xpose.msra.mxu0 %v3553_v46  ;;  %4192 = vmatpush.xpose.msrb.mxu1 %v3645_v35  ;;  %3329 = vst.msk [vmem:[#allocation3 + $0x13] sm:$0x3] %vm9475_vm12, %v3327_v45  ;;  %vm9489_vm10 = vmand %vm9487_vm4, %vm9488_vm3  ;;  %vm9490_vm12 = vnez %v9390_v33  ;;  %v3617_v33 = vld [vmem:[#allocation7 + $0x458] sm:$0xff]  ;;  %v3375_v46 = vsel %vm9493_vm9, %v3374_v61, %v8625_v37  ;;  %v9498_v19 = vld [vmem:[#allocation37_spill] sm:$0xff]  ;;  %vm9506_vm4 = vcmask 1014784  }
 0x6a7   : > { %vm9492_vm11 = vmand %vm9490_vm12, %vm9491_vm5  ;;  %vm9499_vm15 = vnez %v9498_v19  ;;  %v9501_v35 = vld [vmem:[#allocation39_spill] sm:$0xff]  ;;  %v9503_v37 = vld [vmem:[#allocation41_spill] sm:$0xff] }
 0x6a8   : > { %vm9502_vm1 = vnez %v9501_v35  ;;  %v3587_v56 = vld [vmem:[#allocation7 + $0x368] sm:$0xff]  ;;  %v9531_v35 = vld [vmem:[#allocation35_spill] sm:$0xff] }
 0x6a9   : > { %4056 = vmatpush.xpose.msrb.mxu2 %v3518_v12  ;;  %4096 = vmatpush.xpose.msrb.mxu3 %v3520_v14  ;;  %v3333_v30 = vpop.permute.xlu1 %3332  ;;  %v3429_v44 = vpop.permute.xlu2 %3428  ;;  %v3679_v14 = vld [vmem:[#allocation7 + $0x648] sm:$0xff] }
 0x6aa   : > { %4156 = vmatpush.xpose.msra.mxu0 %v3523_v23  ;;  %4193 = vmatpush.xpose.msrb.mxu1 %v3615_v53  ;;  %3335 = vst.msk [vmem:[#allocation3 + $0x14] sm:$0x1] %vm9478_vm7, %v3333_v30  ;;  %v3339_v18 = vpop.permute.xlu0 %3338  ;;  %vm9494_vm7 = vnez %v9394_v25  ;;  %v3582_v25 = vld [vmem:[#allocation7 + $0x340] sm:$0xff]  ;;  %v3557_v53 = vld [vmem:[#allocation7 + $0x278] sm:$0xff]  ;;  %v3711_v61 = vld [vmem:[#allocation7 + $0x748] sm:$0xff] }
 0x6ab   : > { %v3340_v29 = vrot.slane %v3339_v18, 7  ;;  %3431 = vst.msk [vmem:[#allocation3 + $0x1a] sm:$0x1] %vm9479_vm13, %v3429_v44  ;;  %vm9495_vm13 = vnez %v9396_v54  ;;  %v3584_v54 = vld [vmem:[#allocation7 + $0x350] sm:$0xff]  ;;  %v3554_v23 = vld [vmem:[#allocation7 + $0x260] sm:$0xff] }
 0x6ac   : > { %v9514_v30 = vld [vmem:[#allocation54_spill] sm:$0xff]  ;;  %v3522_v44 = vld [vmem:[#allocation7 + $0x160] sm:$0xff] }
 0x6ad   : > { %4057 = vmatpush.xpose.msrb.mxu2 %v3488_v4  ;;  %4097 = vmatpush.xpose.msrb.mxu3 %v3490_v36  ;;  %v3341_v6 = vsel %vm9480_vm2, %v3340_v29, %v3339_v18  ;;  %vm9496_vm2 = vmand %vm9494_vm7, %vm9495_vm13  ;;  %v3527_v18 = vld [vmem:[#allocation7 + $0x188] sm:$0xff]  ;;  %vm9517_vm7 = vcmask 818176   ;;  %vm9518_vm13 = vnez %v9424_v1 }
 0x6ae   : > { %4157 = vmatpush.xpose.msra.mxu0 %v3493_v43  ;;  %4194 = vmatpush.xpose.msrb.mxu1 %v3585_v22  ;;  %3343 = vst.msk [vmem:[#allocation3 + $0x14] sm:$0x3] %vm9483_vm14, %v3341_v6  ;;  %vm9500_vm14 = vmand %vm9497_vm8, %vm9499_vm15  ;;  %v9507_v43 = vld [vmem:[#allocation53_spill] sm:$0xff]  ;;  %v3494_v6 = vld [vmem:[#allocation7 + $0x80] sm:$0xff]  ;;  %vm9521_vm15 = vnez %v9428_v9 }
 0x6af   : > { %vm9508_vm3 = vnez %v9507_v43  ;;  %v3619_v29 = vld [vmem:[#allocation7 + $0x468] sm:$0xff]  ;;  %v3713_v43 = vld [vmem:[#allocation7 + $0x758] sm:$0xff] }
 0x6b0   : > { %4058 = vmatmul.f32.vlgmr.msrb.gmra.mxu2 %v3763_v5  ;;  %4098 = vmatmul.f32.vlgmr.msrb.gmra.mxu3 %v3765_v10  ;;  %v3492_v10 = vld [vmem:[#allocation7 + $0x70] sm:$0xff] }
 0x6b1   : > { %4129 = vmatpush.xpose.msra.mxu2 %v3732_v60  ;;  %4169 = vmatpush.xpose.msra.mxu3 %v3734_v2  ;;  %v3353_v27 = vpop.permute.xlu1 %3352  ;;  %v3649_v60 = vld [vmem:[#allocation7 + $0x558] sm:$0xff]  ;;  %v3443_v5 = vpop.permute.xlu2 %3442 }
 0x6b2   : > { %4229 = vmatpush.xpose.msrb.mxu0 %v3737_v50  ;;  %4195 = vmatpush.xpose.msrb.mxu1 %v3555_v52  ;;  %v3347_v55 = vpop.permute.xlu0 %3346  ;;  %v9512_v2 = vld [vmem:[#allocation47_spill] sm:$0xff]  ;;  %v3524_v50 = vld [vmem:[#allocation7 + $0x170] sm:$0xff] }
 0x6b3   : > { %4158 = vmatmul.f32.vlgmr.msra.gmra.mxu0 %v3768_v39  ;;  %3349 = vst.msk [vmem:[#allocation3 + $0x15] sm:$0x1] %vm9485_vm0, %v3347_v55  ;;  %vm9504_vm0 = vnez %v9503_v37  ;;  %vm9513_vm5 = vnez %v9512_v2  ;;  %v3736_v52 = vld [vmem:[#allocation7 + $0x810] sm:$0xff]  ;;  %v3646_v37 = vld [vmem:[#allocation7 + $0x540] sm:$0xff] }
 0x6b4   : > { %3355 = vst.msk [vmem:[#allocation3 + $0x15] sm:$0x1] %vm9489_vm10, %v3353_v27  ;;  %vm9505_vm6 = vmand %vm9502_vm1, %vm9504_vm0  ;;  %vm9525_vm0 = vcmask 850944   ;;  %v3558_v2 = vld [vmem:[#allocation7 + $0x280] sm:$0xff] }
 0x6b5   : > { %4130 = vmatpush.xpose.msra.mxu2 %v3702_v41  ;;  %4170 = vmatpush.xpose.msra.mxu3 %v3704_v42  ;;  %3363 = vst.msk [vmem:[#allocation3 + $0x15] sm:$0x3] %vm9492_vm11, %v3361_v38  ;;  %vm9515_vm11 = vnez %v9514_v30  ;;  %v3497_v41 = vld [vmem:[#allocation7 + $0x98] sm:$0xff] }
 0x6b6   : > { %4230 = vmatpush.xpose.msrb.mxu0 %v3707_v59  ;;  %4196 = vmatpush.xpose.msrb.mxu1 %v3525_v24  ;;  %vm9516_vm9 = vmand %vm9513_vm5, %vm9515_vm11  ;;  %v3589_v24 = vld [vmem:[#allocation7 + $0x378] sm:$0xff]  ;;  %vm9534_vm5 = vnez %v9437_v49  ;;  %vm9535_vm11 = vnez %v9439_v40  ;;  %v3588_v49 = vld [vmem:[#allocation7 + $0x370] sm:$0xff] }
 0x6b7   : > { %v9526_v38 = vld [vmem:[#allocation30_spill] sm:$0xff]  ;;  %v3591_v40 = vld [vmem:[#allocation7 + $0x388] sm:$0xff] }
 0x6b8   : > { %v3561_v30 = vld [vmem:[#allocation7 + $0x298] sm:$0xff] }
 0x6b9   : > { %4131 = vmatpush.xpose.msra.mxu2 %v3672_v47  ;;  %4171 = vmatpush.xpose.msra.mxu3 %v3674_v21  ;;  %v3393_v3 = vpop.permute.xlu1 %3392  ;;  %v3738_v47 = vld [vmem:[#allocation7 + $0x820] sm:$0xff]  ;;  %v3741_v21 = vld [vmem:[#allocation7 + $0x838] sm:$0xff] }
 0x6ba   : > { %4231 = vmatpush.xpose.msrb.mxu0 %v3677_v13  ;;  %4197 = vmatpush.xpose.msrb.mxu1 %v3495_v20  ;;  %v3367_v34 = vpop.permute.xlu0 %3366  ;;  %v3394_v12 = vrot.slane %v3393_v3, 7  ;;  %v9522_v13 = vld [vmem:[#allocation55_spill] sm:$0xff]  ;;  %v3708_v20 = vld [vmem:[#allocation7 + $0x730] sm:$0xff] }
 0x6bb   : > { %3369 = vst.msk [vmem:[#allocation3 + $0x16] sm:$0x1] %vm9496_vm2, %v3367_v34  ;;  %vm9519_vm2 = vnez %v9426_v17  ;;  %v3678_v34 = vld [vmem:[#allocation7 + $0x640] sm:$0xff] }
 0x6bc   : > { %3377 = vst.msk [vmem:[#allocation3 + $0x16] sm:$0x3] %vm9500_vm14, %v3375_v46  ;;  %v3395_v36 = vsel %vm9506_vm4, %v3394_v12, %v3393_v3  ;;  %vm9520_vm8 = vmand %vm9518_vm13, %vm9519_vm2  ;;  %vm9523_vm14 = vnez %v9522_v13  ;;  %v3681_v46 = vld [vmem:[#allocation7 + $0x658] sm:$0xff]  ;;  %v3743_v12 = vld [vmem:[#allocation7 + $0x848] sm:$0xff]  ;;  %vm9538_vm13 = vnez %v9443_v32 }
 0x6bd   : > { %4132 = vmatpush.xpose.msra.mxu2 %v3642_v11  ;;  %4172 = vmatpush.xpose.msra.mxu3 %v3644_v48  ;;  %3383 = vst.msk [vmem:[#allocation3 + $0x17] sm:$0x1] %vm9505_vm6, %v8651_v57  ;;  %v9509_v57 = vld [vmem:[#allocation44_spill] sm:$0xff]  ;;  %vm9524_vm1 = vmand %vm9521_vm15, %vm9523_vm14  ;;  %vm9527_vm6 = vnez %v9526_v38  ;;  %v3767_v11 = vperm.slane %v8620_v26, 6  ;;  %v9528_v48 = vld [vmem:[#allocation33_spill] sm:$0xff]  ;;  %vm9541_vm15 = vnez %v9313_v28  ;;  %vm9542_vm14 = vnez %v9315_v8 }
 0x6be   : > { %4232 = vmatpush.xpose.msrb.mxu0 %v3647_v0  ;;  %4269 = vmatpush.xpose.msra.mxu1 %v3739_v58  ;;  %vm9510_vm10 = vnez %v9509_v57  ;;  %vm9529_vm4 = vnez %v9528_v48  ;;  %v3706_v0 = vld [vmem:[#allocation7 + $0x720] sm:$0xff]  ;;  %v3559_v58 = vld [vmem:[#allocation7 + $0x288] sm:$0xff]  ;;  %v3556_v32 = vld [vmem:[#allocation7 + $0x270] sm:$0xff] }
 0x6bf   : > { %vm9511_vm12 = vmand %vm9508_vm3, %vm9510_vm10  ;;  %vm9530_vm3 = vcmask 654336   ;;  %vm9532_vm10 = vnez %v9531_v35  ;;  %v3586_v57 = vld [vmem:[#allocation7 + $0x360] sm:$0xff]  ;;  %v3623_v8 = vld [vmem:[#allocation7 + $0x488] sm:$0xff] }
 0x6c0   : > { %v3526_v28 = vld [vmem:[#allocation7 + $0x180] sm:$0xff]  ;;  %v3563_v13 = vld [vmem:[#allocation7 + $0x2a8] sm:$0xff]  ;;  %v3565_v35 = vld [vmem:[#allocation7 + $0x2b8] sm:$0xff] }
 0x6c1   : > { %4133 = vmatpush.xpose.msra.mxu2 %v3612_v63  ;;  %4173 = vmatpush.xpose.msra.mxu3 %v3614_v15  ;;  %v3407_v45 = vpop.permute.xlu1 %3406  ;;  %v3676_v63 = vld [vmem:[#allocation7 + $0x630] sm:$0xff]  ;;  %v3457_v15 = vpop.permute.xlu2 %3456  ;;  %v3650_v38 = vld [vmem:[#allocation7 + $0x560] sm:$0xff]  ;;  %v3503_v48 = vld [vmem:[#allocation7 + $0xc8] sm:$0xff] }
 0x6c2   : > { %4233 = vmatpush.xpose.msrb.mxu0 %v3617_v33  ;;  %4270 = vmatpush.xpose.msra.mxu1 %v3709_v51  ;;  %v3387_v4 = vpop.permute.xlu0 %3386  ;;  %v3408_v22 = vrot.slane %v3407_v45, 7  ;;  %v3529_v51 = vld [vmem:[#allocation7 + $0x198] sm:$0xff] }
 0x6c3   : > { %3389 = vst.msk [vmem:[#allocation3 + $0x17] sm:$0x1] %vm9511_vm12, %v3387_v4  ;;  %vm9533_vm12 = vnez %v9310_v7  ;;  %v3621_v4 = vld [vmem:[#allocation7 + $0x478] sm:$0xff] }
 0x6c4   : > { %3397 = vst.msk [vmem:[#allocation3 + $0x17] sm:$0x3] %vm9516_vm9, %v3395_v36  ;;  %v3409_v62 = vsel %vm9517_vm7, %v3408_v22, %v3407_v45  ;;  %vm9536_vm9 = vmand %vm9534_vm5, %vm9535_vm11  ;;  %vm9537_vm7 = vnez %v9441_v31  ;;  %v3683_v31 = vld [vmem:[#allocation7 + $0x668] sm:$0xff]  ;;  %v3496_v22 = vld [vmem:[#allocation7 + $0x90] sm:$0xff] }
 0x6c5   : > { %4134 = vmatpush.xpose.msra.mxu2 %v3582_v25  ;;  %4174 = vmatpush.xpose.msra.mxu3 %v3584_v54  ;;  %v3648_v25 = vld [vmem:[#allocation7 + $0x550] sm:$0xff]  ;;  %v3651_v54 = vld [vmem:[#allocation7 + $0x568] sm:$0xff]  ;;  %vm9539_vm2 = vmand %vm9537_vm7, %vm9538_vm13 }
 0x6c6   : > { %4234 = vmatpush.xpose.msrb.mxu0 %v3587_v56  ;;  %4271 = vmatpush.xpose.msra.mxu1 %v3679_v14  ;;  %v3499_v56 = vld [vmem:[#allocation7 + $0xa8] sm:$0xff]  ;;  %v3616_v14 = vld [vmem:[#allocation7 + $0x450] sm:$0xff] }
 0x6c9   : > { %4135 = vmatpush.xpose.msra.mxu2 %v3552_v16  ;;  %4175 = vmatpush.xpose.msra.mxu3 %v3554_v23  ;;  %v3435_v39 = vpop.permute.xlu1 %3434  ;;  %v3618_v23 = vld [vmem:[#allocation7 + $0x460] sm:$0xff]  ;;  %v3421_v36 = vpop.permute.xlu2 %3420 }
 0x6ca   : > { %4235 = vmatpush.xpose.msrb.mxu0 %v3557_v53  ;;  %4272 = vmatpush.xpose.msra.mxu1 %v3649_v60  ;;  %v3401_v42 = vpop.permute.xlu0 %3400  ;;  %v3436_v59 = vrot.slane %v3435_v39, 7 }
 0x6cb   : > { %3403 = vst.msk [vmem:[#allocation3 + $0x18] sm:$0x1] %vm9520_vm8, %v3401_v42  ;;  %v8740_v27 = vld [vmem:[#allocation3 + $0x10] sm:$0xff]  ;;  %vm9540_vm8 = vcmask 883712  }
 0x6cc   : > { %3411 = vst.msk [vmem:[#allocation3 + $0x18] sm:$0x3] %vm9524_vm1, %v3409_v62  ;;  %v3437_v55 = vsel %vm9525_vm0, %v3436_v59, %v3435_v39  ;;  %v3769_v1 = vperm.slane %v8740_v27, 0  ;;  %v3770_v17 = vperm.slane %v8740_v27, 1  ;;  %v3772_v9 = vperm.slane %v8740_v27, 3  ;;  %v3745_v39 = vld [vmem:[#allocation7 + $0x858] sm:$0xff] }
 0x6cd   : > { %4136 = vmatpush.xpose.msra.mxu2 %v3522_v44  ;;  %4176 = vmatpush.xpose.msra.mxu3 %v3524_v50  ;;  %3439 = vst.msk [vmem:[#allocation3 + $0x1a] sm:$0x3] %vm9527_vm6, %v3437_v55  ;;  %v3774_v53 = vperm.slane %v8740_v27, 5  ;;  %v3653_v44 = vld [vmem:[#allocation7 + $0x578] sm:$0xff]  ;;  %v3528_v50 = vld [vmem:[#allocation7 + $0x190] sm:$0xff]  ;;  %v3771_v42 = vperm.slane %v8740_v27, 2 }
 0x6ce   : > { %4236 = vmatpush.xpose.msrb.mxu0 %v3527_v18  ;;  %4273 = vmatpush.xpose.msra.mxu1 %v3619_v29  ;;  %3445 = vst.msk [vmem:[#allocation3 + $0x1b] sm:$0x1] %vm9529_vm4, %v3443_v5  ;;  %v3531_v18 = vld [vmem:[#allocation7 + $0x1a8] sm:$0xff]  ;;  %v3498_v29 = vld [vmem:[#allocation7 + $0xa0] sm:$0xff]  ;;  %v3740_v5 = vld [vmem:[#allocation7 + $0x830] sm:$0xff]  ;;  %v3773_v59 = vperm.slane %v8740_v27, 4 }
 0x6cf   : > { %4198 = vmatmul.f32.vlgmr.msrb.gmra.mxu1 %v3770_v17  ;;  %v3776_v62 = vperm.slane %v8740_v27, 7  ;;  %v3680_v55 = vld [vmem:[#allocation7 + $0x650] sm:$0xff]  ;;  %v3533_v17 = vld [vmem:[#allocation7 + $0x1b8] sm:$0xff]  ;;  %vm3812_vm1 = vcmask 261120   ;;  %vm4446_vm0 = vcmask 588800   ;;  %vm4476_vm6 = vcmask 73728  }
 0x6d1   : > { %4137 = vmatpush.xpose.msra.mxu2 %v3492_v10  ;;  %4177 = vmatpush.xpose.msra.mxu3 %v3494_v6  ;;  %v3469_v33 = vpop.permute.xlu1 %3468  ;;  %v3501_v10 = vld [vmem:[#allocation7 + $0xb8] sm:$0xff]  ;;  %v3742_v6 = vld [vmem:[#allocation7 + $0x840] sm:$0xff] }
 0x6d2   : > { %4237 = vmatpush.xpose.msrb.mxu0 %v3497_v41  ;;  %4274 = vmatpush.xpose.msra.mxu1 %v3589_v24  ;;  %v3449_v26 = vpop.permute.xlu0 %3448  ;;  %v3470_v16 = vrot.slane %v3469_v33, 7  ;;  %v3593_v41 = vld [vmem:[#allocation7 + $0x398] sm:$0xff]  ;;  %v3682_v24 = vld [vmem:[#allocation7 + $0x660] sm:$0xff] }
 0x6d3   : > { %v3450_v3 = vrot.slane %v3449_v26, 7 }
 0x6d4   : > { %4138 = vmatmul.f32.vlgmr.msra.gmra.mxu2 %v3767_v11  ;;  %4178 = vmatmul.f32.vlgmr.msra.gmra.mxu3 %v3769_v1  ;;  %v3471_v60 = vsel %vm9540_vm8, %v3470_v16, %v3469_v33  ;;  %v3685_v1 = vld [vmem:[#allocation7 + $0x678] sm:$0xff]  ;;  %v3652_v11 = vld [vmem:[#allocation7 + $0x570] sm:$0xff]  ;;  %v3502_v16 = vld [vmem:[#allocation7 + $0xc0] sm:$0xff] }
 0x6d5   : > { %4209 = vmatpush.xpose.msrb.mxu2 %v3736_v52  ;;  %4249 = vmatpush.xpose.msrb.mxu3 %v3738_v47  ;;  %v3451_v19 = vsel %vm9530_vm3, %v3450_v3, %v3449_v26  ;;  %v3710_v52 = vld [vmem:[#allocation7 + $0x740] sm:$0xff]  ;;  %v3712_v47 = vld [vmem:[#allocation7 + $0x750] sm:$0xff] }
 0x6d6   : > { %4309 = vmatpush.xpose.msra.mxu0 %v3741_v21  ;;  %4275 = vmatpush.xpose.msra.mxu1 %v3559_v58  ;;  %3453 = vst.msk [vmem:[#allocation3 + $0x1b] sm:$0x3] %vm9532_vm10, %v3451_v19  ;;  %v3715_v21 = vld [vmem:[#allocation7 + $0x768] sm:$0xff]  ;;  %v3622_v58 = vld [vmem:[#allocation7 + $0x480] sm:$0xff]  ;;  %v3592_v33 = vld [vmem:[#allocation7 + $0x390] sm:$0xff] }
 0x6d7   : > { %4238 = vmatmul.f32.vlgmr.msrb.gmra.mxu0 %v3772_v9  ;;  %3459 = vst.msk [vmem:[#allocation3 + $0x1c] sm:$0x1] %vm9533_vm12, %v3457_v15  ;;  %v3655_v9 = vld [vmem:[#allocation7 + $0x588] sm:$0xff]  ;;  %v3717_v15 = vld [vmem:[#allocation7 + $0x778] sm:$0xff]  ;;  %v3590_v3 = vld [vmem:[#allocation7 + $0x380] sm:$0xff] }
 0x6d8   : > { %v3562_v19 = vld [vmem:[#allocation7 + $0x2a0] sm:$0xff] }
 0x6d9   : > { %4210 = vmatpush.xpose.msrb.mxu2 %v3706_v0  ;;  %4250 = vmatpush.xpose.msrb.mxu3 %v3708_v20  ;;  %v3747_v0 = vld [vmem:[#allocation7 + $0x868] sm:$0xff] }
 0x6da   : > { %4310 = vmatpush.xpose.msra.mxu0 %v3711_v61  ;;  %4276 = vmatpush.xpose.msra.mxu1 %v3529_v51  ;;  %v3620_v61 = vld [vmem:[#allocation7 + $0x470] sm:$0xff] }
 0x6db   : > { %v3560_v51 = vld [vmem:[#allocation7 + $0x290] sm:$0xff] }
 0x6dc   : > { %v3415_v45 = vpop.permute.xlu0 %3414 }
 0x6dd   : > { %4211 = vmatpush.xpose.msrb.mxu2 %v3676_v63  ;;  %4251 = vmatpush.xpose.msrb.mxu3 %v3678_v34  ;;  %3417 = vst.msk [vmem:[#allocation3 + $0x19] sm:$0x1] %vm9536_vm9, %v3415_v45  ;;  %v3463_v7 = vpop.permute.xlu1 %3462  ;;  %v3625_v63 = vld [vmem:[#allocation7 + $0x498] sm:$0xff]  ;;  %v3595_v34 = vld [vmem:[#allocation7 + $0x3a8] sm:$0xff] }
 0x6de   : > { %4311 = vmatpush.xpose.msra.mxu0 %v3681_v46  ;;  %4277 = vmatpush.xpose.msra.mxu1 %v3499_v56  ;;  %3423 = vst.msk [vmem:[#allocation3 + $0x19] sm:$0x1] %vm9539_vm2, %v3421_v36  ;;  %v3687_v46 = vld [vmem:[#allocation7 + $0x688] sm:$0xff]  ;;  %v3505_v45 = vld [vmem:[#allocation7 + $0xd8] sm:$0xff]  ;;  %v3775_v36 = vperm.slane %v8740_v27, 6  ;;  %v3686_v27 = vld [vmem:[#allocation7 + $0x680] sm:$0xff] }
 0x6df   : > { %3465 = vst.msk [vmem:[#allocation3 + $0x1c] sm:$0x1] %vm9541_vm15, %v3463_v7  ;;  %v3535_v56 = vld [vmem:[#allocation7 + $0x1c8] sm:$0xff] }
 0x6e0   : > { %3473 = vst.msk [vmem:[#allocation3 + $0x1c] sm:$0x3] %vm9542_vm14, %v3471_v60  ;;  %v3716_v60 = vld [vmem:[#allocation7 + $0x770] sm:$0xff] }
 0x6e1   : > { %4212 = vmatpush.xpose.msrb.mxu2 %v3646_v37  ;;  %4252 = vmatpush.xpose.msrb.mxu3 %v3648_v25  ;;  %v3657_v37 = vld [vmem:[#allocation7 + $0x598] sm:$0xff]  ;;  %v3530_v25 = vld [vmem:[#allocation7 + $0x1a0] sm:$0xff] }
 0x6e2   : > { %4312 = vmatpush.xpose.msra.mxu0 %v3651_v54  ;;  %4349 = vmatpush.xpose.msrb.mxu1 %v3743_v12  ;;  %v3532_v54 = vld [vmem:[#allocation7 + $0x1b0] sm:$0xff]  ;;  %v3627_v12 = vld [vmem:[#allocation7 + $0x4a8] sm:$0xff] }
 0x6e3   : > { %4278 = vmatmul.f32.vlgmr.msra.gmra.mxu1 %v3774_v53  ;;  %v3746_v53 = vld [vmem:[#allocation7 + $0x860] sm:$0xff] }
 0x6e5   : > { %4213 = vmatpush.xpose.msrb.mxu2 %v3616_v14  ;;  %4253 = vmatpush.xpose.msrb.mxu3 %v3618_v23  ;;  %v3500_v14 = vld [vmem:[#allocation7 + $0xb0] sm:$0xff] }
 0x6e6   : > { %4313 = vmatpush.xpose.msra.mxu0 %v3621_v4  ;;  %4350 = vmatpush.xpose.msrb.mxu1 %v3713_v43  ;;  %v3744_v23 = vld [vmem:[#allocation7 + $0x850] sm:$0xff]  ;;  %v3597_v4 = vld [vmem:[#allocation7 + $0x3b8] sm:$0xff]  ;;  %v3714_v43 = vld [vmem:[#allocation7 + $0x760] sm:$0xff] }
 0x6e7   : > { %v8780_v20 = vld [vmem:[#allocation3 + $0x18] sm:$0x3f] }
 0x6e8   : > { %v3778_v26 = vperm.slane %v8780_v20, 1  ;;  %v3777_v7 = vperm.slane %v8780_v20, 0 }
 0x6e9   : > { %4214 = vmatpush.xpose.msrb.mxu2 %v3586_v57  ;;  %4254 = vmatpush.xpose.msrb.mxu3 %v3588_v49  ;;  %v3780_v57 = vperm.slane %v8780_v20, 3  ;;  %v3567_v49 = vld [vmem:[#allocation7 + $0x2c8] sm:$0xff] }
 0x6ea   : > { %4314 = vmatpush.xpose.msra.mxu0 %v3591_v40  ;;  %4351 = vmatpush.xpose.msrb.mxu1 %v3683_v31  ;;  %v3684_v40 = vld [vmem:[#allocation7 + $0x670] sm:$0xff]  ;;  %v3537_v31 = vld [vmem:[#allocation7 + $0x1d8] sm:$0xff] }
 0x6ed   : > { %4215 = vmatpush.xpose.msrb.mxu2 %v3556_v32  ;;  %4255 = vmatpush.xpose.msrb.mxu3 %v3558_v2  ;;  %v3654_v32 = vld [vmem:[#allocation7 + $0x580] sm:$0xff]  ;;  %v3656_v2 = vld [vmem:[#allocation7 + $0x590] sm:$0xff] }
 0x6ee   : > { %4315 = vmatpush.xpose.msra.mxu0 %v3561_v30  ;;  %4352 = vmatpush.xpose.msrb.mxu1 %v3653_v44  ;;  %v3507_v30 = vld [vmem:[#allocation7 + $0xe8] sm:$0xff]  ;;  %v3624_v44 = vld [vmem:[#allocation7 + $0x490] sm:$0xff] }
 0x6f1   : > { %4216 = vmatpush.xpose.msrb.mxu2 %v3526_v28  ;;  %4256 = vmatpush.xpose.msrb.mxu3 %v3528_v50  ;;  %v3626_v28 = vld [vmem:[#allocation7 + $0x4a0] sm:$0xff]  ;;  %v3782_v50 = vperm.slane %v8780_v20, 5 }
 0x6f2   : > { %4316 = vmatpush.xpose.msra.mxu0 %v3531_v18  ;;  %4353 = vmatpush.xpose.msrb.mxu1 %v3623_v8  ;;  %v3594_v18 = vld [vmem:[#allocation7 + $0x3a0] sm:$0xff]  ;;  %v3596_v8 = vld [vmem:[#allocation7 + $0x3b0] sm:$0xff] }
 0x6f5   : > { %4217 = vmatpush.xpose.msrb.mxu2 %v3496_v22  ;;  %4257 = vmatpush.xpose.msrb.mxu3 %v3498_v29  ;;  %v3564_v22 = vld [vmem:[#allocation7 + $0x2b0] sm:$0xff]  ;;  %v3566_v29 = vld [vmem:[#allocation7 + $0x2c0] sm:$0xff] }
 0x6f6   : > { %4317 = vmatpush.xpose.msra.mxu0 %v3501_v10  ;;  %4354 = vmatpush.xpose.msrb.mxu1 %v3593_v41  ;;  %v3536_v10 = vld [vmem:[#allocation7 + $0x1d0] sm:$0xff]  ;;  %v3779_v41 = vperm.slane %v8780_v20, 2 }
 0x6f8   : > { %4218 = vmatmul.f32.vlgmr.msrb.gmra.mxu2 %v3771_v42  ;;  %4258 = vmatmul.f32.vlgmr.msrb.gmra.mxu3 %v3773_v59  ;;  %v3781_v42 = vperm.slane %v8780_v20, 4  ;;  %v3859_v59 = vpop.f32.mrf.mxu2 }
 0x6f9   : > { %4289 = vmatpush.xpose.msra.mxu2 %v3740_v5  ;;  %4329 = vmatpush.xpose.msra.mxu3 %v3742_v6  ;;  %v3534_v5 = vld [vmem:[#allocation7 + $0x1c0] sm:$0xff]  ;;  %v3504_v6 = vld [vmem:[#allocation7 + $0xd0] sm:$0xff] }
 0x6fa   : > { %4389 = vmatpush.xpose.msrb.mxu0 %v3745_v39  ;;  %4355 = vmatpush.xpose.msrb.mxu1 %v3563_v13  ;;  %v3506_v39 = vld [vmem:[#allocation7 + $0xe0] sm:$0xff] }
 0x6fb   : > { %4318 = vmatmul.f32.vlgmr.msra.gmra.mxu0 %v3776_v62 }
 0x6fd   : > { %4290 = vmatpush.xpose.msra.mxu2 %v3710_v52  ;;  %4330 = vmatpush.xpose.msra.mxu3 %v3712_v47  ;;  %v3748_v52 = vld [vmem:[#allocation9] sm:$0x1]  ;;  %v3879_v47 = vpop.f32.mrf.mxu3 }
 0x6fe   : > { %4390 = vmatpush.xpose.msrb.mxu0 %v3715_v21  ;;  %4356 = vmatpush.xpose.msrb.mxu1 %v3533_v17  ;;  %v3860_v62 = vadd.f32 %v3859_v59, %v3748_v52  ;;  %v4445_v59 = vld [vmem:[#allocation12] sm:$0x1] }
 0x700   : > { %v3899_v21 = vpop.f32.mrf.mxu2  ;;  %v3880_v13 = vadd.f32 %v3879_v47, %v3860_v62 }
 0x701   : > { %4291 = vmatpush.xpose.msra.mxu2 %v3680_v55  ;;  %4331 = vmatpush.xpose.msra.mxu3 %v3682_v24  ;;  %v3919_v24 = vpop.f32.mrf.mxu0 }
 0x702   : > { %4391 = vmatpush.xpose.msrb.mxu0 %v3685_v1  ;;  %4357 = vmatpush.xpose.msrb.mxu1 %v3503_v48  ;;  %v3900_v55 = vadd.f32 %v3899_v21, %v3880_v13 }
 0x704   : > { %v3920_v1 = vadd.f32 %v3919_v24, %v3900_v55 }
 0x705   : > { %4292 = vmatpush.xpose.msra.mxu2 %v3650_v38  ;;  %4332 = vmatpush.xpose.msra.mxu3 %v3652_v11  ;;  %v3939_v17 = vpop.f32.mrf.mxu3  ;;  %v3959_v11 = vpop.f32.mrf.mxu1 }
 0x706   : > { %4392 = vmatpush.xpose.msrb.mxu0 %v3655_v9  ;;  %5268 = vmatpush.xpose.msk.msra.mxu1 %vm3812_vm1, %v3747_v0  ;;  %v3940_v38 = vadd.f32 %v3939_v17, %v3920_v1 }
 0x707   : > { %4358 = vmatmul.f32.vlgmr.msrb.gmra.mxu1 %v3778_v26 }
 0x708   : > { %v3960_v48 = vadd.f32 %v3959_v11, %v3940_v38 }
 0x709   : > { %4293 = vmatpush.xpose.msra.mxu2 %v3620_v61  ;;  %4333 = vmatpush.xpose.msra.mxu3 %v3622_v58  ;;  %v3999_v61 = vpop.f32.mrf.mxu0 }
 0x70a   : > { %4393 = vmatpush.xpose.msrb.mxu0 %v3625_v63  ;;  %5269 = vmatpush.xpose.msk.msra.mxu1 %vm3812_vm1, %v3717_v15 }
 0x70d   : > { %4294 = vmatpush.xpose.msra.mxu2 %v3590_v3  ;;  %4334 = vmatpush.xpose.msra.mxu3 %v3592_v33 }
 0x70e   : > { %4394 = vmatpush.xpose.msrb.mxu0 %v3595_v34  ;;  %5270 = vmatpush.xpose.msk.msra.mxu1 %vm3812_vm1, %v3687_v46 }
 0x70f   : > { %v3979_v9 = vpop.f32.mrf.mxu2 }
 0x710   : > { %v3980_v0 = vadd.f32 %v3979_v9, %v3960_v48 }
 0x711   : > { %4295 = vmatpush.xpose.msra.mxu2 %v3560_v51  ;;  %4335 = vmatpush.xpose.msra.mxu3 %v3562_v19 }
 0x712   : > { %4395 = vmatpush.xpose.msrb.mxu0 %v3565_v35  ;;  %5271 = vmatpush.xpose.msk.msra.mxu1 %vm3812_vm1, %v3657_v37  ;;  %v4000_v20 = vadd.f32 %v3999_v61, %v3980_v0 }
 0x715   : > { %4296 = vmatpush.xpose.msra.mxu2 %v3530_v25  ;;  %4336 = vmatpush.xpose.msra.mxu3 %v3532_v54  ;;  %v4039_v63 = vpop.f32.mrf.mxu1 }
 0x716   : > { %4396 = vmatpush.xpose.msrb.mxu0 %v3535_v56  ;;  %5272 = vmatpush.xpose.msk.msra.mxu1 %vm3812_vm1, %v3627_v12 }
 0x718   : > { %v4079_v34 = vpop.f32.mrf.mxu0 }
 0x719   : > { %4297 = vmatpush.xpose.msra.mxu2 %v3500_v14  ;;  %4337 = vmatpush.xpose.msra.mxu3 %v3502_v16 }
 0x71a   : > { %4397 = vmatpush.xpose.msrb.mxu0 %v3505_v45  ;;  %5273 = vmatpush.xpose.msk.msra.mxu1 %vm3812_vm1, %v3597_v4 }
 0x71b   : > { %v4019_v58 = vpop.f32.mrf.mxu3 }
 0x71c   : > { %4298 = vmatmul.f32.vlgmr.msra.gmra.mxu2 %v3775_v36  ;;  %4338 = vmatmul.f32.vlgmr.msra.gmra.mxu3 %v3777_v7  ;;  %v4020_v26 = vadd.f32 %v4019_v58, %v4000_v20  ;;  %v4444_v36 = vld [vmem:[#allocation10 + $0x8] sm:$0x3] }
 0x71d   : > { %4369 = vmatpush.xpose.msrb.mxu2 %v3744_v23  ;;  %4409 = vmatpush.xpose.msrb.mxu3 %v3746_v53  ;;  %v4119_v35 = vpop.f32.mrf.mxu1 }
 0x71e   : > { %4398 = vmatmul.f32.vlgmr.msrb.gmra.mxu0 %v3780_v57  ;;  %5274 = vmatpush.xpose.msk.msra.mxu1 %vm3812_vm1, %v3567_v49  ;;  %v4040_v3 = vadd.f32 %v4039_v63, %v4020_v26  ;;  %v4443_v57 = vld [vmem:[#allocation10] sm:$0xff] }
 0x721   : > { %4370 = vmatpush.xpose.msrb.mxu2 %v3714_v43  ;;  %4410 = vmatpush.xpose.msrb.mxu3 %v3716_v60 }
 0x722   : > { %5275 = vmatpush.xpose.msk.msra.mxu1 %vm3812_vm1, %v3537_v31 }
 0x725   : > { %4371 = vmatpush.xpose.msrb.mxu2 %v3684_v40  ;;  %4411 = vmatpush.xpose.msrb.mxu3 %v3686_v27 }
 0x726   : > { %5276 = vmatpush.xpose.msk.msra.mxu1 %vm3812_vm1, %v3507_v30 }
 0x729   : > { %4372 = vmatpush.xpose.msrb.mxu2 %v3654_v32  ;;  %4412 = vmatpush.xpose.msrb.mxu3 %v3656_v2 }
 0x72a   : > { %5277 = vmatmul.msk.f32.vlgmr.msra.gmra.mxu1 %vm3812_vm1, %v3782_v50 }
 0x72d   : > { %4373 = vmatpush.xpose.msrb.mxu2 %v3624_v44  ;;  %4413 = vmatpush.xpose.msrb.mxu3 %v3626_v28 }
 0x730   : > { %v4159_v56 = vpop.f32.mrf.mxu0 }
 0x731   : > { %4374 = vmatpush.xpose.msrb.mxu2 %v3594_v18  ;;  %4414 = vmatpush.xpose.msrb.mxu3 %v3596_v8 }
 0x733   : > { %v4059_v15 = vpop.f32.mrf.mxu2  ;;  %v4099_v51 = vpop.f32.mrf.mxu3 }
 0x734   : > { %v4060_v33 = vadd.f32 %v4059_v15, %v4040_v3 }
 0x735   : > { %4375 = vmatpush.xpose.msrb.mxu2 %v3564_v22  ;;  %4415 = vmatpush.xpose.msrb.mxu3 %v3566_v29 }
 0x736   : > { %v4080_v46 = vadd.f32 %v4079_v34, %v4060_v33 }
 0x738   : > { %v4100_v19 = vadd.f32 %v4099_v51, %v4080_v46 }
 0x739   : > { %4376 = vmatpush.xpose.msrb.mxu2 %v3534_v5  ;;  %4416 = vmatpush.xpose.msrb.mxu3 %v3536_v10 }
 0x73a   : > { %v4120_v25 = vadd.f32 %v4119_v35, %v4100_v19 }
 0x73d   : > { %4377 = vmatpush.xpose.msrb.mxu2 %v3504_v6  ;;  %4417 = vmatpush.xpose.msrb.mxu3 %v3506_v39 }
 0x740   : > { %4378 = vmatmul.f32.vlgmr.msrb.gmra.mxu2 %v3779_v41  ;;  %4418 = vmatmul.f32.vlgmr.msrb.gmra.mxu3 %v3781_v42 }
 0x741   : > { %5278 = vmatpush.xpose.msk.msra.mxu2 %vm4446_vm0, %v4444_v36 }
 0x745   : > { %5279 = vmatpush.xpose.msk.msra.mxu2 %vm4446_vm0, %v4443_v57 }
 0x74c   : > { %v4199_v23 = vpop.f32.mrf.mxu1 }
 0x754   : > { %v4239_v7 = vpop.f32.mrf.mxu0 }
 0x757   : > { %v4139_v37 = vpop.f32.mrf.mxu2  ;;  %v4179_v14 = vpop.f32.mrf.mxu3 }
 0x758   : > { %v4140_v54 = vadd.f32 %v4139_v37, %v4120_v25 }
 0x75a   : > { %v4160_v12 = vadd.f32 %v4159_v56, %v4140_v54 }
 0x75c   : > { %v4180_v16 = vadd.f32 %v4179_v14, %v4160_v12 }
 0x75e   : > { %v4200_v53 = vadd.f32 %v4199_v23, %v4180_v16 }
 0x760   : > { %v4279_v40 = vpop.f32.mrf.mxu1 }
 0x778   : > { %v4319_v2 = vpop.f32.mrf.mxu0 }
 0x77b   : > { %v4219_v45 = vpop.f32.mrf.mxu2  ;;  %v4259_v60 = vpop.f32.mrf.mxu3 }
 0x77c   : > { %v4220_v4 = vadd.f32 %v4219_v45, %v4200_v53 }
 0x77e   : > { %v4240_v43 = vadd.f32 %v4239_v7, %v4220_v4 }
 0x780   : > { %v4260_v49 = vadd.f32 %v4259_v60, %v4240_v43 }
 0x782   : > { %v4280_v31 = vadd.f32 %v4279_v40, %v4260_v49 }
 0x784   : > { %v4359_v50 = vpop.f32.mrf.mxu1 }
 0x79b   : > { %v4399_v29 = vpop.f32.mrf.mxu0 }
 0x79f   : > { %v4299_v27 = vpop.f32.mrf.mxu2  ;;  %v4339_v44 = vpop.f32.mrf.mxu3 }
 0x7a0   : > { %v4300_v32 = vadd.f32 %v4299_v27, %v4280_v31 }
 0x7a2   : > { %v4320_v30 = vadd.f32 %v4319_v2, %v4300_v32 }
 0x7a4   : > { %v4340_v28 = vadd.f32 %v4339_v44, %v4320_v30 }
 0x7a6   : > { %v4360_v18 = vadd.f32 %v4359_v50, %v4340_v28 }
 0x7a7   : > { %v4439_v39 = vpop.f32.mrf.mxu1 }
 0x7c3   : > { %v4379_v8 = vpop.f32.mrf.mxu2  ;;  %v4419_v10 = vpop.f32.mrf.mxu3 }
 0x7c4   : > { %v4380_v22 = vadd.f32 %v4379_v8, %v4360_v18 }
 0x7c6   : > { %v4400_v5 = vadd.f32 %v4399_v29, %v4380_v22 }
 0x7c8   : > { %v4420_v6 = vadd.f32 %v4419_v10, %v4400_v5 }
 0x7ca   : > { %v4440_v41 = vadd.f32 %v4439_v39, %v4420_v6 }
 0x7cc   : > { %v4442_v42 = vmax.f32 %v4440_v41, 0.0 }
 0x7ce   : > { %5280 = vmatmul.msk.f32.vlgmr.msra.gmra.mxu2 %vm4446_vm0, %v4442_v42 }
 0x851   : > { %v4473_v52 = vpop.f32.mrf.mxu2 }
 0x852   : > { %v4474_v62 = vadd.f32 %v4473_v52, %v4445_v59 }
 0x854   : > { %v4477_v47 = vsel %vm4476_vm6, %v4474_v62, -inf }
 0x855   : > { %4478 = vmax.xlane.f32.xlu0 %v4477_v47 }
 0x8c8   : > { %v4479_v21 = vpop.xlane.xlu0 %4478 }
 0x8c9   : > { %v4480_v13 = vsub.f32 %v4474_v62, %v4479_v21 }
 0x8cb   : > { %v4481_v55 = vmul.f32 1.442695, %v4480_v13 }
 0x8cd   : > { %5470 = vpow2.f32 %v4481_v55 }
 0x8d3   : > { %v5471_v24 = vpop.eup %5470 }
 0x8d4   : > { %v4483_v1 = vsel %vm4476_vm6, %v5471_v24, 0.0 }
 0x8d5   : > { %4484 = vadd.xlane.f32.xlu1 %v4483_v1 }
 0x948   : > { %v4485_v17 = vpop.xlane.xlu1 %4484 }
 0x949   : > { %5472 = vlog2.f32 %v4485_v17 }
 0x94f   : > { %v5473_v38 = vpop.eup %5472 }
 0x950   : > { %v4487_v11 = vmul.f32 0.6931472, %v5473_v38 }
 0x952   : > { %v4488_v9 = vsub.f32 %v4480_v13, %v4487_v11 }
 0x954   : > { %4489 = vst.msk [vmem:[%s464_s19] sm:$0x1] %vm4476_vm6, %v4488_v9 }
 0x955   : > { %5651 = shalt.err (!%p5648_p9)
}
 0x956   : > { %5310 = dma.vmem_to_hbm [thread:$0]  (%p5893_p4), %s4502_s7, 16, %s4504_s14, %s4491_s12  }
 0x957 PF: > { %s4515_s23 = sand.u32 1, %s5686_s17   ;;  %p9543_p10 = scmp.ge.s32.totalorder %s5698_s20, 2 }
 0x958   : > { %s4516_s26 = scalar_lea.sflag [#allocation6], %s4515_s23 }
 0x959   : > { %p5330_p13 = pnand %p9543_p10, %p5897_p6 }
 0x95b   : > { %p5331_p11 = pneg %p5330_p13 }
 0x95d   : > { %5681 = dma.done.wait (%p5331_p11), %s4516_s26, 16  }
 0x95e   : > { %5683 = vsyncadd (%p5331_p11), %s4516_s26, 4294967280  ;;  %s9544_s16 = sld [smem:[#allocation18_spill]]  ;;  %p26_p0 = scmp.ge.s32.totalorder %s5867_s22, 4  }
 0x95f   : > { %s9545_s19 = sld [smem:[#allocation19_spill]]  ;;  %s9546_s17 = smov %s5690_s18 }
 0x960   : > { %s9548_s20 = smov %s5867_s22  ;;  %28 = sbr.rel (!%p26_p0) target bundleno = 12 (0xc), region = 129 }
 0x964   : > { %s9547_s18 = smov %s9544_s16 }
 0x965   :  { %4521 = vsyncpa [#allocation5], 1 }
 0x966   :  { %4523 = vsyncpa [#allocation5 + $0x1], 1 }
 0x967   :  { %4524 = vsyncpa [#allocation8], 1 }
 0x968   :  { %4525 = vsyncpa [#allocation11], 1 }
 0x969   :  { %4526 = vsyncpa [#allocation6], 1 }
 0x96a   :  { %4528 = vsyncpa [#allocation6 + $0x1], 1 }

</bundles_post_ra>
